<compile_context>
chip_gen: v7x
topology: tpu7x:2x2x1
jax: 0.10.0
libtpu: 0.0.40
codegen_flags: <defaults>
</compile_context>

<pallas_src>
import functools

import jax
import jax.numpy as jnp
from jax.experimental import pallas as pl
from jax.experimental.pallas import tpu as pltpu

EPS = 1e-5
LANE = 128


def _round_up(x, m):
    return (x + m - 1) // m * m


# ---------------------------------------------------------------------------
# Pallas kernels
# ---------------------------------------------------------------------------
def _make_conv1_kernel(stride, Ho, Wo, Cin, Cpad, has_proj):
    """conv1 (3x3, stride) as 9 accumulated bf16 matmuls (+ fused 1x1 shortcut).

    Emits the raw conv output y1 (f32) plus per-image [sum; sum_sq] partials so
    batch-norm statistics can be finalized across the whole batch afterwards.
    """
    M = Ho * Wo
    taps = [(kh, kw) for kh in range(3) for kw in range(3)]

    def kernel(*refs):
        if has_proj:
            ph_ref, w1_ref, wsc_ref, y1_ref, st1_ref, ysc_ref, stsc_ref = refs
        else:
            ph_ref, w1_ref, y1_ref, st1_ref = refs

        acc = jnp.zeros((M, Cpad), jnp.float32)
        for t, (kh, kw) in enumerate(taps):
            p = (kh % stride) * stride + (kw % stride)          # polyphase index
            r0, c0 = kh // stride, kw // stride                 # static offsets
            tap = ph_ref[0, p, r0:r0 + Ho, c0:c0 + Wo, :].reshape(M, Cin)
            acc = acc + jnp.dot(tap, w1_ref[t],
                                preferred_element_type=jnp.float32)
        y1_ref[0] = acc
        st1_ref[0, 0:1, :] = jnp.sum(acc, axis=0, keepdims=True)
        st1_ref[0, 1:2, :] = jnp.sum(acc * acc, axis=0, keepdims=True)

        if has_proj:
            # 1x1 strided shortcut conv reads the same resident input block.
            psc = (1 % stride) * stride + (1 % stride)
            o = 1 // stride
            xs = ph_ref[0, psc, o:o + Ho, o:o + Wo, :].reshape(M, Cin)
            ysc = jnp.dot(xs, wsc_ref[...], preferred_element_type=jnp.float32)
            ysc_ref[0] = ysc
            stsc_ref[0, 0:1, :] = jnp.sum(ysc, axis=0, keepdims=True)
            stsc_ref[0, 1:2, :] = jnp.sum(ysc * ysc, axis=0, keepdims=True)

    return kernel


def _make_conv2_kernel(Ho, Wo, Cpad):
    """Applies BN1+ReLU (scale/shift), then conv2 (3x3, stride 1) from a VMEM
    halo image; emits y2 (f32) + per-image BN2 partial stats."""
    M = Ho * Wo
    taps = [(kh, kw) for kh in range(3) for kw in range(3)]

    def kernel(y1_ref, s1_ref, w2_ref, y2_ref, st2_ref, img_ref):
        scale = s1_ref[0:1, :]
        shift = s1_ref[1:2, :]
        out1 = jnp.maximum(y1_ref[0] * scale + shift, 0.0)        # (M, Cpad) f32

        img_ref[...] = jnp.zeros_like(img_ref)                    # zero halo
        img_ref[1:1 + Ho, 1:1 + Wo, :] = (
            out1.reshape(Ho, Wo, Cpad).astype(img_ref.dtype))     # bf16 image

        acc = jnp.zeros((M, Cpad), jnp.float32)
        for t, (kh, kw) in enumerate(taps):
            tap = img_ref[kh:kh + Ho, kw:kw + Wo, :].reshape(M, Cpad)
            acc = acc + jnp.dot(tap, w2_ref[t],
                                preferred_element_type=jnp.float32)
        y2_ref[0] = acc
        st2_ref[0, 0:1, :] = jnp.sum(acc, axis=0, keepdims=True)
        st2_ref[0, 1:2, :] = jnp.sum(acc * acc, axis=0, keepdims=True)

    return kernel


def _final_proj_kernel(y2_ref, ysc_ref, s2_ref, ssc_ref, o_ref):
    """out = relu(BN2(y2) + BNsc(ysc)) via precomputed scale/shift."""
    y2 = y2_ref[0] * s2_ref[0:1, :] + s2_ref[1:2, :]
    sc = ysc_ref[0] * ssc_ref[0:1, :] + ssc_ref[1:2, :]
    o_ref[0] = jnp.maximum(y2 + sc, 0.0)


def _final_identity_kernel(y2_ref, sc_ref, s2_ref, o_ref):
    """out = relu(BN2(y2) + x)  (identity shortcut)."""
    y2 = y2_ref[0] * s2_ref[0:1, :] + s2_ref[1:2, :]
    o_ref[0] = jnp.maximum(y2 + sc_ref[0], 0.0)


# ---------------------------------------------------------------------------
# Glue (polyphase decomposition, weight packing, BN finalization)
# ---------------------------------------------------------------------------
def _phase_decompose(x_nhwc, stride):
    """Zero-pad by 1 px and split into stride*stride polyphase components.

    Total data == padded input (no 9x im2col duplication).  Each 3x3 tap of a
    stride-s conv (and the strided 1x1 shortcut) becomes a contiguous, static
    window of one phase inside the kernel.
    """
    xp = jnp.pad(x_nhwc, ((0, 0), (1, 1), (1, 1), (0, 0)))
    _, Hp, Wp, _ = xp.shape
    Hph = -(-Hp // stride)
    Wph = -(-Wp // stride)
    parts = []
    for ph in range(stride):
        for pw in range(stride):
            v = xp[:, ph::stride, pw::stride, :]
            v = jnp.pad(v, ((0, 0), (0, Hph - v.shape[1]),
                            (0, Wph - v.shape[2]), (0, 0)))
            parts.append(v)
    return jnp.stack(parts, axis=1)          # (B, stride*stride, Hph, Wph, C)


def _prep_w3x3(w_oihw, Cpad, pad_in_to=None):
    """torch (Cout,Cin,3,3) -> (9, Cin[_pad], Cpad) bf16, zero-padded Cout."""
    Cout, Cin = w_oihw.shape[0], w_oihw.shape[1]
    w = jnp.transpose(w_oihw, (2, 3, 1, 0)).reshape(9, Cin, Cout)
    pin = 0 if pad_in_to is None else pad_in_to - Cin
    w = jnp.pad(w, ((0, 0), (0, pin), (0, Cpad - Cout)))
    return w.astype(jnp.bfloat16)


def _prep_w1x1(w_oihw, Cpad):
    Cout, Cin = w_oihw.shape[0], w_oihw.shape[1]
    w = jnp.transpose(w_oihw, (2, 3, 1, 0)).reshape(Cin, Cout)
    return jnp.pad(w, ((0, 0), (0, Cpad - Cout))).astype(jnp.bfloat16)


def _bn_scale_shift(stats, gamma, beta, n_rows, Cpad):
    """Training-mode BN from per-image [sum; sum_sq] partials -> (2, Cpad)
    [scale; shift] with scale = gamma*rsqrt(var+eps), shift = beta - mean*scale."""
    total = jnp.sum(stats[:, 0, :], axis=0)
    total_sq = jnp.sum(stats[:, 1, :], axis=0)
    mean = total / n_rows
    var = jnp.maximum(total_sq / n_rows - mean * mean, 0.0)     # biased (PyTorch)
    g = jnp.pad(gamma, (0, Cpad - gamma.shape[0]))
    b = jnp.pad(beta, (0, Cpad - beta.shape[0]))
    scale = g * jax.lax.rsqrt(var + EPS)
    shift = b - mean * scale
    return jnp.stack([scale, shift], axis=0).astype(jnp.float32)


def init_basicblock_params(key, in_planes, planes, stride):
    """Deterministic synthetic parameters (PyTorch weight layout [Cout,Cin,kh,kw])."""
    ks = jax.random.split(key, 9)
    p = {
        "w1": jax.random.normal(ks[0], (planes, in_planes, 3, 3), jnp.float32) * 0.1,
        "g1": jax.random.uniform(ks[1], (planes,), jnp.float32, 0.5, 1.5),
        "b1": jax.random.normal(ks[2], (planes,), jnp.float32) * 0.1,
        "w2": jax.random.normal(ks[3], (planes, planes, 3, 3), jnp.float32) * 0.1,
        "g2": jax.random.uniform(ks[4], (planes,), jnp.float32, 0.5, 1.5),
        "b2": jax.random.normal(ks[5], (planes,), jnp.float32) * 0.1,
    }
    p["has_proj"] = (stride != 1) or (in_planes != planes)
    if p["has_proj"]:
        p["wsc"] = jax.random.normal(ks[6], (planes, in_planes, 1, 1), jnp.float32) * 0.1
        p["gsc"] = jax.random.uniform(ks[7], (planes,), jnp.float32, 0.5, 1.5)
        p["bsc"] = jax.random.normal(ks[8], (planes,), jnp.float32) * 0.1
    p["stride"] = stride
    return p


# ---------------------------------------------------------------------------
# Forward
# ---------------------------------------------------------------------------
def basicblock_forward(x_nchw, p):
    """BasicBlock forward.  x: NCHW float32.  Returns NCHW float32."""
    stride = p["stride"]
    planes = p["w1"].shape[0]
    cin = p["w1"].shape[1]
    Cpad = _round_up(planes, LANE)                   # lane-dense outputs
    has_proj = p["has_proj"]

    x = jnp.transpose(x_nchw, (0, 2, 3, 1)).astype(jnp.float32)    # -> NHWC
    B, H, W, _ = x.shape
    Ho = (H - 1) // stride + 1
    Wo = (W - 1) // stride + 1
    M = Ho * Wo
    n_rows = B * M

    parallel = pltpu.CompilerParams(dimension_semantics=("parallel",))

    # ---- stage 1: conv1 (+ fused projection shortcut), per-image partial stats
    phases = _phase_decompose(x, stride).astype(jnp.bfloat16)
    P = stride * stride
    _, _, Hph, Wph, _ = phases.shape
    w1 = _prep_w3x3(p["w1"], Cpad)

    k1 = _make_conv1_kernel(stride, Ho, Wo, cin, Cpad, has_proj)
    in_specs = [
        pl.BlockSpec((1, P, Hph, Wph, cin), lambda b: (b, 0, 0, 0, 0)),
        pl.BlockSpec((9, cin, Cpad), lambda b: (0, 0, 0)),      # resident weights
    ]
    out_shape = [
        jax.ShapeDtypeStruct((B, M, Cpad), jnp.float32),        # y1 (pre-BN)
        jax.ShapeDtypeStruct((B, 2, Cpad), jnp.float32),        # [sum; sum_sq]
    ]
    out_specs = [
        pl.BlockSpec((1, M, Cpad), lambda b: (b, 0, 0)),
        pl.BlockSpec((1, 2, Cpad), lambda b: (b, 0, 0)),
    ]
    args = [phases, w1]
    if has_proj:
        wsc = _prep_w1x1(p["wsc"], Cpad)
        in_specs.append(pl.BlockSpec((cin, Cpad), lambda b: (0, 0)))
        out_shape += [jax.ShapeDtypeStruct((B, M, Cpad), jnp.float32),
                      jax.ShapeDtypeStruct((B, 2, Cpad), jnp.float32)]
        out_specs += [pl.BlockSpec((1, M, Cpad), lambda b: (b, 0, 0)),
                      pl.BlockSpec((1, 2, Cpad), lambda b: (b, 0, 0))]
        args.append(wsc)

    res1 = pl.pallas_call(
        k1, grid=(B,), in_specs=in_specs, out_specs=out_specs,
        out_shape=out_shape, compiler_params=parallel)(*args)
    if has_proj:
        y1, st1, ysc, stsc = res1
        ssc = _bn_scale_shift(stsc, p["gsc"], p["bsc"], n_rows, Cpad)
    else:
        y1, st1 = res1
    s1 = _bn_scale_shift(st1, p["g1"], p["b1"], n_rows, Cpad)

    # ---- stage 2: BN1+ReLU in-kernel, conv2 from a VMEM halo image
    w2 = _prep_w3x3(p["w2"], Cpad, pad_in_to=Cpad)
    k2 = _make_conv2_kernel(Ho, Wo, Cpad)
    y2, st2 = pl.pallas_call(
        k2, grid=(B,),
        in_specs=[pl.BlockSpec((1, M, Cpad), lambda b: (b, 0, 0)),
                  pl.BlockSpec((2, Cpad), lambda b: (0, 0)),
                  pl.BlockSpec((9, Cpad, Cpad), lambda b: (0, 0, 0))],
        out_specs=[pl.BlockSpec((1, M, Cpad), lambda b: (b, 0, 0)),
                   pl.BlockSpec((1, 2, Cpad), lambda b: (b, 0, 0))],
        out_shape=[jax.ShapeDtypeStruct((B, M, Cpad), jnp.float32),
                   jax.ShapeDtypeStruct((B, 2, Cpad), jnp.float32)],
        scratch_shapes=[pltpu.VMEM((Ho + 2, Wo + 2, Cpad), jnp.bfloat16)],
        compiler_params=parallel)(y1, s1, w2)
    s2 = _bn_scale_shift(st2, p["g2"], p["b2"], n_rows, Cpad)

    # ---- stage 3: BN2 + shortcut add + ReLU (streaming, lane-dense)
    if has_proj:
        out = pl.pallas_call(
            _final_proj_kernel, grid=(B,),
            in_specs=[pl.BlockSpec((1, M, Cpad), lambda b: (b, 0, 0)),
                      pl.BlockSpec((1, M, Cpad), lambda b: (b, 0, 0)),
                      pl.BlockSpec((2, Cpad), lambda b: (0, 0)),
                      pl.BlockSpec((2, Cpad), lambda b: (0, 0))],
            out_specs=pl.BlockSpec((1, M, Cpad), lambda b: (b, 0, 0)),
            out_shape=jax.ShapeDtypeStruct((B, M, Cpad), jnp.float32),
            compiler_params=parallel)(y2, ysc, s2, ssc)
    else:
        sc = jnp.pad(x.reshape(B, M, cin), ((0, 0), (0, 0), (0, Cpad - cin)))
        out = pl.pallas_call(
            _final_identity_kernel, grid=(B,),
            in_specs=[pl.BlockSpec((1, M, Cpad), lambda b: (b, 0, 0)),
                      pl.BlockSpec((1, M, Cpad), lambda b: (b, 0, 0)),
                      pl.BlockSpec((2, Cpad), lambda b: (0, 0))],
            out_specs=pl.BlockSpec((1, M, Cpad), lambda b: (b, 0, 0)),
            out_shape=jax.ShapeDtypeStruct((B, M, Cpad), jnp.float32),
            compiler_params=parallel)(y2, sc, s2)

    out = out[:, :, :planes].reshape(B, Ho, Wo, planes)
    return jnp.transpose(out, (0, 3, 1, 2))                        # -> NCHW


# ---------------------------------------------------------------------------
# Pure-JAX references (f32 and bf16-matched precision)
# ---------------------------------------------------------------------------
def _ref_conv(x_nhwc, w_oihw, stride, pad, cast_bf16):
    w_hwio = jnp.transpose(w_oihw, (2, 3, 1, 0))
    if cast_bf16:
        x_nhwc = x_nhwc.astype(jnp.bfloat16)
        w_hwio = w_hwio.astype(jnp.bfloat16)
    return jax.lax.conv_general_dilated(
        x_nhwc, w_hwio, (stride, stride), ((pad, pad), (pad, pad)),
        dimension_numbers=("NHWC", "HWIO", "NHWC"),
        preferred_element_type=jnp.float32)


def _ref_bn(y, gamma, beta):
    mean = jnp.mean(y, axis=(0, 1, 2), keepdims=True)
    var = jnp.mean((y - mean) ** 2, axis=(0, 1, 2), keepdims=True)
    return (y - mean) * (gamma * jax.lax.rsqrt(var + EPS)) + beta


def basicblock_reference(x_nchw, p, cast_bf16=False):
    s = p["stride"]
    x = jnp.transpose(x_nchw, (0, 2, 3, 1)).astype(jnp.float32)
    out = jnp.maximum(
        _ref_bn(_ref_conv(x, p["w1"], s, 1, cast_bf16), p["g1"], p["b1"]), 0.0)
    out = _ref_bn(_ref_conv(out, p["w2"], 1, 1, cast_bf16), p["g2"], p["b2"])
    if p["has_proj"]:
        sc = _ref_bn(_ref_conv(x, p["wsc"], s, 0, cast_bf16), p["gsc"], p["bsc"])
    else:
        sc = x
    out = jnp.maximum(out + sc, 0.0)
    return jnp.transpose(out, (0, 3, 1, 2))


# ---------------------------------------------------------------------------
if __name__ == "__main__":
    key = jax.random.PRNGKey(0)

    configs = [
        dict(B=2, in_planes=4, planes=8, H=16, W=16, stride=2),   # projection shortcut
        dict(B=2, in_planes=8, planes=8, H=8, W=8, stride=1),     # identity shortcut
    ]
    for i, cfg in enumerate(configs):
        kx, kp, key = jax.random.split(key, 3)
        x = jax.random.normal(
            kx, (cfg["B"], cfg["in_planes"], cfg["H"], cfg["W"]), jnp.float32)
        params = init_basicblock_params(kp, cfg["in_planes"], cfg["planes"],
                                        cfg["stride"])

        fwd = jax.jit(functools.partial(basicblock_forward, p=params))
        out = jax.block_until_ready(fwd(x))

        Ho = (cfg["H"] - 1) // cfg["stride"] + 1
        Wo = (cfg["W"] - 1) // cfg["stride"] + 1
        assert out.shape == (cfg["B"], cfg["planes"], Ho, Wo), (i, out.shape)

        # tight check vs precision-matched (bf16 matmul operands) reference
        ref_bf16 = jax.block_until_ready(
            basicblock_reference(x, params, cast_bf16=True))
        err = float(jnp.max(jnp.abs(out - ref_bf16)))
        assert jnp.allclose(out, ref_bf16, atol=2e-2, rtol=2e-2), (i, err)

        # loose semantic check vs full-f32 reference (bf16 rounding noise only)
        ref_f32 = jax.block_until_ready(
            basicblock_reference(x, params, cast_bf16=False))
        assert jnp.allclose(out, ref_f32, atol=0.25, rtol=0.25), i

    print("KERNEL_OK")
</pallas_src>

<mosaic_0001>
module attributes {stable_mosaic.version = 11 : i64} {
  func.func @_final_proj_kernel(%arg0: i32, %arg1: memref<1x64x128xf32, #tpu.memory_space<vmem>>, %arg2: memref<1x64x128xf32, #tpu.memory_space<vmem>>, %arg3: memref<2x128xf32, #tpu.memory_space<vmem>>, %arg4: memref<2x128xf32, #tpu.memory_space<vmem>>, %arg5: memref<1x64x128xf32, #tpu.memory_space<vmem>>) attributes {dimension_semantics = [#tpu.dimension_semantics<parallel>], iteration_bounds = array<i64: 2>, scalar_prefetch = 0 : i64, scratch_operands = 0 : i64, tpu.core_type = #tpu.core_type<tc>, window_params = [{transform_indices = @transform_0, window_bounds = array<i64: 1, 64, 128>}, {transform_indices = @transform_1, window_bounds = array<i64: 1, 64, 128>}, {pipeline_mode = #tpu.pipeline_mode<synchronous>, transform_indices = @transform_2, window_bounds = array<i64: 2, 128>}, {pipeline_mode = #tpu.pipeline_mode<synchronous>, transform_indices = @transform_3, window_bounds = array<i64: 2, 128>}, {transform_indices = @transform_4, window_bounds = array<i64: 1, 64, 128>}]} {
    %c0 = arith.constant 0 : index
    %c0_0 = arith.constant 0 : index
    %c0_1 = arith.constant 0 : index
    %0 = vector.load %arg1[%c0, %c0_0, %c0_1] : memref<1x64x128xf32, #tpu.memory_space<vmem>>, vector<1x64x128xf32>
    %1 = vector.shape_cast %0 : vector<1x64x128xf32> to vector<64x128xf32>
    %c0_2 = arith.constant 0 : index
    %c0_3 = arith.constant 0 : index
    %2 = vector.load %arg3[%c0_2, %c0_3] : memref<2x128xf32, #tpu.memory_space<vmem>>, vector<1x128xf32>
    %3 = vector.broadcast %2 : vector<1x128xf32> to vector<64x128xf32>
    %4 = arith.mulf %1, %3 : vector<64x128xf32>
    %c1 = arith.constant 1 : index
    %c0_4 = arith.constant 0 : index
    %5 = vector.load %arg3[%c1, %c0_4] : memref<2x128xf32, #tpu.memory_space<vmem>>, vector<1x128xf32>
    %6 = vector.broadcast %5 : vector<1x128xf32> to vector<64x128xf32>
    %7 = arith.addf %4, %6 : vector<64x128xf32>
    %c0_5 = arith.constant 0 : index
    %c0_6 = arith.constant 0 : index
    %c0_7 = arith.constant 0 : index
    %8 = vector.load %arg2[%c0_5, %c0_6, %c0_7] : memref<1x64x128xf32, #tpu.memory_space<vmem>>, vector<1x64x128xf32>
    %9 = vector.shape_cast %8 : vector<1x64x128xf32> to vector<64x128xf32>
    %c0_8 = arith.constant 0 : index
    %c0_9 = arith.constant 0 : index
    %10 = vector.load %arg4[%c0_8, %c0_9] : memref<2x128xf32, #tpu.memory_space<vmem>>, vector<1x128xf32>
    %11 = vector.broadcast %10 : vector<1x128xf32> to vector<64x128xf32>
    %12 = arith.mulf %9, %11 : vector<64x128xf32>
    %c1_10 = arith.constant 1 : index
    %c0_11 = arith.constant 0 : index
    %13 = vector.load %arg4[%c1_10, %c0_11] : memref<2x128xf32, #tpu.memory_space<vmem>>, vector<1x128xf32>
    %14 = vector.broadcast %13 : vector<1x128xf32> to vector<64x128xf32>
    %15 = arith.addf %12, %14 : vector<64x128xf32>
    %16 = arith.addf %7, %15 : vector<64x128xf32>
    %cst = arith.constant 0.000000e+00 : f32
    %17 = vector.broadcast %cst : f32 to vector<64x128xf32>
    %18 = arith.maximumf %16, %17 : vector<64x128xf32>
    %c0_12 = arith.constant 0 : index
    %c0_13 = arith.constant 0 : index
    %c0_14 = arith.constant 0 : index
    %19 = vector.load %arg5[%c0_12, %c0_13, %c0_14] : memref<1x64x128xf32, #tpu.memory_space<vmem>>, vector<1x64x128xf32>
    %20 = vector.shape_cast %19 : vector<1x64x128xf32> to vector<64x128xf32>
    %21 = vector.shape_cast %18 : vector<64x128xf32> to vector<1x64x128xf32>
    tpu.vector_store %arg5[%c0_12, %c0_13, %c0_14], %21 {strides = array<i32>} : memref<1x64x128xf32, #tpu.memory_space<vmem>>, vector<1x64x128xf32>,
    return
  }
  func.func @transform_0(%arg0: i32) -> (i32, i32, i32) {
    %c0_i32 = arith.constant 0 : i32
    %c0_i32_0 = arith.constant 0 : i32
    %c0_i32_1 = arith.constant 0 : i32
    return %arg0, %c0_i32, %c0_i32_0 : i32, i32, i32
  }
  func.func @transform_1(%arg0: i32) -> (i32, i32, i32) {
    %c0_i32 = arith.constant 0 : i32
    %c0_i32_0 = arith.constant 0 : i32
    %c0_i32_1 = arith.constant 0 : i32
    return %arg0, %c0_i32, %c0_i32_0 : i32, i32, i32
  }
  func.func @transform_2(%arg0: i32) -> (i32, i32) {
    %c0_i32 = arith.constant 0 : i32
    %c0_i32_0 = arith.constant 0 : i32
    %c0_i32_1 = arith.constant 0 : i32
    return %c0_i32, %c0_i32_0 : i32, i32
  }
  func.func @transform_3(%arg0: i32) -> (i32, i32) {
    %c0_i32 = arith.constant 0 : i32
    %c0_i32_0 = arith.constant 0 : i32
    %c0_i32_1 = arith.constant 0 : i32
    return %c0_i32, %c0_i32_0 : i32, i32
  }
  func.func @transform_4(%arg0: i32) -> (i32, i32, i32) {
    %c0_i32 = arith.constant 0 : i32
    %c0_i32_0 = arith.constant 0 : i32
    %c0_i32_1 = arith.constant 0 : i32
    return %arg0, %c0_i32, %c0_i32_0 : i32, i32, i32
  }
}

module attributes {stable_mosaic.version = 11 : i64} {
  func.func @kernel(%arg0: i32, %arg1: memref<1x4x9x9x4xbf16, #tpu.memory_space<vmem>>, %arg2: memref<9x4x128xbf16, #tpu.memory_space<vmem>>, %arg3: memref<4x128xbf16, #tpu.memory_space<vmem>>, %arg4: memref<1x64x128xf32, #tpu.memory_space<vmem>>, %arg5: memref<1x2x128xf32, #tpu.memory_space<vmem>>, %arg6: memref<1x64x128xf32, #tpu.memory_space<vmem>>, %arg7: memref<1x2x128xf32, #tpu.memory_space<vmem>>) attributes {dimension_semantics = [#tpu.dimension_semantics<parallel>], iteration_bounds = array<i64: 2>, scalar_prefetch = 0 : i64, scratch_operands = 0 : i64, tpu.core_type = #tpu.core_type<tc>, window_params = [{transform_indices = @transform_0, window_bounds = array<i64: 1, 4, 9, 9, 4>}, {pipeline_mode = #tpu.pipeline_mode<synchronous>, transform_indices = @transform_1, window_bounds = array<i64: 9, 4, 128>}, {pipeline_mode = #tpu.pipeline_mode<synchronous>, transform_indices = @transform_2, window_bounds = array<i64: 4, 128>}, {transform_indices = @transform_3, window_bounds = array<i64: 1, 64, 128>}, {transform_indices = @transform_4, window_bounds = array<i64: 1, 2, 128>}, {transform_indices = @transform_5, window_bounds = array<i64: 1, 64, 128>}, {transform_indices = @transform_6, window_bounds = array<i64: 1, 2, 128>}]} {
    %cst = arith.constant 0.000000e+00 : f32
    %0 = vector.broadcast %cst : f32 to vector<64x128xf32>
    %c0 = arith.constant 0 : index
    %c0_0 = arith.constant 0 : index
    %c0_1 = arith.constant 0 : index
    %c0_2 = arith.constant 0 : index
    %c0_3 = arith.constant 0 : index
    %1 = vector.load %arg1[%c0, %c0_0, %c0_1, %c0_2, %c0_3] : memref<1x4x9x9x4xbf16, #tpu.memory_space<vmem>>, vector<1x1x8x8x4xbf16>
    %2 = vector.shape_cast %1 : vector<1x1x8x8x4xbf16> to vector<8x8x4xbf16>
    %3 = vector.shape_cast %2 : vector<8x8x4xbf16> to vector<64x4xbf16>
    %c0_4 = arith.constant 0 : index
    %c0_5 = arith.constant 0 : index
    %c0_6 = arith.constant 0 : index
    %4 = vector.load %arg2[%c0_4, %c0_5, %c0_6] : memref<9x4x128xbf16, #tpu.memory_space<vmem>>, vector<1x4x128xbf16>
    %5 = vector.shape_cast %4 : vector<1x4x128xbf16> to vector<4x128xbf16>
    %cst_7 = arith.constant dense<0.000000e+00> : vector<64x128xf32>
    %6 = tpu.matmul %3, %5, %cst_7 {dimension_numbers = #tpu.dot_dimension_numbers<[1], [0], [0], [1], [0, 0, 1, 1], [], []>} : vector<64x4xbf16>, vector<4x128xbf16>, vector<64x128xf32> -> vector<64x128xf32>
    %7 = arith.addf %0, %6 : vector<64x128xf32>
    %c0_8 = arith.constant 0 : index
    %c1 = arith.constant 1 : index
    %c0_9 = arith.constant 0 : index
    %c0_10 = arith.constant 0 : index
    %c0_11 = arith.constant 0 : index
    %8 = vector.load %arg1[%c0_8, %c1, %c0_9, %c0_10, %c0_11] : memref<1x4x9x9x4xbf16, #tpu.memory_space<vmem>>, vector<1x1x8x8x4xbf16>
    %9 = vector.shape_cast %8 : vector<1x1x8x8x4xbf16> to vector<8x8x4xbf16>
    %10 = vector.shape_cast %9 : vector<8x8x4xbf16> to vector<64x4xbf16>
    %c1_12 = arith.constant 1 : index
    %c0_13 = arith.constant 0 : index
    %c0_14 = arith.constant 0 : index
    %11 = vector.load %arg2[%c1_12, %c0_13, %c0_14] : memref<9x4x128xbf16, #tpu.memory_space<vmem>>, vector<1x4x128xbf16>
    %12 = vector.shape_cast %11 : vector<1x4x128xbf16> to vector<4x128xbf16>
    %cst_15 = arith.constant dense<0.000000e+00> : vector<64x128xf32>
    %13 = tpu.matmul %10, %12, %cst_15 {dimension_numbers = #tpu.dot_dimension_numbers<[1], [0], [0], [1], [0, 0, 1, 1], [], []>} : vector<64x4xbf16>, vector<4x128xbf16>, vector<64x128xf32> -> vector<64x128xf32>
    %14 = arith.addf %7, %13 : vector<64x128xf32>
    %c0_16 = arith.constant 0 : index
    %c0_17 = arith.constant 0 : index
    %c0_18 = arith.constant 0 : index
    %c1_19 = arith.constant 1 : index
    %c0_20 = arith.constant 0 : index
    %15 = vector.load %arg1[%c0_16, %c0_17, %c0_18, %c1_19, %c0_20] : memref<1x4x9x9x4xbf16, #tpu.memory_space<vmem>>, vector<1x1x8x8x4xbf16>
    %16 = vector.shape_cast %15 : vector<1x1x8x8x4xbf16> to vector<8x8x4xbf16>
    %17 = vector.shape_cast %16 : vector<8x8x4xbf16> to vector<64x4xbf16>
    %c2 = arith.constant 2 : index
    %c0_21 = arith.constant 0 : index
    %c0_22 = arith.constant 0 : index
    %18 = vector.load %arg2[%c2, %c0_21, %c0_22] : memref<9x4x128xbf16, #tpu.memory_space<vmem>>, vector<1x4x128xbf16>
    %19 = vector.shape_cast %18 : vector<1x4x128xbf16> to vector<4x128xbf16>
    %cst_23 = arith.constant dense<0.000000e+00> : vector<64x128xf32>
    %20 = tpu.matmul %17, %19, %cst_23 {dimension_numbers = #tpu.dot_dimension_numbers<[1], [0], [0], [1], [0, 0, 1, 1], [], []>} : vector<64x4xbf16>, vector<4x128xbf16>, vector<64x128xf32> -> vector<64x128xf32>
    %21 = arith.addf %14, %20 : vector<64x128xf32>
    %c0_24 = arith.constant 0 : index
    %c2_25 = arith.constant 2 : index
    %c0_26 = arith.constant 0 : index
    %c0_27 = arith.constant 0 : index
    %c0_28 = arith.constant 0 : index
    %22 = vector.load %arg1[%c0_24, %c2_25, %c0_26, %c0_27, %c0_28] : memref<1x4x9x9x4xbf16, #tpu.memory_space<vmem>>, vector<1x1x8x8x4xbf16>
    %23 = vector.shape_cast %22 : vector<1x1x8x8x4xbf16> to vector<8x8x4xbf16>
    %24 = vector.shape_cast %23 : vector<8x8x4xbf16> to vector<64x4xbf16>
    %c3 = arith.constant 3 : index
    %c0_29 = arith.constant 0 : index
    %c0_30 = arith.constant 0 : index
    %25 = vector.load %arg2[%c3, %c0_29, %c0_30] : memref<9x4x128xbf16, #tpu.memory_space<vmem>>, vector<1x4x128xbf16>
    %26 = vector.shape_cast %25 : vector<1x4x128xbf16> to vector<4x128xbf16>
    %cst_31 = arith.constant dense<0.000000e+00> : vector<64x128xf32>
    %27 = tpu.matmul %24, %26, %cst_31 {dimension_numbers = #tpu.dot_dimension_numbers<[1], [0], [0], [1], [0, 0, 1, 1], [], []>} : vector<64x4xbf16>, vector<4x128xbf16>, vector<64x128xf32> -> vector<64x128xf32>
    %28 = arith.addf %21, %27 : vector<64x128xf32>
    %c0_32 = arith.constant 0 : index
    %c3_33 = arith.constant 3 : index
    %c0_34 = arith.constant 0 : index
    %c0_35 = arith.constant 0 : index
    %c0_36 = arith.constant 0 : index
    %29 = vector.load %arg1[%c0_32, %c3_33, %c0_34, %c0_35, %c0_36] : memref<1x4x9x9x4xbf16, #tpu.memory_space<vmem>>, vector<1x1x8x8x4xbf16>
    %30 = vector.shape_cast %29 : vector<1x1x8x8x4xbf16> to vector<8x8x4xbf16>
    %31 = vector.shape_cast %30 : vector<8x8x4xbf16> to vector<64x4xbf16>
    %c4 = arith.constant 4 : index
    %c0_37 = arith.constant 0 : index
    %c0_38 = arith.constant 0 : index
    %32 = vector.load %arg2[%c4, %c0_37, %c0_38] : memref<9x4x128xbf16, #tpu.memory_space<vmem>>, vector<1x4x128xbf16>
    %33 = vector.shape_cast %32 : vector<1x4x128xbf16> to vector<4x128xbf16>
    %cst_39 = arith.constant dense<0.000000e+00> : vector<64x128xf32>
    %34 = tpu.matmul %31, %33, %cst_39 {dimension_numbers = #tpu.dot_dimension_numbers<[1], [0], [0], [1], [0, 0, 1, 1], [], []>} : vector<64x4xbf16>, vector<4x128xbf16>, vector<64x128xf32> -> vector<64x128xf32>
    %35 = arith.addf %28, %34 : vector<64x128xf32>
    %c0_40 = arith.constant 0 : index
    %c2_41 = arith.constant 2 : index
    %c0_42 = arith.constant 0 : index
    %c1_43 = arith.constant 1 : index
    %c0_44 = arith.constant 0 : index
    %36 = vector.load %arg1[%c0_40, %c2_41, %c0_42, %c1_43, %c0_44] : memref<1x4x9x9x4xbf16, #tpu.memory_space<vmem>>, vector<1x1x8x8x4xbf16>
    %37 = vector.shape_cast %36 : vector<1x1x8x8x4xbf16> to vector<8x8x4xbf16>
    %38 = vector.shape_cast %37 : vector<8x8x4xbf16> to vector<64x4xbf16>
    %c5 = arith.constant 5 : index
    %c0_45 = arith.constant 0 : index
    %c0_46 = arith.constant 0 : index
    %39 = vector.load %arg2[%c5, %c0_45, %c0_46] : memref<9x4x128xbf16, #tpu.memory_space<vmem>>, vector<1x4x128xbf16>
    %40 = vector.shape_cast %39 : vector<1x4x128xbf16> to vector<4x128xbf16>
    %cst_47 = arith.constant dense<0.000000e+00> : vector<64x128xf32>
    %41 = tpu.matmul %38, %40, %cst_47 {dimension_numbers = #tpu.dot_dimension_numbers<[1], [0], [0], [1], [0, 0, 1, 1], [], []>} : vector<64x4xbf16>, vector<4x128xbf16>, vector<64x128xf32> -> vector<64x128xf32>
    %42 = arith.addf %35, %41 : vector<64x128xf32>
    %c0_48 = arith.constant 0 : index
    %c0_49 = arith.constant 0 : index
    %c1_50 = arith.constant 1 : index
    %c0_51 = arith.constant 0 : index
    %c0_52 = arith.constant 0 : index
    %43 = vector.load %arg1[%c0_48, %c0_49, %c1_50, %c0_51, %c0_52] : memref<1x4x9x9x4xbf16, #tpu.memory_space<vmem>>, vector<1x1x8x8x4xbf16>
    %44 = vector.shape_cast %43 : vector<1x1x8x8x4xbf16> to vector<8x8x4xbf16>
    %45 = vector.shape_cast %44 : vector<8x8x4xbf16> to vector<64x4xbf16>
    %c6 = arith.constant 6 : index
    %c0_53 = arith.constant 0 : index
    %c0_54 = arith.constant 0 : index
    %46 = vector.load %arg2[%c6, %c0_53, %c0_54] : memref<9x4x128xbf16, #tpu.memory_space<vmem>>, vector<1x4x128xbf16>
    %47 = vector.shape_cast %46 : vector<1x4x128xbf16> to vector<4x128xbf16>
    %cst_55 = arith.constant dense<0.000000e+00> : vector<64x128xf32>
    %48 = tpu.matmul %45, %47, %cst_55 {dimension_numbers = #tpu.dot_dimension_numbers<[1], [0], [0], [1], [0, 0, 1, 1], [], []>} : vector<64x4xbf16>, vector<4x128xbf16>, vector<64x128xf32> -> vector<64x128xf32>
    %49 = arith.addf %42, %48 : vector<64x128xf32>
    %c0_56 = arith.constant 0 : index
    %c1_57 = arith.constant 1 : index
    %c1_58 = arith.constant 1 : index
    %c0_59 = arith.constant 0 : index
    %c0_60 = arith.constant 0 : index
    %50 = vector.load %arg1[%c0_56, %c1_57, %c1_58, %c0_59, %c0_60] : memref<1x4x9x9x4xbf16, #tpu.memory_space<vmem>>, vector<1x1x8x8x4xbf16>
    %51 = vector.shape_cast %50 : vector<1x1x8x8x4xbf16> to vector<8x8x4xbf16>
    %52 = vector.shape_cast %51 : vector<8x8x4xbf16> to vector<64x4xbf16>
    %c7 = arith.constant 7 : index
    %c0_61 = arith.constant 0 : index
    %c0_62 = arith.constant 0 : index
    %53 = vector.load %arg2[%c7, %c0_61, %c0_62] : memref<9x4x128xbf16, #tpu.memory_space<vmem>>, vector<1x4x128xbf16>
    %54 = vector.shape_cast %53 : vector<1x4x128xbf16> to vector<4x128xbf16>
    %cst_63 = arith.constant dense<0.000000e+00> : vector<64x128xf32>
    %55 = tpu.matmul %52, %54, %cst_63 {dimension_numbers = #tpu.dot_dimension_numbers<[1], [0], [0], [1], [0, 0, 1, 1], [], []>} : vector<64x4xbf16>, vector<4x128xbf16>, vector<64x128xf32> -> vector<64x128xf32>
    %56 = arith.addf %49, %55 : vector<64x128xf32>
    %c0_64 = arith.constant 0 : index
    %c0_65 = arith.constant 0 : index
    %c1_66 = arith.constant 1 : index
    %c1_67 = arith.constant 1 : index
    %c0_68 = arith.constant 0 : index
    %57 = vector.load %arg1[%c0_64, %c0_65, %c1_66, %c1_67, %c0_68] : memref<1x4x9x9x4xbf16, #tpu.memory_space<vmem>>, vector<1x1x8x8x4xbf16>
    %58 = vector.shape_cast %57 : vector<1x1x8x8x4xbf16> to vector<8x8x4xbf16>
    %59 = vector.shape_cast %58 : vector<8x8x4xbf16> to vector<64x4xbf16>
    %c8 = arith.constant 8 : index
    %c0_69 = arith.constant 0 : index
    %c0_70 = arith.constant 0 : index
    %60 = vector.load %arg2[%c8, %c0_69, %c0_70] : memref<9x4x128xbf16, #tpu.memory_space<vmem>>, vector<1x4x128xbf16>
    %61 = vector.shape_cast %60 : vector<1x4x128xbf16> to vector<4x128xbf16>
    %cst_71 = arith.constant dense<0.000000e+00> : vector<64x128xf32>
    %62 = tpu.matmul %59, %61, %cst_71 {dimension_numbers = #tpu.dot_dimension_numbers<[1], [0], [0], [1], [0, 0, 1, 1], [], []>} : vector<64x4xbf16>, vector<4x128xbf16>, vector<64x128xf32> -> vector<64x128xf32>
    %63 = arith.addf %56, %62 : vector<64x128xf32>
    %c0_72 = arith.constant 0 : index
    %c0_73 = arith.constant 0 : index
    %c0_74 = arith.constant 0 : index
    %64 = vector.load %arg4[%c0_72, %c0_73, %c0_74] : memref<1x64x128xf32, #tpu.memory_space<vmem>>, vector<1x64x128xf32>
    %65 = vector.shape_cast %64 : vector<1x64x128xf32> to vector<64x128xf32>
    %66 = vector.shape_cast %63 : vector<64x128xf32> to vector<1x64x128xf32>
    tpu.vector_store %arg4[%c0_72, %c0_73, %c0_74], %66 {strides = array<i32>} : memref<1x64x128xf32, #tpu.memory_space<vmem>>, vector<1x64x128xf32>,
    %cst_75 = arith.constant dense<0.000000e+00> : vector<128xf32>
    %67 = vector.multi_reduction <add>, %63, %cst_75 [0] : vector<64x128xf32> to vector<128xf32>
    %68 = vector.shape_cast %67 : vector<128xf32> to vector<1x128xf32>
    %c0_76 = arith.constant 0 : index
    %c0_77 = arith.constant 0 : index
    %c0_78 = arith.constant 0 : index
    %69 = vector.load %arg5[%c0_76, %c0_77, %c0_78] : memref<1x2x128xf32, #tpu.memory_space<vmem>>, vector<1x1x128xf32>
    %70 = vector.shape_cast %69 : vector<1x1x128xf32> to vector<1x128xf32>
    %71 = vector.shape_cast %68 : vector<1x128xf32> to vector<1x1x128xf32>
    tpu.vector_store %arg5[%c0_76, %c0_77, %c0_78], %71 {strides = array<i32>} : memref<1x2x128xf32, #tpu.memory_space<vmem>>, vector<1x1x128xf32>,
    %72 = arith.mulf %63, %63 : vector<64x128xf32>
    %cst_79 = arith.constant dense<0.000000e+00> : vector<128xf32>
    %73 = vector.multi_reduction <add>, %72, %cst_79 [0] : vector<64x128xf32> to vector<128xf32>
    %74 = vector.shape_cast %73 : vector<128xf32> to vector<1x128xf32>
    %c0_80 = arith.constant 0 : index
    %c1_81 = arith.constant 1 : index
    %c0_82 = arith.constant 0 : index
    %75 = vector.load %arg5[%c0_80, %c1_81, %c0_82] : memref<1x2x128xf32, #tpu.memory_space<vmem>>, vector<1x1x128xf32>
    %76 = vector.shape_cast %75 : vector<1x1x128xf32> to vector<1x128xf32>
    %77 = vector.shape_cast %74 : vector<1x128xf32> to vector<1x1x128xf32>
    tpu.vector_store %arg5[%c0_80, %c1_81, %c0_82], %77 {strides = array<i32>} : memref<1x2x128xf32, #tpu.memory_space<vmem>>, vector<1x1x128xf32>,
    %c0_83 = arith.constant 0 : index
    %c3_84 = arith.constant 3 : index
    %c0_85 = arith.constant 0 : index
    %c0_86 = arith.constant 0 : index
    %c0_87 = arith.constant 0 : index
    %78 = vector.load %arg1[%c0_83, %c3_84, %c0_85, %c0_86, %c0_87] : memref<1x4x9x9x4xbf16, #tpu.memory_space<vmem>>, vector<1x1x8x8x4xbf16>
    %79 = vector.shape_cast %78 : vector<1x1x8x8x4xbf16> to vector<8x8x4xbf16>
    %80 = vector.shape_cast %79 : vector<8x8x4xbf16> to vector<64x4xbf16>
    %c0_88 = arith.constant 0 : index
    %c0_89 = arith.constant 0 : index
    %81 = vector.load %arg3[%c0_88, %c0_89] : memref<4x128xbf16, #tpu.memory_space<vmem>>, vector<4x128xbf16>
    %cst_90 = arith.constant dense<0.000000e+00> : vector<64x128xf32>
    %82 = tpu.matmul %80, %81, %cst_90 {dimension_numbers = #tpu.dot_dimension_numbers<[1], [0], [0], [1], [0, 0, 1, 1], [], []>} : vector<64x4xbf16>, vector<4x128xbf16>, vector<64x128xf32> -> vector<64x128xf32>
    %c0_91 = arith.constant 0 : index
    %c0_92 = arith.constant 0 : index
    %c0_93 = arith.constant 0 : index
    %83 = vector.load %arg6[%c0_91, %c0_92, %c0_93] : memref<1x64x128xf32, #tpu.memory_space<vmem>>, vector<1x64x128xf32>
    %84 = vector.shape_cast %83 : vector<1x64x128xf32> to vector<64x128xf32>
    %85 = vector.shape_cast %82 : vector<64x128xf32> to vector<1x64x128xf32>
    tpu.vector_store %arg6[%c0_91, %c0_92, %c0_93], %85 {strides = array<i32>} : memref<1x64x128xf32, #tpu.memory_space<vmem>>, vector<1x64x128xf32>,
    %cst_94 = arith.constant dense<0.000000e+00> : vector<128xf32>
    %86 = vector.multi_reduction <add>, %82, %cst_94 [0] : vector<64x128xf32> to vector<128xf32>
    %87 = vector.shape_cast %86 : vector<128xf32> to vector<1x128xf32>
    %c0_95 = arith.constant 0 : index
    %c0_96 = arith.constant 0 : index
    %c0_97 = arith.constant 0 : index
    %88 = vector.load %arg7[%c0_95, %c0_96, %c0_97] : memref<1x2x128xf32, #tpu.memory_space<vmem>>, vector<1x1x128xf32>
    %89 = vector.shape_cast %88 : vector<1x1x128xf32> to vector<1x128xf32>
    %90 = vector.shape_cast %87 : vector<1x128xf32> to vector<1x1x128xf32>
    tpu.vector_store %arg7[%c0_95, %c0_96, %c0_97], %90 {strides = array<i32>} : memref<1x2x128xf32, #tpu.memory_space<vmem>>, vector<1x1x128xf32>,
    %91 = arith.mulf %82, %82 : vector<64x128xf32>
    %cst_98 = arith.constant dense<0.000000e+00> : vector<128xf32>
    %92 = vector.multi_reduction <add>, %91, %cst_98 [0] : vector<64x128xf32> to vector<128xf32>
    %93 = vector.shape_cast %92 : vector<128xf32> to vector<1x128xf32>
    %c0_99 = arith.constant 0 : index
    %c1_100 = arith.constant 1 : index
    %c0_101 = arith.constant 0 : index
    %94 = vector.load %arg7[%c0_99, %c1_100, %c0_101] : memref<1x2x128xf32, #tpu.memory_space<vmem>>, vector<1x1x128xf32>
    %95 = vector.shape_cast %94 : vector<1x1x128xf32> to vector<1x128xf32>
    %96 = vector.shape_cast %93 : vector<1x128xf32> to vector<1x1x128xf32>
    tpu.vector_store %arg7[%c0_99, %c1_100, %c0_101], %96 {strides = array<i32>} : memref<1x2x128xf32, #tpu.memory_space<vmem>>, vector<1x1x128xf32>,
    return
  }
  func.func @transform_0(%arg0: i32) -> (i32, i32, i32, i32, i32) {
    %c0_i32 = arith.constant 0 : i32
    %c0_i32_0 = arith.constant 0 : i32
    %c0_i32_1 = arith.constant 0 : i32
    %c0_i32_2 = arith.constant 0 : i32
    %c0_i32_3 = arith.constant 0 : i32
    return %arg0, %c0_i32, %c0_i32_0, %c0_i32_1, %c0_i32_2 : i32, i32, i32, i32, i32
  }
  func.func @transform_1(%arg0: i32) -> (i32, i32, i32) {
    %c0_i32 = arith.constant 0 : i32
    %c0_i32_0 = arith.constant 0 : i32
    %c0_i32_1 = arith.constant 0 : i32
    %c0_i32_2 = arith.constant 0 : i32
    return %c0_i32, %c0_i32_0, %c0_i32_1 : i32, i32, i32
  }
  func.func @transform_2(%arg0: i32) -> (i32, i32) {
    %c0_i32 = arith.constant 0 : i32
    %c0_i32_0 = arith.constant 0 : i32
    %c0_i32_1 = arith.constant 0 : i32
    return %c0_i32, %c0_i32_0 : i32, i32
  }
  func.func @transform_3(%arg0: i32) -> (i32, i32, i32) {
    %c0_i32 = arith.constant 0 : i32
    %c0_i32_0 = arith.constant 0 : i32
    %c0_i32_1 = arith.constant 0 : i32
    return %arg0, %c0_i32, %c0_i32_0 : i32, i32, i32
  }
  func.func @transform_4(%arg0: i32) -> (i32, i32, i32) {
    %c0_i32 = arith.constant 0 : i32
    %c0_i32_0 = arith.constant 0 : i32
    %c0_i32_1 = arith.constant 0 : i32
    return %arg0, %c0_i32, %c0_i32_0 : i32, i32, i32
  }
  func.func @transform_5(%arg0: i32) -> (i32, i32, i32) {
    %c0_i32 = arith.constant 0 : i32
    %c0_i32_0 = arith.constant 0 : i32
    %c0_i32_1 = arith.constant 0 : i32
    return %arg0, %c0_i32, %c0_i32_0 : i32, i32, i32
  }
  func.func @transform_6(%arg0: i32) -> (i32, i32, i32) {
    %c0_i32 = arith.constant 0 : i32
    %c0_i32_0 = arith.constant 0 : i32
    %c0_i32_1 = arith.constant 0 : i32
    return %arg0, %c0_i32, %c0_i32_0 : i32, i32, i32
  }
}

module attributes {stable_mosaic.version = 11 : i64} {
  func.func @kernel(%arg0: i32, %arg1: memref<1x64x128xf32, #tpu.memory_space<vmem>>, %arg2: memref<2x128xf32, #tpu.memory_space<vmem>>, %arg3: memref<9x128x128xbf16, #tpu.memory_space<vmem>>, %arg4: memref<1x64x128xf32, #tpu.memory_space<vmem>>, %arg5: memref<1x2x128xf32, #tpu.memory_space<vmem>>, %arg6: memref<10x10x128xbf16, #tpu.memory_space<vmem>>) attributes {dimension_semantics = [#tpu.dimension_semantics<parallel>], iteration_bounds = array<i64: 2>, scalar_prefetch = 0 : i64, scratch_operands = 1 : i64, tpu.core_type = #tpu.core_type<tc>, window_params = [{transform_indices = @transform_0, window_bounds = array<i64: 1, 64, 128>}, {pipeline_mode = #tpu.pipeline_mode<synchronous>, transform_indices = @transform_1, window_bounds = array<i64: 2, 128>}, {pipeline_mode = #tpu.pipeline_mode<synchronous>, transform_indices = @transform_2, window_bounds = array<i64: 9, 128, 128>}, {transform_indices = @transform_3, window_bounds = array<i64: 1, 64, 128>}, {transform_indices = @transform_4, window_bounds = array<i64: 1, 2, 128>}]} {
    %c0 = arith.constant 0 : index
    %c0_0 = arith.constant 0 : index
    %0 = vector.load %arg2[%c0, %c0_0] : memref<2x128xf32, #tpu.memory_space<vmem>>, vector<1x128xf32>
    %c1 = arith.constant 1 : index
    %c0_1 = arith.constant 0 : index
    %1 = vector.load %arg2[%c1, %c0_1] : memref<2x128xf32, #tpu.memory_space<vmem>>, vector<1x128xf32>
    %c0_2 = arith.constant 0 : index
    %c0_3 = arith.constant 0 : index
    %c0_4 = arith.constant 0 : index
    %2 = vector.load %arg1[%c0_2, %c0_3, %c0_4] : memref<1x64x128xf32, #tpu.memory_space<vmem>>, vector<1x64x128xf32>
    %3 = vector.shape_cast %2 : vector<1x64x128xf32> to vector<64x128xf32>
    %4 = vector.broadcast %0 : vector<1x128xf32> to vector<64x128xf32>
    %5 = arith.mulf %3, %4 : vector<64x128xf32>
    %6 = vector.broadcast %1 : vector<1x128xf32> to vector<64x128xf32>
    %7 = arith.addf %5, %6 : vector<64x128xf32>
    %cst = arith.constant 0.000000e+00 : f32
    %8 = vector.broadcast %cst : f32 to vector<64x128xf32>
    %9 = arith.maximumf %7, %8 : vector<64x128xf32>
    %cst_5 = arith.constant 0.000000e+00 : bf16
    %10 = vector.broadcast %cst_5 : bf16 to vector<10x10x128xbf16>
    %c0_6 = arith.constant 0 : index
    %c0_7 = arith.constant 0 : index
    %c0_8 = arith.constant 0 : index
    %11 = vector.load %arg6[%c0_6, %c0_7, %c0_8] : memref<10x10x128xbf16, #tpu.memory_space<vmem>>, vector<10x10x128xbf16>
    tpu.vector_store %arg6[%c0_6, %c0_7, %c0_8], %10 {strides = array<i32>} : memref<10x10x128xbf16, #tpu.memory_space<vmem>>, vector<10x10x128xbf16>,
    %12 = vector.shape_cast %9 : vector<64x128xf32> to vector<8x8x128xf32>
    %13 = arith.truncf %12 : vector<8x8x128xf32> to vector<8x8x128xbf16>
    %c1_9 = arith.constant 1 : index
    %c1_10 = arith.constant 1 : index
    %c0_11 = arith.constant 0 : index
    %14 = vector.load %arg6[%c1_9, %c1_10, %c0_11] : memref<10x10x128xbf16, #tpu.memory_space<vmem>>, vector<8x8x128xbf16>
    tpu.vector_store %arg6[%c1_9, %c1_10, %c0_11], %13 {strides = array<i32>} : memref<10x10x128xbf16, #tpu.memory_space<vmem>>, vector<8x8x128xbf16>,
    %cst_12 = arith.constant 0.000000e+00 : f32
    %15 = vector.broadcast %cst_12 : f32 to vector<64x128xf32>
    %c0_13 = arith.constant 0 : index
    %c0_14 = arith.constant 0 : index
    %c0_15 = arith.constant 0 : index
    %16 = vector.load %arg6[%c0_13, %c0_14, %c0_15] : memref<10x10x128xbf16, #tpu.memory_space<vmem>>, vector<8x8x128xbf16>
    %17 = vector.shape_cast %16 : vector<8x8x128xbf16> to vector<64x128xbf16>
    %c0_16 = arith.constant 0 : index
    %c0_17 = arith.constant 0 : index
    %c0_18 = arith.constant 0 : index
    %18 = vector.load %arg3[%c0_16, %c0_17, %c0_18] : memref<9x128x128xbf16, #tpu.memory_space<vmem>>, vector<1x128x128xbf16>
    %19 = vector.shape_cast %18 : vector<1x128x128xbf16> to vector<128x128xbf16>
    %cst_19 = arith.constant dense<0.000000e+00> : vector<64x128xf32>
    %20 = tpu.matmul %17, %19, %cst_19 {dimension_numbers = #tpu.dot_dimension_numbers<[1], [0], [0], [1], [0, 0, 1, 1], [], []>} : vector<64x128xbf16>, vector<128x128xbf16>, vector<64x128xf32> -> vector<64x128xf32>
    %21 = arith.addf %15, %20 : vector<64x128xf32>
    %c0_20 = arith.constant 0 : index
    %c1_21 = arith.constant 1 : index
    %c0_22 = arith.constant 0 : index
    %22 = vector.load %arg6[%c0_20, %c1_21, %c0_22] : memref<10x10x128xbf16, #tpu.memory_space<vmem>>, vector<8x8x128xbf16>
    %23 = vector.shape_cast %22 : vector<8x8x128xbf16> to vector<64x128xbf16>
    %c1_23 = arith.constant 1 : index
    %c0_24 = arith.constant 0 : index
    %c0_25 = arith.constant 0 : index
    %24 = vector.load %arg3[%c1_23, %c0_24, %c0_25] : memref<9x128x128xbf16, #tpu.memory_space<vmem>>, vector<1x128x128xbf16>
    %25 = vector.shape_cast %24 : vector<1x128x128xbf16> to vector<128x128xbf16>
    %cst_26 = arith.constant dense<0.000000e+00> : vector<64x128xf32>
    %26 = tpu.matmul %23, %25, %cst_26 {dimension_numbers = #tpu.dot_dimension_numbers<[1], [0], [0], [1], [0, 0, 1, 1], [], []>} : vector<64x128xbf16>, vector<128x128xbf16>, vector<64x128xf32> -> vector<64x128xf32>
    %27 = arith.addf %21, %26 : vector<64x128xf32>
    %c0_27 = arith.constant 0 : index
    %c2 = arith.constant 2 : index
    %c0_28 = arith.constant 0 : index
    %28 = vector.load %arg6[%c0_27, %c2, %c0_28] : memref<10x10x128xbf16, #tpu.memory_space<vmem>>, vector<8x8x128xbf16>
    %29 = vector.shape_cast %28 : vector<8x8x128xbf16> to vector<64x128xbf16>
    %c2_29 = arith.constant 2 : index
    %c0_30 = arith.constant 0 : index
    %c0_31 = arith.constant 0 : index
    %30 = vector.load %arg3[%c2_29, %c0_30, %c0_31] : memref<9x128x128xbf16, #tpu.memory_space<vmem>>, vector<1x128x128xbf16>
    %31 = vector.shape_cast %30 : vector<1x128x128xbf16> to vector<128x128xbf16>
    %cst_32 = arith.constant dense<0.000000e+00> : vector<64x128xf32>
    %32 = tpu.matmul %29, %31, %cst_32 {dimension_numbers = #tpu.dot_dimension_numbers<[1], [0], [0], [1], [0, 0, 1, 1], [], []>} : vector<64x128xbf16>, vector<128x128xbf16>, vector<64x128xf32> -> vector<64x128xf32>
    %33 = arith.addf %27, %32 : vector<64x128xf32>
    %c1_33 = arith.constant 1 : index
    %c0_34 = arith.constant 0 : index
    %c0_35 = arith.constant 0 : index
    %34 = vector.load %arg6[%c1_33, %c0_34, %c0_35] : memref<10x10x128xbf16, #tpu.memory_space<vmem>>, vector<8x8x128xbf16>
    %35 = vector.shape_cast %34 : vector<8x8x128xbf16> to vector<64x128xbf16>
    %c3 = arith.constant 3 : index
    %c0_36 = arith.constant 0 : index
    %c0_37 = arith.constant 0 : index
    %36 = vector.load %arg3[%c3, %c0_36, %c0_37] : memref<9x128x128xbf16, #tpu.memory_space<vmem>>, vector<1x128x128xbf16>
    %37 = vector.shape_cast %36 : vector<1x128x128xbf16> to vector<128x128xbf16>
    %cst_38 = arith.constant dense<0.000000e+00> : vector<64x128xf32>
    %38 = tpu.matmul %35, %37, %cst_38 {dimension_numbers = #tpu.dot_dimension_numbers<[1], [0], [0], [1], [0, 0, 1, 1], [], []>} : vector<64x128xbf16>, vector<128x128xbf16>, vector<64x128xf32> -> vector<64x128xf32>
    %39 = arith.addf %33, %38 : vector<64x128xf32>
    %c1_39 = arith.constant 1 : index
    %c1_40 = arith.constant 1 : index
    %c0_41 = arith.constant 0 : index
    %40 = vector.load %arg6[%c1_39, %c1_40, %c0_41] : memref<10x10x128xbf16, #tpu.memory_space<vmem>>, vector<8x8x128xbf16>
    %41 = vector.shape_cast %40 : vector<8x8x128xbf16> to vector<64x128xbf16>
    %c4 = arith.constant 4 : index
    %c0_42 = arith.constant 0 : index
    %c0_43 = arith.constant 0 : index
    %42 = vector.load %arg3[%c4, %c0_42, %c0_43] : memref<9x128x128xbf16, #tpu.memory_space<vmem>>, vector<1x128x128xbf16>
    %43 = vector.shape_cast %42 : vector<1x128x128xbf16> to vector<128x128xbf16>
    %cst_44 = arith.constant dense<0.000000e+00> : vector<64x128xf32>
    %44 = tpu.matmul %41, %43, %cst_44 {dimension_numbers = #tpu.dot_dimension_numbers<[1], [0], [0], [1], [0, 0, 1, 1], [], []>} : vector<64x128xbf16>, vector<128x128xbf16>, vector<64x128xf32> -> vector<64x128xf32>
    %45 = arith.addf %39, %44 : vector<64x128xf32>
    %c1_45 = arith.constant 1 : index
    %c2_46 = arith.constant 2 : index
    %c0_47 = arith.constant 0 : index
    %46 = vector.load %arg6[%c1_45, %c2_46, %c0_47] : memref<10x10x128xbf16, #tpu.memory_space<vmem>>, vector<8x8x128xbf16>
    %47 = vector.shape_cast %46 : vector<8x8x128xbf16> to vector<64x128xbf16>
    %c5 = arith.constant 5 : index
    %c0_48 = arith.constant 0 : index
    %c0_49 = arith.constant 0 : index
    %48 = vector.load %arg3[%c5, %c0_48, %c0_49] : memref<9x128x128xbf16, #tpu.memory_space<vmem>>, vector<1x128x128xbf16>
    %49 = vector.shape_cast %48 : vector<1x128x128xbf16> to vector<128x128xbf16>
    %cst_50 = arith.constant dense<0.000000e+00> : vector<64x128xf32>
    %50 = tpu.matmul %47, %49, %cst_50 {dimension_numbers = #tpu.dot_dimension_numbers<[1], [0], [0], [1], [0, 0, 1, 1], [], []>} : vector<64x128xbf16>, vector<128x128xbf16>, vector<64x128xf32> -> vector<64x128xf32>
    %51 = arith.addf %45, %50 : vector<64x128xf32>
    %c2_51 = arith.constant 2 : index
    %c0_52 = arith.constant 0 : index
    %c0_53 = arith.constant 0 : index
    %52 = vector.load %arg6[%c2_51, %c0_52, %c0_53] : memref<10x10x128xbf16, #tpu.memory_space<vmem>>, vector<8x8x128xbf16>
    %53 = vector.shape_cast %52 : vector<8x8x128xbf16> to vector<64x128xbf16>
    %c6 = arith.constant 6 : index
    %c0_54 = arith.constant 0 : index
    %c0_55 = arith.constant 0 : index
    %54 = vector.load %arg3[%c6, %c0_54, %c0_55] : memref<9x128x128xbf16, #tpu.memory_space<vmem>>, vector<1x128x128xbf16>
    %55 = vector.shape_cast %54 : vector<1x128x128xbf16> to vector<128x128xbf16>
    %cst_56 = arith.constant dense<0.000000e+00> : vector<64x128xf32>
    %56 = tpu.matmul %53, %55, %cst_56 {dimension_numbers = #tpu.dot_dimension_numbers<[1], [0], [0], [1], [0, 0, 1, 1], [], []>} : vector<64x128xbf16>, vector<128x128xbf16>, vector<64x128xf32> -> vector<64x128xf32>
    %57 = arith.addf %51, %56 : vector<64x128xf32>
    %c2_57 = arith.constant 2 : index
    %c1_58 = arith.constant 1 : index
    %c0_59 = arith.constant 0 : index
    %58 = vector.load %arg6[%c2_57, %c1_58, %c0_59] : memref<10x10x128xbf16, #tpu.memory_space<vmem>>, vector<8x8x128xbf16>
    %59 = vector.shape_cast %58 : vector<8x8x128xbf16> to vector<64x128xbf16>
    %c7 = arith.constant 7 : index
    %c0_60 = arith.constant 0 : index
    %c0_61 = arith.constant 0 : index
    %60 = vector.load %arg3[%c7, %c0_60, %c0_61] : memref<9x128x128xbf16, #tpu.memory_space<vmem>>, vector<1x128x128xbf16>
    %61 = vector.shape_cast %60 : vector<1x128x128xbf16> to vector<128x128xbf16>
    %cst_62 = arith.constant dense<0.000000e+00> : vector<64x128xf32>
    %62 = tpu.matmul %59, %61, %cst_62 {dimension_numbers = #tpu.dot_dimension_numbers<[1], [0], [0], [1], [0, 0, 1, 1], [], []>} : vector<64x128xbf16>, vector<128x128xbf16>, vector<64x128xf32> -> vector<64x128xf32>
    %63 = arith.addf %57, %62 : vector<64x128xf32>
    %c2_63 = arith.constant 2 : index
    %c2_64 = arith.constant 2 : index
    %c0_65 = arith.constant 0 : index
    %64 = vector.load %arg6[%c2_63, %c2_64, %c0_65] : memref<10x10x128xbf16, #tpu.memory_space<vmem>>, vector<8x8x128xbf16>
    %65 = vector.shape_cast %64 : vector<8x8x128xbf16> to vector<64x128xbf16>
    %c8 = arith.constant 8 : index
    %c0_66 = arith.constant 0 : index
    %c0_67 = arith.constant 0 : index
    %66 = vector.load %arg3[%c8, %c0_66, %c0_67] : memref<9x128x128xbf16, #tpu.memory_space<vmem>>, vector<1x128x128xbf16>
    %67 = vector.shape_cast %66 : vector<1x128x128xbf16> to vector<128x128xbf16>
    %cst_68 = arith.constant dense<0.000000e+00> : vector<64x128xf32>
    %68 = tpu.matmul %65, %67, %cst_68 {dimension_numbers = #tpu.dot_dimension_numbers<[1], [0], [0], [1], [0, 0, 1, 1], [], []>} : vector<64x128xbf16>, vector<128x128xbf16>, vector<64x128xf32> -> vector<64x128xf32>
    %69 = arith.addf %63, %68 : vector<64x128xf32>
    %c0_69 = arith.constant 0 : index
    %c0_70 = arith.constant 0 : index
    %c0_71 = arith.constant 0 : index
    %70 = vector.load %arg4[%c0_69, %c0_70, %c0_71] : memref<1x64x128xf32, #tpu.memory_space<vmem>>, vector<1x64x128xf32>
    %71 = vector.shape_cast %70 : vector<1x64x128xf32> to vector<64x128xf32>
    %72 = vector.shape_cast %69 : vector<64x128xf32> to vector<1x64x128xf32>
    tpu.vector_store %arg4[%c0_69, %c0_70, %c0_71], %72 {strides = array<i32>} : memref<1x64x128xf32, #tpu.memory_space<vmem>>, vector<1x64x128xf32>,
    %cst_72 = arith.constant dense<0.000000e+00> : vector<128xf32>
    %73 = vector.multi_reduction <add>, %69, %cst_72 [0] : vector<64x128xf32> to vector<128xf32>
    %74 = vector.shape_cast %73 : vector<128xf32> to vector<1x128xf32>
    %c0_73 = arith.constant 0 : index
    %c0_74 = arith.constant 0 : index
    %c0_75 = arith.constant 0 : index
    %75 = vector.load %arg5[%c0_73, %c0_74, %c0_75] : memref<1x2x128xf32, #tpu.memory_space<vmem>>, vector<1x1x128xf32>
    %76 = vector.shape_cast %75 : vector<1x1x128xf32> to vector<1x128xf32>
    %77 = vector.shape_cast %74 : vector<1x128xf32> to vector<1x1x128xf32>
    tpu.vector_store %arg5[%c0_73, %c0_74, %c0_75], %77 {strides = array<i32>} : memref<1x2x128xf32, #tpu.memory_space<vmem>>, vector<1x1x128xf32>,
    %78 = arith.mulf %69, %69 : vector<64x128xf32>
    %cst_76 = arith.constant dense<0.000000e+00> : vector<128xf32>
    %79 = vector.multi_reduction <add>, %78, %cst_76 [0] : vector<64x128xf32> to vector<128xf32>
    %80 = vector.shape_cast %79 : vector<128xf32> to vector<1x128xf32>
    %c0_77 = arith.constant 0 : index
    %c1_78 = arith.constant 1 : index
    %c0_79 = arith.constant 0 : index
    %81 = vector.load %arg5[%c0_77, %c1_78, %c0_79] : memref<1x2x128xf32, #tpu.memory_space<vmem>>, vector<1x1x128xf32>
    %82 = vector.shape_cast %81 : vector<1x1x128xf32> to vector<1x128xf32>
    %83 = vector.shape_cast %80 : vector<1x128xf32> to vector<1x1x128xf32>
    tpu.vector_store %arg5[%c0_77, %c1_78, %c0_79], %83 {strides = array<i32>} : memref<1x2x128xf32, #tpu.memory_space<vmem>>, vector<1x1x128xf32>,
    return
  }
  func.func @transform_0(%arg0: i32) -> (i32, i32, i32) {
    %c0_i32 = arith.constant 0 : i32
    %c0_i32_0 = arith.constant 0 : i32
    %c0_i32_1 = arith.constant 0 : i32
    return %arg0, %c0_i32, %c0_i32_0 : i32, i32, i32
  }
  func.func @transform_1(%arg0: i32) -> (i32, i32) {
    %c0_i32 = arith.constant 0 : i32
    %c0_i32_0 = arith.constant 0 : i32
    %c0_i32_1 = arith.constant 0 : i32
    return %c0_i32, %c0_i32_0 : i32, i32
  }
  func.func @transform_2(%arg0: i32) -> (i32, i32, i32) {
    %c0_i32 = arith.constant 0 : i32
    %c0_i32_0 = arith.constant 0 : i32
    %c0_i32_1 = arith.constant 0 : i32
    %c0_i32_2 = arith.constant 0 : i32
    return %c0_i32, %c0_i32_0, %c0_i32_1 : i32, i32, i32
  }
  func.func @transform_3(%arg0: i32) -> (i32, i32, i32) {
    %c0_i32 = arith.constant 0 : i32
    %c0_i32_0 = arith.constant 0 : i32
    %c0_i32_1 = arith.constant 0 : i32
    return %arg0, %c0_i32, %c0_i32_0 : i32, i32, i32
  }
  func.func @transform_4(%arg0: i32) -> (i32, i32, i32) {
    %c0_i32 = arith.constant 0 : i32
    %c0_i32_0 = arith.constant 0 : i32
    %c0_i32_1 = arith.constant 0 : i32
    return %arg0, %c0_i32, %c0_i32_0 : i32, i32, i32
  }
}

</mosaic_0001>

<bundles_post_ra>
// kernel: basicblock_forward.5
= control target key start
LH: loop header
LB: loop body
LE: loop exit
PB: predicated region body
PF: predicated region fallthrough
CT: control target
= control target key end

     0   :  { %s438_s15 = smov 0   ;;  %s525_s0 = inlined_call_operand.vmem [shape: f32[2,64,128], index: 0, kind: input, shape index: {}]   ;;  %s526_s1 = inlined_call_operand.vmem [shape: f32[2,64,128], index: 1, kind: input, shape index: {}]   ;;  %s527_s2 = inlined_call_operand.vmem [shape: f32[2,128], index: 2, kind: input, shape index: {}]   ;;  %s528_s3 = inlined_call_operand.vmem [shape: f32[2,128], index: 3, kind: input, shape index: {}]   ;;  %s529_s4 = inlined_call_operand.vmem [shape: f32[2,64,128], index: 4, kind: output, shape index: {}]  }
   0x1 LB: > { %s377_s16 = sadd.s32 4294967295, %s411_s15   ;;  %p381_p0 = scmp.ge.s32.totalorder %s411_s15, 1  ;;  %s411_s15 = sphi %s438_s15, %s14_s15  }
   0x2   : > { %p172_p1 = scmp.lt.s32.totalorder %s411_s15, 3 }
   0x4   : > { %p173_p2 = pnand %p381_p0, %p172_p1 }
   0x5   : > { %p203_p3 = scmp.lt.s32.totalorder (!%p173_p2), %s377_s16, 1  ;;  %v388_v0 = vld [vmem:[%s527_s2] ss:$0 sm:$0xff] (!%p173_p2)  ;;  %v469_v2 = vld [vmem:[%s527_s2 + $0x1] ss:$0 sm:$0xff] (!%p173_p2) }
   0x6   : > { %176 = sbr.rel (%p173_p2) target bundleno = 35 (0x23), region = 36  ;;  %v390_v1 = vld [vmem:[%s528_s3] ss:$0 sm:$0xff] (!%p173_p2)  ;;  %v474_v3 = vld [vmem:[%s528_s3 + $0x1] ss:$0 sm:$0xff] (!%p173_p2) }
   0xd   : > { %s531_s16 = smov (!%p203_p3, %s377_s16), 1 }
   0xe   : > { %s446_s17 = sshll.u32 %s531_s16, 6 }
   0xf   : > { %s458_s24 = scalar_lea.vmem %s525_s0, %s446_s17  ;;  %s464_s27 = scalar_lea.vmem %s526_s1, %s446_s17 }
  0x10   : > { %v218_v4 = vld [vmem:[%s458_s24] sm:$0xff]  ;;  %v219_v6 = vld [vmem:[%s458_s24 + $0x8] sm:$0xff]  ;;  %v220_v11 = vld [vmem:[%s458_s24 + $0x10] sm:$0xff]  ;;  %s499_s8 = scalar_lea.vmem %s529_s4, %s446_s17 }
  0x11   : > { %v252_v5 = vld [vmem:[%s464_s27] sm:$0xff]  ;;  %v231_v7 = vmul.f32 %v388_v0, %v218_v4  ;;  %v232_v9 = vmul.f32 %v388_v0, %v219_v6  ;;  %v253_v10 = vld [vmem:[%s464_s27 + $0x8] sm:$0xff]  ;;  %v254_v12 = vld [vmem:[%s464_s27 + $0x10] sm:$0xff]  ;;  %v233_v14 = vmul.f32 %v388_v0, %v220_v11 }
  0x12   : > { %v265_v8 = vmul.f32 %v390_v1, %v252_v5  ;;  %v266_v13 = vmul.f32 %v390_v1, %v253_v10  ;;  %v267_v15 = vmul.f32 %v390_v1, %v254_v12  ;;  %v221_v16 = vld [vmem:[%s458_s24 + $0x18] sm:$0xff]  ;;  %v222_v18 = vld [vmem:[%s458_s24 + $0x20] sm:$0xff]  ;;  %v223_v24 = vld [vmem:[%s458_s24 + $0x28] sm:$0xff] }
  0x13   : > { %v255_v17 = vld [vmem:[%s464_s27 + $0x18] sm:$0xff]  ;;  %v244_v19 = vadd.f32 %v469_v2, %v231_v7  ;;  %v245_v21 = vadd.f32 %v469_v2, %v232_v9  ;;  %v234_v22 = vmul.f32 %v388_v0, %v221_v16  ;;  %v256_v23 = vld [vmem:[%s464_s27 + $0x20] sm:$0xff]  ;;  %v246_v26 = vadd.f32 %v469_v2, %v233_v14  ;;  %v257_v29 = vld [vmem:[%s464_s27 + $0x28] sm:$0xff] }
  0x14   : > { %v278_v20 = vadd.f32 %v474_v3, %v265_v8  ;;  %v279_v25 = vadd.f32 %v474_v3, %v266_v13  ;;  %v280_v27 = vadd.f32 %v474_v3, %v267_v15  ;;  %v268_v28 = vmul.f32 %v390_v1, %v255_v17  ;;  %v224_v38 = vld [vmem:[%s458_s24 + $0x30] sm:$0xff]  ;;  %v225_v44 = vld [vmem:[%s458_s24 + $0x38] sm:$0xff] }
  0x15   : > { %v247_v31 = vadd.f32 %v469_v2, %v234_v22  ;;  %v235_v32 = vmul.f32 %v388_v0, %v222_v18  ;;  %v269_v33 = vmul.f32 %v390_v1, %v256_v23  ;;  %v236_v37 = vmul.f32 %v388_v0, %v223_v24  ;;  %v258_v39 = vld [vmem:[%s464_s27 + $0x30] sm:$0xff]  ;;  %v259_v45 = vld [vmem:[%s464_s27 + $0x38] sm:$0xff] }
  0x16   : > { %v286_v30 = vadd.f32 %v278_v20, %v244_v19  ;;  %v287_v34 = vadd.f32 %v279_v25, %v245_v21  ;;  %v288_v35 = vadd.f32 %v280_v27, %v246_v26  ;;  %v281_v36 = vadd.f32 %v474_v3, %v268_v28 }
  0x17   : > { %v248_v41 = vadd.f32 %v469_v2, %v235_v32  ;;  %v282_v42 = vadd.f32 %v474_v3, %v269_v33  ;;  %v270_v43 = vmul.f32 %v390_v1, %v257_v29  ;;  %v249_v49 = vadd.f32 %v469_v2, %v236_v37 }
  0x18   : > { %v294_v40 = vmax.f32 %v286_v30, 0.0  ;;  %v295_v46 = vmax.f32 %v287_v34, 0.0  ;;  %v296_v47 = vmax.f32 %v288_v35, 0.0  ;;  %v289_v48 = vadd.f32 %v281_v36, %v247_v31 }
  0x19   : > { %v290_v50 = vadd.f32 %v282_v42, %v248_v41  ;;  %v283_v51 = vadd.f32 %v474_v3, %v270_v43  ;;  %v237_v52 = vmul.f32 %v388_v0, %v224_v38  ;;  %v271_v53 = vmul.f32 %v390_v1, %v258_v39 }
  0x1a   : > { %302 = vst [vmem:[%s499_s8] sm:$0xff] %v294_v40  ;;  %303 = vst [vmem:[%s499_s8 + $0x8] sm:$0xff] %v295_v46  ;;  %v297_v54 = vmax.f32 %v289_v48, 0.0  ;;  %v238_v55 = vmul.f32 %v388_v0, %v225_v44  ;;  %v272_v56 = vmul.f32 %v390_v1, %v259_v45 }
  0x1b   : > { %304 = vst [vmem:[%s499_s8 + $0x10] sm:$0xff] %v296_v47  ;;  %v298_v57 = vmax.f32 %v290_v50, 0.0  ;;  %v291_v58 = vadd.f32 %v283_v51, %v249_v49  ;;  %v250_v59 = vadd.f32 %v469_v2, %v237_v52  ;;  %v284_v60 = vadd.f32 %v474_v3, %v271_v53 }
  0x1c   : > { %305 = vst [vmem:[%s499_s8 + $0x18] sm:$0xff] %v297_v54  ;;  %v251_v61 = vadd.f32 %v469_v2, %v238_v55  ;;  %v285_v62 = vadd.f32 %v474_v3, %v272_v56 }
  0x1d   : > { %306 = vst [vmem:[%s499_s8 + $0x20] sm:$0xff] %v298_v57  ;;  %v299_v63 = vmax.f32 %v291_v58, 0.0  ;;  %v292_v4 = vadd.f32 %v284_v60, %v250_v59 }
  0x1e   : > { %v293_v5 = vadd.f32 %v285_v62, %v251_v61 }
  0x1f   : > { %307 = vst [vmem:[%s499_s8 + $0x28] sm:$0xff] %v299_v63  ;;  %v300_v0 = vmax.f32 %v292_v4, 0.0 }
  0x20   : > { %v301_v6 = vmax.f32 %v293_v5, 0.0 }
  0x21   : > { %308 = vst [vmem:[%s499_s8 + $0x30] sm:$0xff] %v300_v0 }
  0x22   : > { %309 = vst [vmem:[%s499_s8 + $0x38] sm:$0xff] %v301_v6 }
  0x23 PF: > { %s14_s15 = sadd.s32 1, %s411_s15  }
  0x24   : > { %p11_p4 = scmp.ge.s32.totalorder %s14_s15, 4  }
  0x26   :  { %13 = sbr.rel (!%p11_p4) target bundleno = 1 (0x1), region = 69 }

// kernel: basicblock_forward.3
= control target key start
LH: loop header
LB: loop body
LE: loop exit
PB: predicated region body
PF: predicated region fallthrough
CT: control target
= control target key end

     0   :  { %s2512_s21 = smov 0   ;;  %s2799_s0 = inlined_call_operand.vmem [shape: bf16[2,4,9,9,4], index: 0, kind: input, shape index: {}]   ;;  %s2800_s1 = inlined_call_operand.vmem [shape: bf16[9,4,128], index: 1, kind: input, shape index: {}]   ;;  %s2801_s2 = inlined_call_operand.vmem [shape: bf16[4,128], index: 2, kind: input, shape index: {}]   ;;  %s2802_s3 = inlined_call_operand.vmem [shape: f32[2,64,128], index: 3, kind: output, shape index: {0}]   ;;  %s2803_s4 = inlined_call_operand.vmem [shape: f32[2,2,128], index: 4, kind: output, shape index: {1}]   ;;  %s2804_s5 = inlined_call_operand.vmem [shape: f32[2,64,128], index: 5, kind: output, shape index: {2}]   ;;  %s2805_s6 = inlined_call_operand.vmem [shape: f32[2,2,128], index: 6, kind: output, shape index: {3}]  }
   0x1 LB: > { %s2024_s22 = sadd.s32 4294967295, %s2475_s21   ;;  %p2028_p0 = scmp.ge.s32.totalorder %s2475_s21, 1  ;;  %s2475_s21 = sphi %s2512_s21, %s17_s21  }
   0x2   : > { %p219_p1 = scmp.lt.s32.totalorder %s2475_s21, 3 }
   0x4   : > { %p220_p2 = pnand %p2028_p0, %p219_p1 }
   0x5   : > { %vm339_vm0 = vcmask (!%p220_p2), 1041408   ;;  %v2095_v0 = vld [vmem:[%s2800_s1 + $0x8] sm:$0x3] (!%p220_p2)  ;;  %v2044_v1 = vld [vmem:[%s2800_s1 + $0x2] sm:$0x3] (!%p220_p2)  ;;  %p262_p3 = scmp.lt.s32.totalorder (!%p220_p2), %s2024_s22, 1 }
   0x6   : > { %223 = sbr.rel (%p220_p2) target bundleno = 335 (0x14f), region = 32  ;;  %2426 = vmatprep.subr.msk.bf16.mxu0 (!%p220_p2), %vm339_vm0, %v2095_v0  ;;  %2422 = vmatprep.subr.msk.bf16.mxu1 (!%p220_p2), %vm339_vm0, %v2044_v1  ;;  %v904_v2 = vsel (!%p220_p2), %vm339_vm0, %v2095_v0, 0  ;;  %v341_v3 = vsel (!%p220_p2), %vm339_vm0, %v2044_v1, 0  ;;  %v2120_v4 = vld [vmem:[%s2800_s1 + $0xa] sm:$0x3] (!%p220_p2)  ;;  %vm326_vm1 = vcmask (!%p220_p2), 31744  }
   0x7   : > { %2299 = vmatpush3.bf16.msra.mxu0 (!%p220_p2), %v904_v2  ;;  %2259 = vmatpush3.bf16.msra.mxu1 (!%p220_p2), %v341_v3  ;;  %v294_v5 = vld [vmem:[%s2800_s1] sm:$0x3] (!%p220_p2)  ;;  %v2137_v6 = vld [vmem:[%s2800_s1 + $0xc] sm:$0x3] (!%p220_p2)  ;;  %v1134_v7 = vsel (!%p220_p2), %vm339_vm0, %v2120_v4, 0 }
   0x8   : > { %2427 = vmatprep.subr.msk.bf16.mxu0 (!%p220_p2), %vm339_vm0, %v2120_v4  ;;  %2423 = vmatprep.subr.msk.bf16.mxu1 (!%p220_p2), %vm339_vm0, %v294_v5  ;;  %v441_v8 = vsel (!%p220_p2), %vm339_vm0, %v294_v5, 0  ;;  %v2552_v9 = vsel (!%p220_p2), %vm339_vm0, %v2137_v6, 0  ;;  %v2061_v14 = vld [vmem:[%s2800_s1 + $0x4] sm:$0x3] (!%p220_p2)  ;;  %vm524_vm2 = vsmask.f32 (!%p220_p2), 3328 }
   0x9   : > { %vm525_vm3 = vsmask.f32 (!%p220_p2), 7440  ;;  %v666_v56 = vsel (!%p220_p2), %vm339_vm0, %v2061_v14, 0  ;;  %v2597_v58 = vld [vmem:[%s2800_s1 + $0xe] sm:$0x3] (!%p220_p2) }
   0xa   : > { %vm2588_vm4 = vmor (!%p220_p2), %vm524_vm2, %vm525_vm3  ;;  %v2602_v59 = vld [vmem:[%s2800_s1 + $0x6] sm:$0x3] (!%p220_p2) }
   0xd   : > { %s2809_s22 = smov (!%p262_p3, %s2024_s22), 1 }
   0xe   : > { %s2432_s9 = smul.u32 288, %s2809_s22  ;;  %s2206_s25 = sshll.u32 %s2809_s22, 6 }
   0xf   : > { %s2766_s28 = scalar_lea.vmem %s2802_s3, %s2206_s25  ;;  %s2771_s7 = scalar_lea.vmem %s2804_s5, %s2206_s25 }
  0x10   : > { %s2547_s12 = scalar_lea.vmem %s2799_s0, %s2432_s9  ;;  %s2032_s8 = sshll.u32 %s2809_s22, 1 }
  0x11   : > { %v2441_v10 = vld [vmem:[%s2547_s12 + $0x48] ss:$8 sps:$4 sm:$0xff]   ;;  %v2442_v11 = vld [vmem:[%s2547_s12 + $0xd8] ss:$8 sps:$4 sm:$0xff]   ;;  %v2105_v21 = vld [vmem:[%s2547_s12 + $0x94] sm:$0x1]  ;;  %s275_s11 = scalar_lea.vmem %s2803_s4, %s2032_s8  ;;  %s284_s14 = scalar_lea.vmem %s2805_s6, %s2032_s8 }
  0x12   : > { %2260 = vmatprep.mubr.msk.bf16.mxu1 %vm326_vm1, %v2441_v10  ;;  %v2443_v12 = vld [vmem:[%s2547_s12 + $0x58] ss:$8 sps:$4 sm:$0xff]   ;;  %2300 = vmatprep.mubr.msk.bf16.mxu0 %vm326_vm1, %v2442_v11  ;;  %v2444_v13 = vld [vmem:[%s2547_s12 + $0xe8] ss:$8 sps:$4 sm:$0xff]   ;;  %v2107_v23 = vld [vmem:[%s2547_s12 + $0x9c] sm:$0x1] }
  0x13   : > { %2261 = vmatmul.mubr.msk.bf16.vlgmr.msra.gmra.mrb[0].mxu1 %vm326_vm1, %v2443_v12  ;;  %v2445_v15 = vld [vmem:[%s2547_s12 + $0x68] ss:$8 sps:$4 sm:$0xff]   ;;  %2301 = vmatmul.mubr.msk.bf16.vlgmr.msra.gmra.mrb[0].mxu0 %vm326_vm1, %v2444_v13  ;;  %v2446_v16 = vld [vmem:[%s2547_s12 + $0xf8] ss:$8 sps:$4 sm:$0xff]   ;;  %v1005_v26 = vshll.u32 %v2105_v21, 16  ;;  %v1019_v29 = vshll.u32 %v2107_v23, 16 }
  0x14   : > { %2269 = vmatpush3.bf16.msra.mxu1 %v441_v8  ;;  %2309 = vmatpush3.bf16.msra.mxu0 %v1134_v7  ;;  %v2447_v17 = vld [vmem:[%s2547_s12 + $0x78] ss:$8 sps:$4 sm:$0xff]   ;;  %v2448_v18 = vld [vmem:[%s2547_s12 + $0x108] ss:$8 sps:$4 sm:$0xff]   ;;  %v2109_v37 = vld [vmem:[%s2547_s12 + $0xa4] sm:$0x1] }
  0x15   : > { %2264 = vmatprep.mubr.msk.bf16.mxu1 %vm326_vm1, %v2445_v15  ;;  %2304 = vmatprep.mubr.msk.bf16.mxu0 %vm326_vm1, %v2446_v16  ;;  %v2449_v19 = vld [vmem:[%s2547_s12] ss:$8 sps:$4 sm:$0xff]   ;;  %v2104_v20 = vld [vmem:[%s2547_s12 + $0x90] sm:$0xf]  ;;  %v2106_v22 = vld [vmem:[%s2547_s12 + $0x98] sm:$0xf] }
  0x16   : > { %2428 = vmatprep.subr.msk.bf16.mxu0 %vm339_vm0, %v2137_v6  ;;  %2424 = vmatprep.subr.msk.bf16.mxu1 %vm339_vm0, %v2061_v14  ;;  %v996_v24 = vshrl.u32 %v2104_v20, 16  ;;  %v999_v25 = vshll.u32 %v2104_v20, 16  ;;  %v1010_v27 = vshrl.u32 %v2106_v22, 16  ;;  %v1013_v28 = vshll.u32 %v2106_v22, 16  ;;  %v2108_v36 = vld [vmem:[%s2547_s12 + $0xa0] sm:$0xf] }
  0x17   : > { %v1007_v32 = vrot.slane %v1005_v26, 5  ;;  %v1021_v35 = vrot.slane %v1019_v29, 5  ;;  %v2450_v39 = vld [vmem:[%s2547_s12 + $0x10] ss:$8 sps:$4 sm:$0xff]   ;;  %v2110_v40 = vld [vmem:[%s2547_s12 + $0xa8] sm:$0xf] }
  0x18   : > { %v998_v30 = vrot.slane %v996_v24, 4  ;;  %v1001_v31 = vrot.slane %v999_v25, 5  ;;  %v1012_v33 = vrot.slane %v1010_v27, 4  ;;  %v1015_v34 = vrot.slane %v1013_v28, 5  ;;  %v2111_v41 = vld [vmem:[%s2547_s12 + $0xac] sm:$0x1] }
  0x19   : > { %v1024_v42 = vshrl.u32 %v2108_v36, 16  ;;  %v1027_v43 = vshll.u32 %v2108_v36, 16  ;;  %v1033_v46 = vshll.u32 %v2109_v37, 16  ;;  %v1038_v47 = vshrl.u32 %v2110_v40, 16  ;;  %v2451_v57 = vld [vmem:[%s2547_s12 + $0x20] ss:$8 sps:$4 sm:$0xff]  }
  0x1a   : > { %v1002_v38 = vor.u32 %v1001_v31, %v998_v30  ;;  %v1016_v45 = vor.u32 %v1015_v34, %v1012_v33  ;;  %v1041_v48 = vshll.u32 %v2110_v40, 16  ;;  %v1047_v52 = vshll.u32 %v2111_v41, 16  ;;  %v2112_v0 = vld [vmem:[%s2547_s12 + $0xb0] sm:$0xf]  ;;  %v2113_v1 = vld [vmem:[%s2547_s12 + $0xb4] sm:$0x1] }
  0x1b   : > { %2265 = vmatmul.mubr.msk.bf16.gmra.mrb[4].mxu1 %vm326_vm1, %v2447_v17  ;;  %2305 = vmatmul.mubr.msk.bf16.gmra.mrb[4].mxu0 %vm326_vm1, %v2448_v18  ;;  %v1026_v50 = vrot.slane %v1024_v42, 4  ;;  %v1029_v51 = vrot.slane %v1027_v43, 5  ;;  %v1040_v54 = vrot.slane %v1038_v47, 4  ;;  %v1035_v62 = vrot.slane %v1033_v46, 5  ;;  %v2114_v4 = vld [vmem:[%s2547_s12 + $0xb8] sm:$0xf] }
  0x1c   : > { %2270 = vmatprep.mubr.msk.bf16.mxu1 %vm326_vm1, %v2449_v19  ;;  %v1003_v49 = vrot.slane %v1002_v38, 4  ;;  %v1017_v53 = vrot.slane %v1016_v45, 4  ;;  %v1043_v55 = vrot.slane %v1041_v48, 5  ;;  %v1049_v63 = vrot.slane %v1047_v52, 5  ;;  %v2115_v5 = vld [vmem:[%s2547_s12 + $0xbc] sm:$0x1] }
  0x1d   : > { %v1030_v61 = vor.u32 %v1029_v51, %v1026_v50  ;;  %v1052_v6 = vshrl.u32 %v2112_v0, 16  ;;  %v1055_v7 = vshll.u32 %v2112_v0, 16  ;;  %v1061_v11 = vshll.u32 %v2113_v1, 16  ;;  %v2452_v20 = vld [vmem:[%s2547_s12 + $0x30] ss:$8 sps:$4 sm:$0xff]  }
  0x1e   : > { %v1008_v60 = vsel %vm2588_vm4, %v1003_v49, %v1007_v32  ;;  %v1022_v2 = vsel %vm2588_vm4, %v1017_v53, %v1021_v35  ;;  %v1044_v3 = vor.u32 %v1043_v55, %v1040_v54  ;;  %v1066_v12 = vshrl.u32 %v2114_v4, 16  ;;  %v2116_v26 = vld [vmem:[%s2547_s12 + $0xc0] sm:$0xf]  ;;  %v2117_v27 = vld [vmem:[%s2547_s12 + $0xc4] sm:$0x1] }
  0x1f   : > { %v2121_v8 = vcombine.low %v1008_v60, %v1022_v2  ;;  %v1031_v10 = vrot.slane %v1030_v61, 4  ;;  %v1054_v14 = vrot.slane %v1052_v6, 4  ;;  %v1057_v15 = vrot.slane %v1055_v7, 5  ;;  %v2118_v30 = vld [vmem:[%s2547_s12 + $0xc8] sm:$0xf] }
  0x20   : > { %v1045_v13 = vrot.slane %v1044_v3, 4  ;;  %v1069_v16 = vshll.u32 %v2114_v4, 16  ;;  %v1068_v18 = vrot.slane %v1066_v12, 4  ;;  %v1075_v19 = vshll.u32 %v2115_v5, 16  ;;  %v2119_v31 = vld [vmem:[%s2547_s12 + $0xcc] sm:$0x1] }
  0x21   : > { %2310 = vmatprep.mubr.msk.bf16.mxu0 %vm326_vm1, %v2121_v8  ;;  %v1036_v17 = vsel %vm2588_vm4, %v1031_v10, %v1035_v62  ;;  %v2620_v21 = vsel %vm339_vm0, %v2597_v58, 0  ;;  %v1058_v23 = vor.u32 %v1057_v15, %v1054_v14  ;;  %v1063_v24 = vrot.slane %v1061_v11, 5  ;;  %v508_v37 = vld [vmem:[%s2547_s12] sm:$0xf]  ;;  %v509_v42 = vld [vmem:[%s2547_s12 + $0x4] sm:$0x1] }
  0x22   : > { %v1050_v22 = vsel %vm2588_vm4, %v1045_v13, %v1049_v63  ;;  %v1071_v25 = vrot.slane %v1069_v16, 5  ;;  %v1077_v29 = vrot.slane %v1075_v19, 5  ;;  %v1080_v32 = vshrl.u32 %v2116_v26, 16  ;;  %v510_v48 = vld [vmem:[%s2547_s12 + $0x8] sm:$0xf] }
  0x23   : > { %2271 = vmatmul.mubr.msk.bf16.vlgmr.msra.gmra.mrb[0].mxu1 %vm326_vm1, %v2450_v39  ;;  %v2122_v28 = vcombine.low %v1036_v17, %v1050_v22  ;;  %v1059_v33 = vrot.slane %v1058_v23, 4  ;;  %v1083_v35 = vshll.u32 %v2116_v26, 16  ;;  %v1089_v36 = vshll.u32 %v2117_v27, 16  ;;  %v511_v52 = vld [vmem:[%s2547_s12 + $0xc] sm:$0x1] }
  0x24   : > { %2279 = vmatpush3.bf16.msra.mxu1 %v666_v56  ;;  %2274 = vmatprep.mubr.msk.bf16.mxu1 %vm326_vm1, %v2451_v57  ;;  %v1072_v34 = vor.u32 %v1071_v25, %v1068_v18  ;;  %v1082_v38 = vrot.slane %v1080_v32, 4  ;;  %v1094_v39 = vshrl.u32 %v2118_v30, 16  ;;  %v1097_v40 = vshll.u32 %v2118_v30, 16  ;;  %v512_v63 = vld [vmem:[%s2547_s12 + $0x10] sm:$0xf] }
  0x25   : > { %2425 = vmatprep.subr.msk.bf16.mxu1 %vm339_vm0, %v2602_v59  ;;  %2311 = vmatmul.mubr.msk.bf16.vlgmr.msra.gmra.mrb[0].mxu0 %vm326_vm1, %v2122_v28  ;;  %v1103_v41 = vshll.u32 %v2119_v31, 16  ;;  %v1064_v43 = vsel %vm2588_vm4, %v1059_v33, %v1063_v24  ;;  %v1085_v46 = vrot.slane %v1083_v35, 5  ;;  %v1091_v47 = vrot.slane %v1089_v36, 5  ;;  %v513_v4 = vld [vmem:[%s2547_s12 + $0x14] sm:$0x1] }
  0x26   : > { %2319 = vmatpush3.bf16.msra.mxu0 %v2552_v9  ;;  %v1073_v45 = vrot.slane %v1072_v34, 4  ;;  %v1096_v49 = vrot.slane %v1094_v39, 4  ;;  %v1099_v50 = vrot.slane %v1097_v40, 5  ;;  %v528_v53 = vshrl.u32 %v508_v37, 16  ;;  %v2453_v7 = vld [vmem:[%s2547_s12 + $0x8] ss:$8 sps:$4 sm:$0xff]  }
  0x27   : > { %v1105_v51 = vrot.slane %v1103_v41, 5  ;;  %2429 = vmatprep.subr.msk.bf16.mxu0 %vm339_vm0, %v2597_v58  ;;  %v1086_v54 = vor.u32 %v1085_v46, %v1082_v38  ;;  %v531_v55 = vshll.u32 %v508_v37, 16  ;;  %v537_v56 = vshll.u32 %v509_v42, 16  ;;  %v514_v8 = vld [vmem:[%s2547_s12 + $0x18] sm:$0xf] }
  0x28   : > { %v1078_v9 = vsel %vm2588_vm4, %v1073_v45, %v1077_v29  ;;  %v1100_v60 = vor.u32 %v1099_v50, %v1096_v49  ;;  %v530_v61 = vrot.slane %v528_v53, 4  ;;  %v542_v62 = vshrl.u32 %v510_v48, 16  ;;  %v515_v14 = vld [vmem:[%s2547_s12 + $0x1c] sm:$0x1]  ;;  %v516_v25 = vld [vmem:[%s2547_s12 + $0x20] sm:$0xf] }
  0x29   : > { %v2123_v57 = vcombine.low %v1064_v43, %v1078_v9  ;;  %v1087_v0 = vrot.slane %v1086_v54, 4  ;;  %v533_v1 = vrot.slane %v531_v55, 5  ;;  %v539_v2 = vrot.slane %v537_v56, 5  ;;  %v517_v30 = vld [vmem:[%s2547_s12 + $0x24] sm:$0x1] }
  0x2a   : > { %v545_v3 = vshll.u32 %v510_v48, 16  ;;  %v1101_v58 = vrot.slane %v1100_v60, 4  ;;  %v544_v5 = vrot.slane %v542_v62, 4  ;;  %v551_v6 = vshll.u32 %v511_v52, 16  ;;  %v518_v34 = vld [vmem:[%s2547_s12 + $0x28] sm:$0xf] }
  0x2b   : > { %2275 = vmatmul.mubr.msk.bf16.gmra.mrb[4].mxu1 %vm326_vm1, %v2452_v20  ;;  %2314 = vmatprep.mubr.msk.bf16.mxu0 %vm326_vm1, %v2123_v57  ;;  %v556_v10 = vshrl.u32 %v512_v63, 16  ;;  %v1092_v11 = vsel %vm2588_vm4, %v1087_v0, %v1091_v47  ;;  %v534_v12 = vor.u32 %v533_v1, %v530_v61  ;;  %v559_v15 = vshll.u32 %v512_v63, 16  ;;  %v519_v35 = vld [vmem:[%s2547_s12 + $0x2c] sm:$0x1]  ;;  %v2454_v43 = vld [vmem:[%s2547_s12 + $0x18] ss:$8 sps:$4 sm:$0xff]  }
  0x2c   : > { %v547_v13 = vrot.slane %v545_v3, 5  ;;  %v1106_v16 = vsel %vm2588_vm4, %v1101_v58, %v1105_v51  ;;  %v553_v17 = vrot.slane %v551_v6, 5  ;;  %v565_v19 = vshll.u32 %v513_v4, 16  ;;  %v2455_v51 = vld [vmem:[%s2547_s12 + $0x28] ss:$8 sps:$4 sm:$0xff]  }
  0x2d   : > { %v558_v18 = vrot.slane %v556_v10, 4  ;;  %v2124_v20 = vcombine.low %v1092_v11, %v1106_v16  ;;  %v535_v22 = vrot.slane %v534_v12, 4  ;;  %v561_v24 = vrot.slane %v559_v15, 5  ;;  %v520_v52 = vld [vmem:[%s2547_s12 + $0x30] sm:$0xf] }
  0x2e   : > { %v548_v23 = vor.u32 %v547_v13, %v544_v5  ;;  %v567_v26 = vrot.slane %v565_v19, 5  ;;  %v570_v27 = vshrl.u32 %v514_v8, 16  ;;  %v573_v28 = vshll.u32 %v514_v8, 16  ;;  %v521_v56 = vld [vmem:[%s2547_s12 + $0x34] sm:$0x1] }
  0x2f   : > { %v579_v29 = vshll.u32 %v515_v14, 16  ;;  %2315 = vmatmul.mubr.msk.bf16.gmra.mrb[4].mxu0 %vm326_vm1, %v2124_v20  ;;  %v540_v31 = vsel %vm2588_vm4, %v535_v22, %v539_v2  ;;  %v562_v33 = vor.u32 %v561_v24, %v558_v18  ;;  %v584_v36 = vshrl.u32 %v516_v25, 16  ;;  %v522_v63 = vld [vmem:[%s2547_s12 + $0x38] sm:$0xf]  ;;  %v523_v0 = vld [vmem:[%s2547_s12 + $0x3c] sm:$0x1] }
  0x30   : > { %v549_v32 = vrot.slane %v548_v23, 4  ;;  %2320 = vmatprep.mubr.msk.bf16.mxu0 %vm326_vm1, %v2453_v7  ;;  %v572_v37 = vrot.slane %v570_v27, 4  ;;  %v575_v38 = vrot.slane %v573_v28, 5  ;;  %v587_v40 = vshll.u32 %v516_v25, 16  ;;  %v2179_v1 = vld [vmem:[%s2800_s1 + $0x10] sm:$0x3] }
  0x31   : > { %v581_v39 = vrot.slane %v579_v29, 5  ;;  %v563_v42 = vrot.slane %v562_v33, 4  ;;  %v586_v45 = vrot.slane %v584_v36, 4  ;;  %v593_v46 = vshll.u32 %v517_v30, 16  ;;  %v1729_v15 = vld [vmem:[%s2801_s2] sm:$0x3] }
  0x32   : > { %v554_v41 = vsel %vm2588_vm4, %v549_v32, %v553_v17  ;;  %v576_v48 = vor.u32 %v575_v38, %v572_v37  ;;  %v589_v49 = vrot.slane %v587_v40, 5  ;;  %v598_v50 = vshrl.u32 %v518_v34, 16  ;;  %v2456_v20 = vld [vmem:[%s2547_s12 + $0x38] ss:$8 sps:$4 sm:$0xff]   ;;  %v2163_v37 = vld [vmem:[%s2547_s12 + $0x8] sm:$0xf] }
  0x33   : > { %v2062_v47 = vcombine.low %v540_v31, %v554_v41  ;;  %v785_v53 = vsel %vm339_vm0, %v2602_v59, 0  ;;  %v595_v9 = vrot.slane %v593_v46, 5  ;;  %v601_v54 = vshll.u32 %v518_v34, 16  ;;  %v2458_v23 = vld [vmem:[%s2547_s12 + $0x50] ss:$8 sps:$4 sm:$0xff]  }
  0x34   : > { %v607_v55 = vshll.u32 %v519_v35, 16  ;;  %v568_v57 = vsel %vm2588_vm4, %v563_v42, %v567_v26  ;;  %v577_v60 = vrot.slane %v576_v48, 4  ;;  %v590_v61 = vor.u32 %v589_v49, %v586_v45  ;;  %v2457_v34 = vld [vmem:[%s2547_s12 + $0x90] ss:$8 sps:$4 sm:$0xff]   ;;  %v2460_v36 = vld [vmem:[%s2547_s12 + $0x60] ss:$8 sps:$4 sm:$0xff]  }
  0x35   : > { %2280 = vmatprep.mubr.msk.bf16.mxu1 %vm326_vm1, %v2062_v47  ;;  %v600_v62 = vrot.slane %v598_v50, 4  ;;  %v603_v2 = vrot.slane %v601_v54, 5  ;;  %v612_v3 = vshrl.u32 %v520_v52, 16  ;;  %v615_v4 = vshll.u32 %v520_v52, 16  ;;  %v2164_v38 = vld [vmem:[%s2547_s12 + $0xc] sm:$0x1] }
  0x36   : > { %v609_v59 = vrot.slane %v607_v55, 5  ;;  %v582_v58 = vsel %vm2588_vm4, %v577_v60, %v581_v39  ;;  %v591_v5 = vrot.slane %v590_v61, 4  ;;  %v621_v6 = vshll.u32 %v521_v56, 16  ;;  %v2165_v39 = vld [vmem:[%s2547_s12 + $0x10] sm:$0xf] }
  0x37   : > { %v626_v7 = vshrl.u32 %v522_v63, 16  ;;  %v2063_v8 = vcombine.low %v568_v57, %v582_v58  ;;  %2321 = vmatmul.mubr.msk.bf16.vlgmr.msra.gmra.mrb[0].mxu0 %vm326_vm1, %v2454_v43  ;;  %v604_v10 = vor.u32 %v603_v2, %v600_v62  ;;  %v614_v11 = vrot.slane %v612_v3, 4  ;;  %v2166_v40 = vld [vmem:[%s2547_s12 + $0x14] sm:$0x1]  ;;  %v2462_v46 = vld [vmem:[%s2547_s12 + $0x70] ss:$8 sps:$4 sm:$0xff]  }
  0x38   : > { %v617_v12 = vrot.slane %v615_v4, 5  ;;  %2329 = vmatpush3.bf16.msra.mxu0 %v2620_v21  ;;  %2324 = vmatprep.mubr.msk.bf16.mxu0 %vm326_vm1, %v2455_v51  ;;  %v629_v14 = vshll.u32 %v522_v63, 16  ;;  %v596_v16 = vsel %vm2588_vm4, %v591_v5, %v595_v9  ;;  %v635_v19 = vshll.u32 %v523_v0, 16  ;;  %v2459_v49 = vld [vmem:[%s2547_s12 + $0xa0] ss:$8 sps:$4 sm:$0xff]  }
  0x39   : > { %v628_v13 = vrot.slane %v626_v7, 4  ;;  %2281 = vmatmul.mubr.msk.bf16.vlgmr.msra.gmra.mrb[0].mxu1 %vm326_vm1, %v2063_v8  ;;  %v605_v17 = vrot.slane %v604_v10, 4  ;;  %2430 = vmatprep.subr.msk.bf16.mxu0 %vm339_vm0, %v2179_v1  ;;  %v623_v21 = vrot.slane %v621_v6, 5  ;;  %v1602_v31 = vsel %vm339_vm0, %v2179_v1, 0  ;;  %v2167_v9 = vld [vmem:[%s2547_s12 + $0x18] sm:$0xf] }
  0x3a   : > { %v618_v18 = vor.u32 %v617_v12, %v614_v11  ;;  %2289 = vmatpush3.bf16.msra.mxu1 %v785_v53  ;;  %v631_v22 = vrot.slane %v629_v14, 5  ;;  %v637_v28 = vrot.slane %v635_v19, 5  ;;  %v1763_v32 = vsel %vm339_vm0, %v1729_v15, 0  ;;  %v2461_v54 = vld [vmem:[%s2547_s12 + $0xb0] ss:$8 sps:$4 sm:$0xff]  }
  0x3b   : > { %v610_v24 = vsel %vm2588_vm4, %v605_v17, %v609_v59  ;;  %2431 = vmatprep.subr.msk.bf16.mxu1 %vm339_vm0, %v1729_v15  ;;  %v1464_v41 = vshrl.u32 %v2163_v37, 16  ;;  %v1467_v42 = vshll.u32 %v2163_v37, 16  ;;  %v1473_v43 = vshll.u32 %v2164_v38, 16  ;;  %v2168_v57 = vld [vmem:[%s2547_s12 + $0x1c] sm:$0x1] }
  0x3c   : > { %v619_v25 = vrot.slane %v618_v18, 4  ;;  %v2064_v26 = vcombine.low %v596_v16, %v610_v24  ;;  %v632_v27 = vor.u32 %v631_v22, %v628_v13  ;;  %v1478_v45 = vshrl.u32 %v2165_v39, 16  ;;  %v2169_v60 = vld [vmem:[%s2547_s12 + $0x20] sm:$0xf]  ;;  %v2170_v62 = vld [vmem:[%s2547_s12 + $0x24] sm:$0x1] }
  0x3d   : > { %v1481_v47 = vshll.u32 %v2165_v39, 16  ;;  %v1487_v48 = vshll.u32 %v2166_v40, 16  ;;  %v1466_v50 = vrot.slane %v1464_v41, 4  ;;  %v1469_v51 = vrot.slane %v1467_v42, 5  ;;  %v2464_v8 = vld [vmem:[%s2547_s12 + $0x80] ss:$8 sps:$4 sm:$0xff]  }
  0x3e   : > { %2284 = vmatprep.mubr.msk.bf16.mxu1 %vm326_vm1, %v2064_v26  ;;  %v624_v29 = vsel %vm2588_vm4, %v619_v25, %v623_v21  ;;  %v633_v30 = vrot.slane %v632_v27, 4  ;;  %v1475_v52 = vrot.slane %v1473_v43, 5  ;;  %v1480_v53 = vrot.slane %v1478_v45, 4  ;;  %v2171_v16 = vld [vmem:[%s2547_s12 + $0x28] sm:$0xf] }
  0x3f   : > { %2325 = vmatmul.mubr.msk.bf16.gmra.mrb[4].mxu0 %vm326_vm1, %v2456_v20  ;;  %v1483_v55 = vrot.slane %v1481_v47, 5  ;;  %v1489_v56 = vrot.slane %v1487_v48, 5  ;;  %v1470_v61 = vor.u32 %v1469_v51, %v1466_v50  ;;  %v1492_v63 = vshrl.u32 %v2167_v9, 16  ;;  %v2172_v17 = vld [vmem:[%s2547_s12 + $0x2c] sm:$0x1] }
  0x40   : > { %v638_v33 = vsel %vm2588_vm4, %v633_v30, %v637_v28  ;;  %2330 = vmatprep.mubr.msk.bf16.mxu0 %vm326_vm1, %v2458_v23  ;;  %v1495_v0 = vshll.u32 %v2167_v9, 16  ;;  %v1501_v1 = vshll.u32 %v2168_v57, 16  ;;  %v1506_v59 = vshrl.u32 %v2169_v60, 16  ;;  %v2173_v18 = vld [vmem:[%s2547_s12 + $0x30] sm:$0xf] }
  0x41   : > { %v2065_v35 = vcombine.low %v624_v29, %v638_v33  ;;  %v1484_v2 = vor.u32 %v1483_v55, %v1480_v53  ;;  %v1509_v3 = vshll.u32 %v2169_v60, 16  ;;  %v1515_v4 = vshll.u32 %v2170_v62, 16  ;;  %v2174_v21 = vld [vmem:[%s2547_s12 + $0x34] sm:$0x1]  ;;  %v2463_v24 = vld [vmem:[%s2547_s12 + $0xc0] ss:$8 sps:$4 sm:$0xff]  }
  0x42   : > { %v1471_v58 = vrot.slane %v1470_v61, 4  ;;  %v1494_v5 = vrot.slane %v1492_v63, 4  ;;  %v1497_v6 = vrot.slane %v1495_v0, 5  ;;  %v1503_v7 = vrot.slane %v1501_v1, 5  ;;  %v2465_v29 = vld [vmem:[%s2547_s12 + $0xd8] ss:$8 sps:$4 sm:$0xff]  }
  0x43   : > { %2285 = vmatmul.mubr.msk.bf16.gmra.mrb[4].mxu1 %vm326_vm1, %v2065_v35  ;;  %v1485_v10 = vrot.slane %v1484_v2, 4  ;;  %v1508_v11 = vrot.slane %v1506_v59, 4  ;;  %v1511_v12 = vrot.slane %v1509_v3, 5  ;;  %v1517_v13 = vrot.slane %v1515_v4, 5  ;;  %v2175_v38 = vld [vmem:[%s2547_s12 + $0x38] sm:$0xf] }
  0x44   : > { %2290 = vmatprep.mubr.msk.bf16.mxu1 %vm326_vm1, %v2457_v34  ;;  %v1476_v14 = vsel %vm2588_vm4, %v1471_v58, %v1475_v52  ;;  %v1498_v15 = vor.u32 %v1497_v6, %v1494_v5  ;;  %v1520_v22 = vshrl.u32 %v2171_v16, 16  ;;  %v1523_v23 = vshll.u32 %v2171_v16, 16  ;;  %v2176_v42 = vld [vmem:[%s2547_s12 + $0x3c] sm:$0x1]  ;;  %v2177_v43 = vld [vmem:[%s2547_s12 + $0x40] sm:$0xf] }
  0x45   : > { %v1490_v19 = vsel %vm2588_vm4, %v1485_v10, %v1489_v56  ;;  %v1512_v20 = vor.u32 %v1511_v12, %v1508_v11  ;;  %v1529_v27 = vshll.u32 %v2172_v17, 16  ;;  %v1534_v28 = vshrl.u32 %v2173_v18, 16  ;;  %v2178_v47 = vld [vmem:[%s2547_s12 + $0x44] sm:$0x1]  ;;  %v2466_v2 = vld [vmem:[%s2547_s12 + $0xe8] ss:$8 sps:$4 sm:$0xff]  }
  0x46   : > { %v2180_v25 = vcombine.low %v1476_v14, %v1490_v19  ;;  %v1499_v26 = vrot.slane %v1498_v15, 4  ;;  %v1537_v33 = vshll.u32 %v2173_v18, 16  ;;  %v1543_v37 = vshll.u32 %v2174_v21, 16  ;;  %v2467_v5 = vld [vmem:[%s2547_s12 + $0xf8] ss:$8 sps:$4 sm:$0xff]  }
  0x47   : > { %2331 = vmatmul.mubr.msk.bf16.vlgmr.msra.gmra.mrb[0].mxu0 %vm326_vm1, %v2460_v36  ;;  %v1513_v30 = vrot.slane %v1512_v20, 4  ;;  %v1531_v35 = vrot.slane %v1529_v27, 5  ;;  %v1536_v36 = vrot.slane %v1534_v28, 4  ;;  %v1548_v45 = vshrl.u32 %v2175_v38, 16  ;;  %v2468_v11 = vld [vmem:[%s2547_s12 + $0x108] ss:$8 sps:$4 sm:$0xff]  }
  0x48   : > { %2339 = vmatpush3.bf16.msra.mxu0 %v1602_v31  ;;  %2334 = vmatprep.mubr.msk.bf16.mxu0 %vm326_vm1, %v2462_v46  ;;  %v1522_v31 = vrot.slane %v1520_v22, 4  ;;  %v1504_v34 = vsel %vm2588_vm4, %v1499_v26, %v1503_v7  ;;  %v1539_v41 = vrot.slane %v1537_v33, 5  ;;  %v1545_v46 = vrot.slane %v1543_v37, 5 }
  0x49   : > { %v1518_v39 = vsel %vm2588_vm4, %v1513_v30, %v1517_v13  ;;  %v1551_v48 = vshll.u32 %v2175_v38, 16  ;;  %v1550_v52 = vrot.slane %v1548_v45, 4  ;;  %v1562_v53 = vshrl.u32 %v2177_v43, 16 }
  0x4a   : > { %v1540_v51 = vor.u32 %v1539_v41, %v1536_v36  ;;  %v2181_v9 = vcombine.low %v1504_v34, %v1518_v39  ;;  %v1565_v55 = vshll.u32 %v2177_v43, 16  ;;  %v1571_v56 = vshll.u32 %v2178_v47, 16 }
  0x4b   : > { %2291 = vmatmul.mubr.msk.bf16.vlgmr.msra.gmra.mrb[0].mxu1 %vm326_vm1, %v2459_v49  ;;  %v1557_v49 = vshll.u32 %v2176_v42, 16  ;;  %v1564_v61 = vrot.slane %v1562_v53, 4 }
  0x4c   : > { %2349 = vmatpush3.bf16.msra.mxu1 %v1763_v32  ;;  %2294 = vmatprep.mubr.msk.bf16.mxu1 %vm326_vm1, %v2461_v54  ;;  %v1525_v32 = vrot.slane %v1523_v23, 5  ;;  %v1553_v54 = vrot.slane %v1551_v48, 5  ;;  %v1541_v60 = vrot.slane %v1540_v51, 4  ;;  %v1567_v0 = vrot.slane %v1565_v55, 5 }
  0x4d   : > { %v1559_v63 = vrot.slane %v1557_v49, 5  ;;  %v1573_v58 = vrot.slane %v1571_v56, 5 }
  0x4e   : > { %v1526_v40 = vor.u32 %v1525_v32, %v1522_v31  ;;  %v1554_v62 = vor.u32 %v1553_v54, %v1550_v52  ;;  %v1546_v1 = vsel %vm2588_vm4, %v1541_v60, %v1545_v46  ;;  %v1568_v4 = vor.u32 %v1567_v0, %v1564_v61 }
  0x4f   : > { %2335 = vmatmul.mubr.msk.bf16.gmra.mrb[4].mxu0 %vm326_vm1, %v2464_v8 }
  0x50   : > { %2340 = vmatprep.mubr.msk.bf16.mxu0 %vm326_vm1, %v2180_v25  ;;  %v1527_v50 = vrot.slane %v1526_v40, 4  ;;  %v1555_v3 = vrot.slane %v1554_v62, 4  ;;  %v1569_v7 = vrot.slane %v1568_v4, 4 }
  0x52   : > { %v1532_v57 = vsel %vm2588_vm4, %v1527_v50, %v1531_v35  ;;  %v1560_v6 = vsel %vm2588_vm4, %v1555_v3, %v1559_v63  ;;  %v1574_v8 = vsel %vm2588_vm4, %v1569_v7, %v1573_v58 }
  0x53   : > { %2295 = vmatmul.mubr.msk.bf16.gmra.mrb[4].mxu1 %vm326_vm1, %v2463_v24  ;;  %v2182_v59 = vcombine.low %v1532_v57, %v1546_v1  ;;  %v2183_v10 = vcombine.low %v1560_v6, %v1574_v8 }
  0x54   : > { %2350 = vmatprep.mubr.msk.bf16.mxu1 %vm326_vm1, %v2465_v29 }
  0x57   : > { %2341 = vmatmul.mubr.msk.bf16.vlgmr.msra.gmra.mrb[0].mxu0 %vm326_vm1, %v2181_v9 }
  0x58   : > { %2344 = vmatprep.mubr.msk.bf16.mxu0 %vm326_vm1, %v2182_v59 }
  0x5b   : > { %2351 = vmatmul.mubr.msk.bf16.vlgmr.msra.gmra.mrb[8].mxu1 %vm326_vm1, %v2466_v2 }
  0x5c   : > { %2354 = vmatprep.mubr.msk.bf16.mxu1 %vm326_vm1, %v2467_v5 }
  0x5f   : > { %2345 = vmatmul.mubr.msk.bf16.gmra.mrb[4].mxu0 %vm326_vm1, %v2183_v10 }
  0x63   : > { %2355 = vmatmul.mubr.msk.bf16.gmra.mrb[12].mxu1 %vm326_vm1, %v2468_v11 }
 0x11e   : > { %v2292_v12 = vpop.f32.mrb[0].mxu1 }
 0x11f   : > { %v821_v13 = vpop.f32.mrb[1].mxu1 }
 0x120   : > { %v2293_v14 = vpop.f32.mrb[2].mxu1 }
 0x121   : > { %v824_v15 = vpop.f32.mrb[3].mxu1 }
 0x126   : > { %v2296_v16 = vpop.f32.mrb[4].mxu1 }
 0x127   : > { %v837_v17 = vpop.f32.mrb[5].mxu1 }
 0x128   : > { %v2297_v18 = vpop.f32.mrb[6].mxu1 }
 0x129   : > { %v840_v19 = vpop.f32.mrb[7].mxu1 }
 0x12a   : > { %v2342_v44 = vpop.f32.mrb[0].mxu0 }
 0x12b   : > { %v2358_v20 = vadd.f32 %v2342_v44, %v2292_v12  ;;  %v1638_v21 = vpop.f32.mrb[1].mxu0 }
 0x12c   : > { %v2359_v22 = vadd.f32 %v1638_v21, %v821_v13  ;;  %v2343_v23 = vpop.f32.mrb[2].mxu0 }
 0x12d   : > { %1679 = vst [vmem:[%s2766_s28 + $0x10] sm:$0xff] %v2358_v20  ;;  %v2360_v24 = vadd.f32 %v2343_v23, %v2293_v14  ;;  %v1641_v25 = vpop.f32.mrb[3].mxu0  ;;  %v1701_v34 = vmul.f32 %v2358_v20, %v2358_v20 }
 0x12e   : > { %v2352_v26 = vpop.f32.mrb[8].mxu1  ;;  %1677 = vst [vmem:[%s2766_s28] sm:$0xff] %v2359_v22  ;;  %v2361_v27 = vadd.f32 %v1641_v25, %v824_v15  ;;  %v1699_v29 = vmul.f32 %v2359_v22, %v2359_v22 }
 0x12f   : > { %1832 = vst [vmem:[%s2771_s7 + $0x10] sm:$0xff] %v2352_v26  ;;  %v1799_v28 = vpop.f32.mrb[9].mxu1  ;;  %1680 = vst [vmem:[%s2766_s28 + $0x18] sm:$0xff] %v2360_v24  ;;  %v1854_v41 = vmul.f32 %v2352_v26, %v2352_v26  ;;  %v1702_v42 = vmul.f32 %v2360_v24, %v2360_v24 }
 0x130   : > { %1830 = vst [vmem:[%s2771_s7] sm:$0xff] %v1799_v28  ;;  %v1852_v30 = vmul.f32 %v1799_v28, %v1799_v28  ;;  %v2353_v31 = vpop.f32.mrb[10].mxu1  ;;  %1678 = vst [vmem:[%s2766_s28 + $0x8] sm:$0xff] %v2361_v27  ;;  %v1685_v32 = vadd.f32 %v2361_v27, %v2359_v22  ;;  %v1700_v33 = vmul.f32 %v2361_v27, %v2361_v27 }
 0x131   : > { %1833 = vst [vmem:[%s2771_s7 + $0x18] sm:$0xff] %v2353_v31  ;;  %v1802_v35 = vpop.f32.mrb[11].mxu1  ;;  %v1855_v51 = vmul.f32 %v2353_v31, %v2353_v31 }
 0x132   : > { %v1686_v36 = vadd.f32 %v2358_v20, %v1685_v32  ;;  %v1707_v37 = vadd.f32 %v1700_v33, %v1699_v29  ;;  %1831 = vst [vmem:[%s2771_s7 + $0x8] sm:$0xff] %v1802_v35  ;;  %v1838_v38 = vadd.f32 %v1802_v35, %v1799_v28  ;;  %v1853_v39 = vmul.f32 %v1802_v35, %v1802_v35  ;;  %v2346_v40 = vpop.f32.mrb[4].mxu0 }
 0x133   : > { %v2362_v43 = vadd.f32 %v2346_v40, %v2296_v16  ;;  %v1654_v45 = vpop.f32.mrb[5].mxu0 }
 0x134   : > { %v1708_v46 = vadd.f32 %v1707_v37, %v1701_v34  ;;  %v1839_v47 = vadd.f32 %v2352_v26, %v1838_v38  ;;  %v1860_v48 = vadd.f32 %v1853_v39, %v1852_v30  ;;  %v2363_v49 = vadd.f32 %v1654_v45, %v837_v17  ;;  %v2347_v50 = vpop.f32.mrb[6].mxu0 }
 0x135   : > { %1683 = vst [vmem:[%s2766_s28 + $0x30] sm:$0xff] %v2362_v43  ;;  %v1687_v52 = vadd.f32 %v2360_v24, %v1686_v36  ;;  %v2364_v53 = vadd.f32 %v2347_v50, %v2297_v18  ;;  %v1657_v9 = vpop.f32.mrb[7].mxu0  ;;  %v1705_v10 = vmul.f32 %v2362_v43, %v2362_v43 }
 0x136   : > { %v1861_v54 = vadd.f32 %v1860_v48, %v1854_v41  ;;  %v2356_v55 = vpop.f32.mrb[12].mxu1  ;;  %1681 = vst [vmem:[%s2766_s28 + $0x20] sm:$0xff] %v2363_v49  ;;  %v1703_v56 = vmul.f32 %v2363_v49, %v2363_v49  ;;  %v1709_v57 = vadd.f32 %v1708_v46, %v1702_v42  ;;  %v1840_v60 = vadd.f32 %v2353_v31, %v1839_v47 }
 0x137   : > { %1836 = vst [vmem:[%s2771_s7 + $0x30] sm:$0xff] %v2356_v55  ;;  %v1688_v61 = vadd.f32 %v2363_v49, %v1687_v52  ;;  %v1815_v62 = vpop.f32.mrb[13].mxu1  ;;  %1684 = vst [vmem:[%s2766_s28 + $0x38] sm:$0xff] %v2364_v53  ;;  %v2365_v63 = vadd.f32 %v1657_v9, %v840_v19  ;;  %v1858_v13 = vmul.f32 %v2356_v55, %v2356_v55 }
 0x138   : > { %v1710_v0 = vadd.f32 %v1709_v57, %v1703_v56  ;;  %1834 = vst [vmem:[%s2771_s7 + $0x20] sm:$0xff] %v1815_v62  ;;  %v1841_v1 = vadd.f32 %v1840_v60, %v1815_v62  ;;  %v1856_v2 = vmul.f32 %v1815_v62, %v1815_v62  ;;  %v1862_v59 = vadd.f32 %v1861_v54, %v1855_v51  ;;  %v2357_v3 = vpop.f32.mrb[14].mxu1 }
 0x139   : > { %1837 = vst [vmem:[%s2771_s7 + $0x38] sm:$0xff] %v2357_v3  ;;  %1682 = vst [vmem:[%s2766_s28 + $0x28] sm:$0xff] %v2365_v63  ;;  %v1689_v4 = vadd.f32 %v2365_v63, %v1688_v61  ;;  %v1704_v58 = vmul.f32 %v2365_v63, %v2365_v63  ;;  %v1818_v5 = vpop.f32.mrb[15].mxu1  ;;  %v1706_v16 = vmul.f32 %v2364_v53, %v2364_v53 }
 0x13a   : > { %v1863_v6 = vadd.f32 %v1862_v59, %v1856_v2  ;;  %1835 = vst [vmem:[%s2771_s7 + $0x28] sm:$0xff] %v1818_v5  ;;  %v1842_v7 = vadd.f32 %v1841_v1, %v1818_v5  ;;  %v1857_v8 = vmul.f32 %v1818_v5, %v1818_v5  ;;  %v1859_v19 = vmul.f32 %v2357_v3, %v2357_v3 }
 0x13b   : > { %v1690_v11 = vadd.f32 %v2362_v43, %v1689_v4  ;;  %v1711_v12 = vadd.f32 %v1710_v0, %v1704_v58 }
 0x13c   : > { %v1843_v14 = vadd.f32 %v2356_v55, %v1842_v7  ;;  %v1864_v15 = vadd.f32 %v1863_v6, %v1857_v8 }
 0x13d   : > { %v1691_v17 = vadd.f32 %v2364_v53, %v1690_v11  ;;  %v1712_v18 = vadd.f32 %v1711_v12, %v1705_v10 }
 0x13e   : > { %v1844_v44 = vadd.f32 %v2357_v3, %v1843_v14  ;;  %v1865_v20 = vadd.f32 %v1864_v15, %v1858_v13 }
 0x13f   : > { %v1692_v21 = vrot.slane %v1691_v17, 4  ;;  %v1713_v22 = vadd.f32 %v1712_v18, %v1706_v16 }
 0x140   : > { %v1845_v23 = vrot.slane %v1844_v44, 4  ;;  %v1866_v24 = vadd.f32 %v1865_v20, %v1859_v19 }
 0x141   : > { %v1693_v25 = vadd.f32 %v1692_v21, %v1691_v17  ;;  %v1714_v26 = vrot.slane %v1713_v22, 4 }
 0x142   : > { %v1846_v27 = vadd.f32 %v1845_v23, %v1844_v44  ;;  %v1867_v28 = vrot.slane %v1866_v24, 4 }
 0x143   : > { %v1694_v29 = vrot.slane %v1693_v25, 2  ;;  %v1715_v30 = vadd.f32 %v1714_v26, %v1713_v22 }
 0x144   : > { %v1847_v31 = vrot.slane %v1846_v27, 2  ;;  %v1868_v32 = vadd.f32 %v1867_v28, %v1866_v24 }
 0x145   : > { %v1695_v33 = vadd.f32 %v1694_v29, %v1693_v25  ;;  %v1716_v34 = vrot.slane %v1715_v30, 2 }
 0x146   : > { %v1848_v35 = vadd.f32 %v1847_v31, %v1846_v27  ;;  %v1869_v36 = vrot.slane %v1868_v32, 2 }
 0x147   : > { %v1696_v37 = vrot.slane %v1695_v33, 1  ;;  %v1717_v38 = vadd.f32 %v1716_v34, %v1715_v30 }
 0x148   : > { %v1849_v39 = vrot.slane %v1848_v35, 1  ;;  %v1870_v40 = vadd.f32 %v1869_v36, %v1868_v32 }
 0x149   : > { %v1697_v41 = vadd.f32 %v1696_v37, %v1695_v33  ;;  %v1718_v42 = vrot.slane %v1717_v38, 1 }
 0x14a   : > { %v1850_v43 = vadd.f32 %v1849_v39, %v1848_v35  ;;  %v1871_v45 = vrot.slane %v1870_v40, 1 }
 0x14b   : > { %v1719_v46 = vadd.f32 %v1718_v42, %v1717_v38  ;;  %1698 = vst [vmem:[%s275_s11] sm:$0x1] %v1697_v41 }
 0x14c   : > { %1851 = vst [vmem:[%s284_s14] sm:$0x1] %v1850_v43  ;;  %v1872_v47 = vadd.f32 %v1871_v45, %v1870_v40 }
 0x14d   : > { %1720 = vst [vmem:[%s275_s11 + $0x1] sm:$0x1] %v1719_v46 }
 0x14e   : > { %1873 = vst [vmem:[%s284_s14 + $0x1] sm:$0x1] %v1872_v47 }
 0x14f PF: > { %s17_s21 = sadd.s32 1, %s2475_s21  }
 0x150   : > { %p14_p4 = scmp.ge.s32.totalorder %s17_s21, 4  }
 0x152   :  { %16 = sbr.rel (!%p14_p4) target bundleno = 1 (0x1), region = 111 }

// kernel: basicblock_forward.4
= control target key start
LH: loop header
LB: loop body
LE: loop exit
PB: predicated region body
PF: predicated region fallthrough
CT: control target
= control target key end

     0   :  { %s3360_s15 = smov 0   ;;  %s4016_s0 = inlined_call_operand.vmem [shape: f32[2,64,128], index: 0, kind: input, shape index: {}]   ;;  %s4017_s1 = inlined_call_operand.vmem [shape: f32[2,128], index: 1, kind: input, shape index: {}]   ;;  %s4018_s2 = inlined_call_operand.vmem [shape: bf16[9,128,128], index: 2, kind: input, shape index: {}]   ;;  %s4019_s3 = inlined_call_operand.vmem [shape: f32[2,64,128], index: 3, kind: output, shape index: {0}]   ;;  %s4020_s4 = inlined_call_operand.vmem [shape: f32[2,2,128], index: 4, kind: output, shape index: {1}]  }
   0x1 LB: > { %s2537_s16 = sadd.s32 4294967295, %s3332_s15   ;;  %p2541_p0 = scmp.ge.s32.totalorder %s3332_s15, 1  ;;  %s3332_s15 = sphi %s3360_s15, %s15_s15  }
   0x2   : > { %p165_p1 = scmp.lt.s32.totalorder %s3332_s15, 3 }
   0x4   : > { %p166_p2 = pnand %p2541_p0, %p165_p1 }
   0x5   : > { %v3242_v0 = vld [vmem:[%s4018_s2 + $0x40] sm:$0xff] (!%p166_p2)   ;;  %v3244_v2 = vld [vmem:[%s4018_s2 + $0x48] sm:$0xff] (!%p166_p2)   ;;  %p3379_p3 = scmp.lt.s32.totalorder (!%p166_p2), %s2537_s16, 1  ;;  %v3334_v3 = vmov (!%p166_p2), 0   ;;  %v3246_v5 = vld [vmem:[%s4018_s2 + $0x50] sm:$0xff] (!%p166_p2)   ;;  %vm385_vm0 = vcmask (!%p166_p2), 1043456  }
   0x6   : > { %169 = sbr.rel (%p166_p2) target bundleno = 450 (0x1c2), region = 32  ;;  %v3243_v1 = vld [vmem:[%s4018_s2 + $0x100] sm:$0xff] (!%p166_p2)   ;;  %2937 = vmatprep.subr.bf16.mxu1 (!%p166_p2), %v3242_v0  ;;  %252 = vst [vmem:[#allocation2] sm:$0xf] (!%p166_p2), %v3334_v3  ;;  %253 = vst [vmem:[#allocation2 + $0x4] sm:$0x1] (!%p166_p2), %v3334_v3 }
   0x7   : > { %254 = vst [vmem:[#allocation2 + $0x8] sm:$0xf] (!%p166_p2), %v3334_v3  ;;  %255 = vst [vmem:[#allocation2 + $0xc] sm:$0x1] (!%p166_p2), %v3334_v3  ;;  %3033 = vmatprep.subr.bf16.mxu0 (!%p166_p2), %v3243_v1  ;;  %2938 = vmatpush3.bf16.msra.mxu1 (!%p166_p2), %v3242_v0  ;;  %v3245_v4 = vld [vmem:[%s4018_s2 + $0x108] sm:$0xff] (!%p166_p2)   ;;  %v3247_v6 = vld [vmem:[%s4018_s2 + $0x110] sm:$0xff] (!%p166_p2)  }
   0x8   : > { %256 = vst [vmem:[#allocation2 + $0x10] sm:$0xf] (!%p166_p2), %v3334_v3  ;;  %257 = vst [vmem:[#allocation2 + $0x14] sm:$0x1] (!%p166_p2), %v3334_v3  ;;  %3034 = vmatpush3.bf16.msra.mxu0 (!%p166_p2), %v3243_v1  ;;  %2939 = vmatprep.subr.bf16.mxu1 (!%p166_p2), %v3244_v2  ;;  %v3248_v7 = vld [vmem:[%s4018_s2 + $0x58] sm:$0xff] (!%p166_p2)   ;;  %v3250_v9 = vld [vmem:[%s4018_s2 + $0x60] sm:$0xff] (!%p166_p2)  }
   0x9   : > { %258 = vst [vmem:[#allocation2 + $0x18] sm:$0xf] (!%p166_p2), %v3334_v3  ;;  %259 = vst [vmem:[#allocation2 + $0x1c] sm:$0x1] (!%p166_p2), %v3334_v3  ;;  %3035 = vmatprep.subr.bf16.mxu0 (!%p166_p2), %v3245_v4  ;;  %v3249_v8 = vld [vmem:[%s4018_s2 + $0x118] sm:$0xff] (!%p166_p2)   ;;  %v3251_v10 = vld [vmem:[%s4018_s2 + $0x120] sm:$0xff] (!%p166_p2)  }
   0xa   : > { %260 = vst [vmem:[#allocation2 + $0x20] sm:$0xf] (!%p166_p2), %v3334_v3  ;;  %261 = vst [vmem:[#allocation2 + $0x24] sm:$0x1] (!%p166_p2), %v3334_v3  ;;  %v3252_v11 = vld [vmem:[%s4018_s2 + $0x68] sm:$0xff] (!%p166_p2)   ;;  %v3254_v18 = vld [vmem:[%s4018_s2 + $0x70] sm:$0xff] (!%p166_p2)  }
   0xb   : > { %262 = vst [vmem:[#allocation2 + $0x28] sm:$0xf] (!%p166_p2), %v3334_v3  ;;  %263 = vst [vmem:[#allocation2 + $0x2c] sm:$0x1] (!%p166_p2), %v3334_v3  ;;  %2940 = vmatpush3.bf16.msra.mxu1 (!%p166_p2), %v3244_v2  ;;  %v3424_v12 = vld [vmem:[%s4017_s1] ss:$0 sm:$0xff] (!%p166_p2) }
   0xc   : > { %264 = vst [vmem:[#allocation2 + $0x30] sm:$0xf] (!%p166_p2), %v3334_v3  ;;  %265 = vst [vmem:[#allocation2 + $0x34] sm:$0x1] (!%p166_p2), %v3334_v3  ;;  %3036 = vmatpush3.bf16.msra.mxu0 (!%p166_p2), %v3245_v4  ;;  %2941 = vmatprep.subr.bf16.mxu1 (!%p166_p2), %v3246_v5  ;;  %v3429_v13 = vld [vmem:[%s4017_s1 + $0x1] ss:$0 sm:$0xff] (!%p166_p2) }
   0xd   : > { %266 = vst [vmem:[#allocation2 + $0x38] sm:$0xf] %v3334_v3  ;;  %267 = vst [vmem:[#allocation2 + $0x3c] sm:$0x1] %v3334_v3  ;;  %s4031_s16 = smov (!%p3379_p3, %s2537_s16), 1  ;;  %3037 = vmatprep.subr.bf16.mxu0 %v3247_v6  ;;  %v3253_v15 = vld [vmem:[%s4018_s2 + $0x128] sm:$0xff]  }
   0xe   : > { %268 = vst [vmem:[#allocation2 + $0x40] sm:$0xf] %v3334_v3  ;;  %269 = vst [vmem:[#allocation2 + $0x44] sm:$0x1] %v3334_v3  ;;  %s2819_s8 = sshll.u32 %s4031_s16, 6  ;;  %v3255_v19 = vld [vmem:[%s4018_s2 + $0x130] sm:$0xff]  }
   0xf   : > { %270 = vst [vmem:[#allocation2 + $0x48] sm:$0xf] %v3334_v3  ;;  %271 = vst [vmem:[#allocation2 + $0x4c] sm:$0x1] %v3334_v3  ;;  %2942 = vmatpush3.bf16.msra.mxu1 %v3246_v5  ;;  %s3416_s17 = scalar_lea.vmem %s4016_s0, %s2819_s8  ;;  %vm386_vm1 = vsmask.f32 7938  ;;  %s204_s7 = scalar_lea.vmem %s4019_s3, %s2819_s8 }
  0x10   : > { %3038 = vmatpush3.bf16.msra.mxu0 %v3247_v6  ;;  %2943 = vmatprep.subr.bf16.mxu1 %v3248_v7  ;;  %v212_v14 = vld [vmem:[%s3416_s17] sm:$0xff]  ;;  %v213_v21 = vld [vmem:[%s3416_s17 + $0x8] sm:$0xff]  ;;  %v214_v23 = vld [vmem:[%s3416_s17 + $0x10] sm:$0xff]  ;;  %vm391_vm2 = vcmask 1040384   ;;  %vm392_vm3 = vsmask.f32 256 }
  0x11   : > { %3039 = vmatprep.subr.bf16.mxu0 %v3249_v8  ;;  %v224_v16 = vmul.f32 %v3424_v12, %v212_v14  ;;  %v225_v22 = vmul.f32 %v3424_v12, %v213_v21  ;;  %v3446_v25 = vld [vmem:[#allocation2] sm:$0xf]  ;;  %v226_v26 = vmul.f32 %v3424_v12, %v214_v23  ;;  %v3256_v27 = vld [vmem:[%s4018_s2 + $0x78] sm:$0xff]   ;;  %vm3460_vm4 = vmand %vm385_vm0, %vm386_vm1  ;;  %vm471_vm6 = vsmask.f32 3328  ;;  %s2546_s8 = sshll.u32 %s4031_s16, 1 }
  0x12   : > { %v215_v29 = vld [vmem:[%s3416_s17 + $0x18] sm:$0xff]  ;;  %v388_v35 = vld [vmem:[#allocation2 + $0x8] sm:$0xf]  ;;  %v394_v36 = vld [vmem:[#allocation2 + $0xc] sm:$0x1]  ;;  %v475_v37 = vshrl.u32 %v3446_v25, 16  ;;  %s208_s11 = scalar_lea.vmem %s4020_s4, %s2546_s8 }
  0x13   : > { %2944 = vmatpush3.bf16.msra.mxu1 %v3248_v7  ;;  %v236_v17 = vadd.f32 %v3429_v13, %v224_v16  ;;  %v237_v28 = vadd.f32 %v3429_v13, %v225_v22  ;;  %v3257_v30 = vld [vmem:[%s4018_s2 + $0x138] sm:$0xff]   ;;  %v238_v33 = vadd.f32 %v3429_v13, %v226_v26  ;;  %v227_v39 = vmul.f32 %v3424_v12, %v215_v29  ;;  %vm3468_vm5 = vmand %vm391_vm2, %vm392_vm3  ;;  %v3472_v43 = vld [vmem:[#allocation2 + $0x4] sm:$0x1] }
  0x14   : > { %3040 = vmatpush3.bf16.msra.mxu0 %v3249_v8  ;;  %2945 = vmatprep.subr.bf16.mxu1 %v3250_v9  ;;  %v478_v44 = vshll.u32 %v3446_v25, 16  ;;  %v3478_v45 = vld [vmem:[%s4018_s2] sm:$0xff]   ;;  %v477_v52 = vrot.slane %v475_v37, 4  ;;  %v397_v58 = vld [vmem:[#allocation2 + $0x10] sm:$0xf]  ;;  %v484_v3 = vshll.u32 %v3472_v43, 16 }
  0x15   : > { %3041 = vmatprep.subr.bf16.mxu0 %v3251_v10  ;;  %v244_v20 = vmax.f32 %v236_v17, 0.0  ;;  %v245_v38 = vmax.f32 %v237_v28, 0.0  ;;  %v246_v42 = vmax.f32 %v238_v33, 0.0  ;;  %v239_v47 = vadd.f32 %v3429_v13, %v227_v39  ;;  %v3484_v50 = vld [vmem:[%s4018_s2 + $0x140] sm:$0xff]   ;;  %v400_v59 = vld [vmem:[#allocation2 + $0x14] sm:$0x1] }
  0x16   : > { %vm472_vm7 = vsmask.f32 7440  ;;  %v480_v62 = vrot.slane %v478_v44, 5  ;;  %v403_v0 = vld [vmem:[#allocation2 + $0x18] sm:$0xf]  ;;  %v3497_v17 = vrot.slane %v484_v3, 5 }
  0x17   : > { %2946 = vmatpush3.bf16.msra.mxu1 %v3250_v9  ;;  %v2821_v24 = vpack.c.bf16 %v244_v20, %v244_v20  ;;  %v2822_v46 = vpack.c.bf16 %v245_v38, %v245_v38  ;;  %v2823_v51 = vpack.c.bf16 %v246_v42, %v246_v42  ;;  %v247_v55 = vmax.f32 %v239_v47, 0.0  ;;  %v406_v1 = vld [vmem:[#allocation2 + $0x1c] sm:$0x1]  ;;  %v409_v21 = vld [vmem:[#allocation2 + $0x20] sm:$0xf]  ;;  %vm3521_vm8 = vmor %vm471_vm6, %vm472_vm7 }
  0x18   : > { %3042 = vmatpush3.bf16.msra.mxu0 %v3251_v10  ;;  %2947 = vmatprep.subr.bf16.mxu1 %v3252_v11  ;;  %v216_v26 = vld [vmem:[%s3416_s17 + $0x20] sm:$0xff]  ;;  %vm893_vm9 = vcmask 1042432   ;;  %vm894_vm10 = vcmask 1046532  }
  0x19   : > { %3043 = vmatprep.subr.bf16.mxu0 %v3253_v15  ;;  %v305_v31 = vshrl.u32 %v2821_v24, 16  ;;  %v308_v32 = vshll.u32 %v2821_v24, 16  ;;  %v313_v53 = vshrl.u32 %v2822_v46, 16  ;;  %v316_v54 = vshll.u32 %v2822_v46, 16  ;;  %v412_v24 = vld [vmem:[#allocation2 + $0x24] sm:$0x1]  ;;  %vm3719_vm11 = vmor %vm893_vm9, %vm894_vm10 }
  0x1a   : > { %v321_v60 = vshrl.u32 %v2823_v51, 16  ;;  %v324_v61 = vshll.u32 %v2823_v51, 16  ;;  %v2824_v2 = vpack.c.bf16 %v247_v55, %v247_v55  ;;  %v228_v39 = vmul.f32 %v3424_v12, %v216_v26  ;;  %v3322_v47 = vld [vmem:[%s4018_s2 + $0x220] sm:$0xff]  }
  0x1b   : > { %2948 = vmatpush3.bf16.msra.mxu1 %v3252_v11  ;;  %v307_v40 = vrot.slane %v305_v31, 7  ;;  %v315_v63 = vrot.slane %v313_v53, 7  ;;  %v481_v11 = vor.u32 %v480_v62, %v477_v52 }
  0x1c   : > { %3044 = vmatpush3.bf16.msra.mxu0 %v3253_v15  ;;  %2949 = vmatprep.subr.bf16.mxu1 %v3254_v18  ;;  %v323_v4 = vrot.slane %v321_v60, 7  ;;  %v329_v7 = vshrl.u32 %v2824_v2, 16  ;;  %v332_v8 = vshll.u32 %v2824_v2, 16 }
  0x1d   : > { %3045 = vmatprep.subr.bf16.mxu0 %v3255_v19  ;;  %v310_v48 = vor.u32 %v308_v32, %v307_v40  ;;  %v311_v49 = vrot.slane %v307_v40, 4  ;;  %v318_v5 = vor.u32 %v316_v54, %v315_v63  ;;  %v319_v6 = vrot.slane %v315_v63, 4 }
  0x1e   : > { %v326_v9 = vor.u32 %v324_v61, %v323_v4  ;;  %v327_v10 = vrot.slane %v323_v4, 4  ;;  %v331_v16 = vrot.slane %v329_v7, 7  ;;  %v3542_v4 = vadd.f32 %v3429_v13, %v228_v39 }
  0x1f   : > { %2950 = vmatpush3.bf16.msra.mxu1 %v3254_v18  ;;  %v389_v56 = vsel %vm3460_vm4, %v310_v48, %v388_v35  ;;  %v395_v57 = vsel %vm3468_vm5, %v311_v49, %v394_v36  ;;  %v398_v14 = vsel %vm3460_vm4, %v318_v5, %v397_v58  ;;  %v401_v15 = vsel %vm3468_vm5, %v319_v6, %v400_v59 }
  0x20   : > { %3046 = vmatpush3.bf16.msra.mxu0 %v3255_v19  ;;  %2951 = vmatprep.subr.bf16.mxu1 %v3256_v27  ;;  %390 = vst [vmem:[#allocation2 + $0x8] sm:$0xf] %v389_v56  ;;  %396 = vst [vmem:[#allocation2 + $0xc] sm:$0x1] %v395_v57  ;;  %v898_v18 = vrot.slane %v3472_v43, 5  ;;  %v404_v19 = vsel %vm3460_vm4, %v326_v9, %v403_v0  ;;  %v407_v20 = vsel %vm3468_vm5, %v327_v10, %v406_v1  ;;  %v217_v57 = vld [vmem:[%s3416_s17 + $0x28] sm:$0xff] }
  0x21   : > { %3047 = vmatprep.subr.bf16.mxu0 %v3257_v30  ;;  %399 = vst [vmem:[#allocation2 + $0x10] sm:$0xf] %v398_v14  ;;  %402 = vst [vmem:[#allocation2 + $0x14] sm:$0x1] %v401_v15  ;;  %v334_v22 = vor.u32 %v332_v8, %v331_v16  ;;  %v335_v23 = vrot.slane %v331_v16, 4  ;;  %v229_v9 = vmul.f32 %v3424_v12, %v217_v57  ;;  %v218_v10 = vld [vmem:[%s3416_s17 + $0x30] sm:$0xff] }
  0x22   : > { %405 = vst [vmem:[#allocation2 + $0x18] sm:$0xf] %v404_v19  ;;  %408 = vst [vmem:[#allocation2 + $0x1c] sm:$0x1] %v407_v20 }
  0x23   : > { %2952 = vmatpush3.bf16.msra.mxu1 %v3256_v27  ;;  %v410_v46 = vsel %vm3460_vm4, %v334_v22, %v409_v21  ;;  %v413_v52 = vsel %vm3468_vm5, %v335_v23, %v412_v24 }
  0x24   : > { %3048 = vmatpush3.bf16.msra.mxu0 %v3257_v30  ;;  %2961 = vmatprep.subr.bf16.mxu1 %v3478_v45  ;;  %v482_v30 = vrot.slane %v481_v11, 4  ;;  %411 = vst [vmem:[#allocation2 + $0x20] sm:$0xf] %v410_v46  ;;  %414 = vst [vmem:[#allocation2 + $0x24] sm:$0x1] %v413_v52 }
  0x25   : > { %3057 = vmatprep.subr.bf16.mxu0 %v3484_v50 }
  0x26   : > { %v487_v63 = vsel %vm3521_vm8, %v482_v30, %v3497_v17  ;;  %v230_v30 = vmul.f32 %v3424_v12, %v218_v10 }
  0x27   : > { %v3505_v27 = vld [vmem:[#allocation2 + $0x8] sm:$0xf]  ;;  %v3507_v28 = vld [vmem:[#allocation2 + $0xc] sm:$0x1] }
  0x28   : > { %v1252_v29 = vld [vmem:[#allocation2 + $0x8] sm:$0xf]  ;;  %v489_v31 = vshrl.u32 %v3505_v27, 16  ;;  %v492_v32 = vshll.u32 %v3505_v27, 16  ;;  %v498_v33 = vshll.u32 %v3507_v28, 16  ;;  %v902_v36 = vrot.slane %v3507_v28, 5 }
  0x29   : > { %v3512_v35 = vld [vmem:[#allocation2 + $0xc] sm:$0x1]  ;;  %v1269_v37 = vshrl.u32 %v1252_v29, 16  ;;  %v1272_v38 = vshll.u32 %v1252_v29, 16  ;;  %v1254_v55 = vld [vmem:[#allocation2 + $0x10] sm:$0xf] }
  0x2a   : > { %v491_v40 = vrot.slane %v489_v31, 4  ;;  %v494_v42 = vrot.slane %v492_v32, 5  ;;  %v1278_v44 = vshll.u32 %v3512_v35, 16  ;;  %v1560_v51 = vrot.slane %v3512_v35, 5  ;;  %v3528_v56 = vld [vmem:[#allocation2 + $0x14] sm:$0x1] }
  0x2b   : > { %v1271_v48 = vrot.slane %v1269_v37, 4  ;;  %v1274_v49 = vrot.slane %v1272_v38, 5  ;;  %v500_v54 = vrot.slane %v498_v33, 5  ;;  %v1283_v59 = vshrl.u32 %v1254_v55, 16  ;;  %v3532_v62 = vld [vmem:[#allocation2 + $0x10] sm:$0xf] }
  0x2c   : > { %v495_v53 = vor.u32 %v494_v42, %v491_v40  ;;  %v1286_v60 = vshll.u32 %v1254_v55, 16  ;;  %v1292_v61 = vshll.u32 %v3528_v56, 16  ;;  %v1280_v1 = vrot.slane %v1278_v44, 5  ;;  %v3537_v2 = vld [vmem:[#allocation2 + $0x18] sm:$0xf] }
  0x2d   : > { %v1275_v58 = vor.u32 %v1274_v49, %v1271_v48  ;;  %v3539_v3 = vld [vmem:[#allocation2 + $0x14] sm:$0x1]  ;;  %v1285_v6 = vrot.slane %v1283_v59, 4  ;;  %v3544_v8 = vld [vmem:[#allocation2 + $0x1c] sm:$0x1]  ;;  %v503_v14 = vshrl.u32 %v3532_v62, 16 }
  0x2e   : > { %v496_v0 = vrot.slane %v495_v53, 4  ;;  %v1288_v7 = vrot.slane %v1286_v60, 5  ;;  %v506_v15 = vshll.u32 %v3532_v62, 16  ;;  %v512_v16 = vshll.u32 %v3539_v3, 16  ;;  %v1256_v17 = vld [vmem:[#allocation2 + $0x18] sm:$0xf] }
  0x2f   : > { %v1276_v5 = vrot.slane %v1275_v58, 4  ;;  %v1294_v21 = vrot.slane %v1292_v61, 5  ;;  %v517_v22 = vshrl.u32 %v3537_v2, 16  ;;  %v505_v23 = vrot.slane %v503_v14, 4  ;;  %v3555_v29 = vld [vmem:[#allocation2 + $0x1c] sm:$0x1] }
  0x30   : > { %v501_v11 = vsel %vm3521_vm8, %v496_v0, %v500_v54  ;;  %v1289_v20 = vor.u32 %v1288_v7, %v1285_v6  ;;  %v508_v24 = vrot.slane %v506_v15, 5  ;;  %v520_v26 = vshll.u32 %v3537_v2, 16  ;;  %v1258_v42 = vld [vmem:[#allocation2 + $0x20] sm:$0xf]  ;;  %v3563_v49 = vld [vmem:[#allocation2 + $0x24] sm:$0x1] }
  0x31   : > { %v2573_v19 = vcombine.low %v487_v63, %v501_v11  ;;  %v1281_v31 = vsel %vm3521_vm8, %v1276_v5, %v1280_v1  ;;  %v519_v33 = vrot.slane %v517_v22, 4  ;;  %v526_v37 = vshll.u32 %v3544_v8, 16  ;;  %v3566_v63 = vld [vmem:[#allocation2 + $0x20] sm:$0xf] }
  0x32   : > { %v1290_v32 = vrot.slane %v1289_v20, 4  ;;  %v509_v38 = vor.u32 %v508_v24, %v505_v23  ;;  %v514_v39 = vrot.slane %v512_v16, 5  ;;  %v522_v40 = vrot.slane %v520_v26, 5 }
  0x33   : > { %2953 = vmatprep.mubr.bf16.mxu1 %v2573_v19  ;;  %v1297_v44 = vshrl.u32 %v1256_v17, 16  ;;  %v528_v48 = vrot.slane %v526_v37, 5  ;;  %v1300_v52 = vshll.u32 %v1256_v17, 16  ;;  %v1306_v53 = vshll.u32 %v3555_v29, 16 }
  0x34   : > { %v1295_v46 = vsel %vm3521_vm8, %v1290_v32, %v1294_v21  ;;  %v510_v55 = vrot.slane %v509_v38, 4  ;;  %v523_v57 = vor.u32 %v522_v40, %v519_v33  ;;  %v1311_v60 = vshrl.u32 %v1258_v42, 16  ;;  %v219_v33 = vld [vmem:[%s3416_s17 + $0x38] sm:$0xff] }
  0x35   : > { %v2677_v54 = vcombine.low %v1281_v31, %v1295_v46  ;;  %v1299_v58 = vrot.slane %v1297_v44, 4  ;;  %v1302_v59 = vrot.slane %v1300_v52, 5  ;;  %v1314_v61 = vshll.u32 %v1258_v42, 16  ;;  %v3262_v52 = vld [vmem:[%s4018_s2 + $0x10] sm:$0xff]  }
  0x36   : > { %v241_v0 = vadd.f32 %v3429_v13, %v229_v9  ;;  %v515_v1 = vsel %vm3521_vm8, %v510_v55, %v514_v39  ;;  %v524_v5 = vrot.slane %v523_v57, 4  ;;  %v1320_v6 = vshll.u32 %v3563_v49, 16  ;;  %v3260_v9 = vld [vmem:[%s4018_s2 + $0x8] sm:$0xff]  }
  0x37   : > { %3049 = vmatprep.mubr.bf16.mxu0 %v2677_v54  ;;  %v242_v7 = vadd.f32 %v3429_v13, %v230_v30  ;;  %v1303_v10 = vor.u32 %v1302_v59, %v1299_v58  ;;  %v1308_v11 = vrot.slane %v1306_v53, 5  ;;  %v1313_v14 = vrot.slane %v1311_v60, 4  ;;  %v415_v53 = vld [vmem:[#allocation2 + $0x28] sm:$0xf]  ;;  %v418_v54 = vld [vmem:[#allocation2 + $0x2c] sm:$0x1] }
  0x38   : > { %v1316_v15 = vrot.slane %v1314_v61, 5  ;;  %v529_v16 = vsel %vm3521_vm8, %v524_v5, %v528_v48  ;;  %v1322_v17 = vrot.slane %v1320_v6, 5  ;;  %v248_v19 = vmax.f32 %v3542_v4, 0.0  ;;  %v3261_v59 = vld [vmem:[%s4018_s2 + $0x148] sm:$0xff]   ;;  %v3599_v61 = vld [vmem:[#allocation2 + $0x24] sm:$0x1] }
  0x39   : > { %v531_v20 = vshrl.u32 %v3566_v63, 16  ;;  %v2574_v21 = vcombine.low %v515_v1, %v529_v16  ;;  %v1304_v22 = vrot.slane %v1303_v10, 4  ;;  %v534_v24 = vshll.u32 %v3566_v63, 16  ;;  %v421_v6 = vld [vmem:[#allocation2 + $0x30] sm:$0xf] }
  0x3a   : > { %v1317_v23 = vor.u32 %v1316_v15, %v1313_v14  ;;  %v1564_v26 = vrot.slane %v3528_v56, 5  ;;  %v906_v30 = vrot.slane %v3539_v3, 5  ;;  %v2825_v31 = vpack.c.bf16 %v248_v19, %v248_v19  ;;  %v430_v19 = vld [vmem:[#allocation2 + $0x3c] sm:$0x1]  ;;  %v870_v56 = vld [vmem:[#allocation2 + $0x8] sm:$0xe] }
  0x3b   : > { %v249_v32 = vmax.f32 %v241_v0, 0.0  ;;  %2954 = vmatmul.mubr.bf16.vlgmr.msra.gmra.mrb[0].mxu1 %v2574_v21  ;;  %v910_v37 = vrot.slane %v3544_v8, 5  ;;  %v1309_v4 = vsel %vm3521_vm8, %v1304_v22, %v1308_v11  ;;  %v250_v39 = vmax.f32 %v242_v7, 0.0  ;;  %v424_v7 = vld [vmem:[#allocation2 + $0x34] sm:$0x1] }
  0x3c   : > { %v1318_v38 = vrot.slane %v1317_v23, 4  ;;  %2962 = vmatpush3.bf16.msra.mxu1 %v3478_v45  ;;  %v337_v40 = vshrl.u32 %v2825_v31, 16  ;;  %v340_v42 = vshll.u32 %v2825_v31, 16  ;;  %v3588_v44 = vrot.slane %v531_v20, 4  ;;  %v3264_v20 = vld [vmem:[%s4018_s2 + $0x18] sm:$0xff]  }
  0x3d   : > { %v2826_v46 = vpack.c.bf16 %v249_v32, %v249_v32  ;;  %2963 = vmatprep.subr.bf16.mxu1 %v3260_v9  ;;  %v536_v55 = vrot.slane %v534_v24, 5  ;;  %v2827_v57 = vpack.c.bf16 %v250_v39, %v250_v39  ;;  %v231_v58 = vmul.f32 %v3424_v12, %v219_v33  ;;  %v3616_v33 = vld [vmem:[#allocation2 + $0x8] sm:$0xe] }
  0x3e   : > { %v1323_v48 = vsel %vm3521_vm8, %v1318_v38, %v1322_v17  ;;  %v339_v60 = vrot.slane %v337_v40, 7  ;;  %v1568_v5 = vrot.slane %v3555_v29, 5  ;;  %v427_v17 = vld [vmem:[#allocation2 + $0x38] sm:$0xf]  ;;  %v540_v22 = vshll.u32 %v3599_v61, 16  ;;  %v3266_v38 = vld [vmem:[%s4018_s2 + $0x20] sm:$0xff]  }
  0x3f   : > { %v2678_v45 = vcombine.low %v1309_v4, %v1323_v48  ;;  %v345_v0 = vshrl.u32 %v2826_v46, 16  ;;  %v348_v1 = vshll.u32 %v2826_v46, 16  ;;  %v353_v10 = vshrl.u32 %v2827_v57, 16 }
  0x40   : > { %v356_v11 = vshll.u32 %v2827_v57, 16  ;;  %v243_v14 = vadd.f32 %v3429_v13, %v231_v58  ;;  %2964 = vmatpush3.bf16.msra.mxu1 %v3260_v9  ;;  %v342_v12 = vor.u32 %v340_v42, %v339_v60  ;;  %v343_v15 = vrot.slane %v339_v60, 4  ;;  %v3263_v9 = vld [vmem:[%s4018_s2 + $0x150] sm:$0xff]  }
  0x41   : > { %3050 = vmatmul.mubr.bf16.vlgmr.msra.gmra.mrb[0].mxu0 %v2678_v45  ;;  %v347_v16 = vrot.slane %v345_v0, 7  ;;  %2965 = vmatprep.subr.bf16.mxu1 %v3262_v52  ;;  %v537_v21 = vor.u32 %v536_v55, %v3588_v44  ;;  %v355_v23 = vrot.slane %v353_v10, 7  ;;  %v1572_v4 = vrot.slane %v3563_v49, 5  ;;  %v3265_v44 = vld [vmem:[%s4018_s2 + $0x158] sm:$0xff]   ;;  %v433_v0 = vld [vmem:[#allocation2 + $0x40] sm:$0xf] }
  0x42   : > { %3058 = vmatpush3.bf16.msra.mxu0 %v3484_v50  ;;  %v251_v13 = vmax.f32 %v243_v14, 0.0  ;;  %v416_v24 = vsel %vm3460_vm4, %v342_v12, %v415_v53  ;;  %v419_v50 = vsel %vm3468_vm5, %v343_v15, %v418_v54  ;;  %v3629_v53 = vld [vmem:[#allocation2 + $0x10] sm:$0xe]  ;;  %v3637_v45 = vrot.slane %v540_v22, 5 }
  0x43   : > { %3059 = vmatprep.subr.bf16.mxu0 %v3261_v59  ;;  %v350_v31 = vor.u32 %v348_v1, %v347_v16  ;;  %v351_v32 = vrot.slane %v347_v16, 4  ;;  %417 = vst [vmem:[#allocation2 + $0x28] sm:$0xf] %v416_v24  ;;  %420 = vst [vmem:[#allocation2 + $0x2c] sm:$0x1] %v419_v50  ;;  %v358_v39 = vor.u32 %v356_v11, %v355_v23  ;;  %v359_v40 = vrot.slane %v355_v23, 4 }
  0x44   : > { %v2828_v42 = vpack.c.bf16 %v251_v13, %v251_v13  ;;  %2966 = vmatpush3.bf16.msra.mxu1 %v3262_v52  ;;  %v3635_v58 = vrot.slane %v537_v21, 4  ;;  %v436_v1 = vld [vmem:[#allocation2 + $0x44] sm:$0x1]  ;;  %v2690_v14 = vrot.slane %v3629_v53, 9  ;;  %v3270_v21 = vld [vmem:[%s4018_s2 + $0x30] sm:$0xff]   ;;  %v3269_v13 = vld [vmem:[%s4018_s2 + $0x168] sm:$0xff]  }
  0x45   : > { %v422_v46 = vsel %vm3460_vm4, %v350_v31, %v421_v6  ;;  %v425_v48 = vsel %vm3468_vm5, %v351_v32, %v424_v7  ;;  %2967 = vmatprep.subr.bf16.mxu1 %v3264_v20  ;;  %v428_v54 = vsel %vm3460_vm4, %v358_v39, %v427_v17  ;;  %v431_v52 = vsel %vm3468_vm5, %v359_v40, %v430_v19  ;;  %v3267_v7 = vld [vmem:[%s4018_s2 + $0x160] sm:$0xff]   ;;  %v3280_v49 = vld [vmem:[%s4018_s2 + $0x90] sm:$0xff]  }
  0x46   : > { %3060 = vmatpush3.bf16.msra.mxu0 %v3261_v59  ;;  %423 = vst [vmem:[#allocation2 + $0x30] sm:$0xf] %v422_v46  ;;  %426 = vst [vmem:[#allocation2 + $0x34] sm:$0x1] %v425_v48  ;;  %v361_v55 = vshrl.u32 %v2828_v42, 16  ;;  %v364_v57 = vshll.u32 %v2828_v42, 16  ;;  %v543_v41 = vsel %vm3521_vm8, %v3635_v58, %v3637_v45 }
  0x47   : > { %3061 = vmatprep.subr.bf16.mxu0 %v3263_v9  ;;  %429 = vst [vmem:[#allocation2 + $0x38] sm:$0xf] %v428_v54  ;;  %432 = vst [vmem:[#allocation2 + $0x3c] sm:$0x1] %v431_v52  ;;  %v3268_v59 = vld [vmem:[%s4018_s2 + $0x28] sm:$0xff]   ;;  %v2689_v6 = vrot.slane %v3616_v33, 9 }
  0x48   : > { %v363_v60 = vrot.slane %v361_v55, 7  ;;  %2968 = vmatpush3.bf16.msra.mxu1 %v3264_v20  ;;  %v3272_v58 = vld [vmem:[%s4018_s2 + $0x38] sm:$0xff]  }
  0x49   : > { %2969 = vmatprep.subr.bf16.mxu1 %v3266_v38 }
  0x4a   : > { %3062 = vmatpush3.bf16.msra.mxu0 %v3263_v9  ;;  %v366_v10 = vor.u32 %v364_v57, %v363_v60  ;;  %v367_v11 = vrot.slane %v363_v60, 4  ;;  %v3647_v12 = vld [vmem:[#allocation2 + $0x28] sm:$0xf]  ;;  %v3649_v15 = vld [vmem:[#allocation2 + $0x2c] sm:$0x1] }
  0x4b   : > { %3063 = vmatprep.subr.bf16.mxu0 %v3265_v44  ;;  %v1260_v16 = vld [vmem:[#allocation2 + $0x28] sm:$0xf]  ;;  %v545_v17 = vshrl.u32 %v3647_v12, 16  ;;  %v548_v19 = vshll.u32 %v3647_v12, 16  ;;  %v554_v20 = vshll.u32 %v3649_v15, 16  ;;  %v2587_v43 = vcombine.low %v3566_v63, %v3647_v12  ;;  %v3282_v12 = vld [vmem:[%s4018_s2 + $0x98] sm:$0xff]  }
  0x4c   : > { %v3657_v22 = vld [vmem:[#allocation2 + $0x2c] sm:$0x1]  ;;  %v1325_v23 = vshrl.u32 %v1260_v16, 16  ;;  %2970 = vmatpush3.bf16.msra.mxu1 %v3266_v38  ;;  %v1328_v50 = vshll.u32 %v1260_v16, 16  ;;  %v434_v32 = vsel %vm3460_vm4, %v366_v10, %v433_v0  ;;  %v437_v39 = vsel %vm3468_vm5, %v367_v11, %v436_v1 }
  0x4d   : > { %v1262_v9 = vld [vmem:[#allocation2 + $0x30] sm:$0xf]  ;;  %v3662_v24 = vld [vmem:[#allocation2 + $0x34] sm:$0x1]  ;;  %v1334_v31 = vshll.u32 %v3657_v22, 16  ;;  %2971 = vmatprep.subr.bf16.mxu1 %v3268_v59  ;;  %v547_v40 = vrot.slane %v545_v17, 4 }
  0x4e   : > { %3064 = vmatpush3.bf16.msra.mxu0 %v3265_v44  ;;  %v550_v38 = vrot.slane %v548_v19, 5  ;;  %v556_v42 = vrot.slane %v554_v20, 5  ;;  %v1327_v46 = vrot.slane %v1325_v23, 4  ;;  %v3669_v48 = vld [vmem:[#allocation2 + $0x30] sm:$0xf]  ;;  %v1330_v54 = vrot.slane %v1328_v50, 5 }
  0x4f   : > { %435 = vst [vmem:[#allocation2 + $0x40] sm:$0xf] %v434_v32  ;;  %438 = vst [vmem:[#allocation2 + $0x44] sm:$0x1] %v437_v39  ;;  %3065 = vmatprep.subr.bf16.mxu0 %v3267_v7  ;;  %v1336_v52 = vrot.slane %v1334_v31, 5  ;;  %v1339_v34 = vshrl.u32 %v1262_v9, 16 }
  0x50   : > { %v1342_v55 = vshll.u32 %v1262_v9, 16  ;;  %v3671_v57 = vld [vmem:[#allocation2 + $0x38] sm:$0xf]  ;;  %v551_v44 = vor.u32 %v550_v38, %v547_v40  ;;  %v1348_v60 = vshll.u32 %v3662_v24, 16  ;;  %v3678_v0 = vld [vmem:[#allocation2 + $0x34] sm:$0x1]  ;;  %2972 = vmatpush3.bf16.msra.mxu1 %v3268_v59  ;;  %v1331_v11 = vor.u32 %v1330_v54, %v1327_v46 }
  0x51   : > { %v3680_v1 = vld [vmem:[#allocation2 + $0x3c] sm:$0x1]  ;;  %v559_v10 = vshrl.u32 %v3669_v48, 16  ;;  %v1341_v16 = vrot.slane %v1339_v34, 4  ;;  %v562_v19 = vshll.u32 %v3669_v48, 16  ;;  %2973 = vmatprep.subr.bf16.mxu1 %v3270_v21  ;;  %v568_v50 = vshll.u32 %v3678_v0, 16 }
  0x52   : > { %v1344_v17 = vrot.slane %v1342_v55, 5  ;;  %v1264_v20 = vld [vmem:[#allocation2 + $0x38] sm:$0xf]  ;;  %3066 = vmatpush3.bf16.msra.mxu0 %v3267_v7  ;;  %v552_v45 = vrot.slane %v551_v44, 4  ;;  %v1350_v23 = vrot.slane %v1348_v60, 5  ;;  %v1332_v59 = vrot.slane %v1331_v11, 4 }
  0x53   : > { %v561_v9 = vrot.slane %v559_v10, 4  ;;  %v3688_v31 = vld [vmem:[#allocation2 + $0x3c] sm:$0x1]  ;;  %3067 = vmatprep.subr.bf16.mxu0 %v3269_v13  ;;  %v3271_v39 = vld [vmem:[%s4018_s2 + $0x170] sm:$0xff]   ;;  %v564_v40 = vrot.slane %v562_v19, 5  ;;  %v573_v38 = vshrl.u32 %v3671_v57, 16 }
  0x54   : > { %v1345_v32 = vor.u32 %v1344_v17, %v1341_v16  ;;  %v557_v7 = vsel %vm3521_vm8, %v552_v45, %v556_v42  ;;  %v570_v46 = vrot.slane %v568_v50, 5  ;;  %v576_v54 = vshll.u32 %v3671_v57, 16  ;;  %2974 = vmatpush3.bf16.msra.mxu1 %v3270_v21  ;;  %v3273_v16 = vld [vmem:[%s4018_s2 + $0x178] sm:$0xff]  }
  0x55   : > { %v582_v34 = vshll.u32 %v3680_v1, 16  ;;  %v2575_v55 = vcombine.low %v543_v41, %v557_v7  ;;  %v1337_v44 = vsel %vm3521_vm8, %v1332_v59, %v1336_v52  ;;  %v565_v10 = vor.u32 %v564_v40, %v561_v9  ;;  %v3703_v17 = vld [vmem:[#allocation2 + $0x18] sm:$0xe]  ;;  %2975 = vmatprep.subr.bf16.mxu1 %v3272_v58  ;;  %v3705_v41 = vld [vmem:[#allocation2 + $0x20] sm:$0xe] }
  0x56   : > { %v1346_v60 = vrot.slane %v1345_v32, 4  ;;  %v1266_v11 = vld [vmem:[#allocation2 + $0x40] sm:$0xf]  ;;  %3068 = vmatpush3.bf16.msra.mxu0 %v3269_v13  ;;  %v575_v42 = vrot.slane %v573_v38, 4  ;;  %v578_v19 = vrot.slane %v576_v54, 5  ;;  %v1353_v50 = vshrl.u32 %v1264_v20, 16 }
  0x57   : > { %v584_v45 = vrot.slane %v582_v34, 5  ;;  %2957 = vmatprep.mubr.bf16.mxu1 %v2575_v55  ;;  %3069 = vmatprep.subr.bf16.mxu0 %v3271_v39  ;;  %v566_v21 = vrot.slane %v565_v10, 4  ;;  %v3709_v9 = vld [vmem:[#allocation2 + $0x44] sm:$0x1]  ;;  %v1356_v59 = vshll.u32 %v1264_v20, 16  ;;  %v1362_v32 = vshll.u32 %v3688_v31, 16 }
  0x58   : > { %v1351_v52 = vsel %vm3521_vm8, %v1346_v60, %v1350_v23  ;;  %v3715_v13 = vld [vmem:[%s4018_s2 + $0x80] sm:$0xff]   ;;  %v579_v38 = vor.u32 %v578_v19, %v575_v42  ;;  %v1355_v7 = vrot.slane %v1353_v50, 4  ;;  %v1367_v54 = vshrl.u32 %v1266_v11, 16  ;;  %2976 = vmatpush3.bf16.msra.mxu1 %v3272_v58  ;;  %v3725_v10 = vld [vmem:[#allocation2 + $0x28] sm:$0xe] }
  0x59   : > { %v2679_v40 = vcombine.low %v1337_v44, %v1351_v52  ;;  %v1358_v34 = vrot.slane %v1356_v59, 5  ;;  %v1370_v55 = vshll.u32 %v1266_v11, 16  ;;  %v2691_v20 = vrot.slane %v3703_v17, 9  ;;  %v3733_v11 = vld [vmem:[%s4018_s2 + $0x180] sm:$0xff]   ;;  %v1539_v50 = vld [vmem:[#allocation2 + $0x30] sm:$0xe]  ;;  %2985 = vmatprep.subr.bf16.mxu1 %v3715_v13 }
  0x5a   : > { %v2692_v60 = vrot.slane %v3705_v41, 9  ;;  %v571_v44 = vsel %vm3521_vm8, %v566_v21, %v570_v46  ;;  %v580_v42 = vrot.slane %v579_v38, 4  ;;  %v1369_v19 = vrot.slane %v1367_v54, 4  ;;  %3070 = vmatpush3.bf16.msra.mxu0 %v3271_v39  ;;  %v3736_v59 = vld [vmem:[#allocation2 + $0x38] sm:$0xe] }
  0x5b   : > { %3053 = vmatprep.mubr.bf16.mxu0 %v2679_v40  ;;  %v1376_v58 = vshll.u32 %v3709_v9, 16  ;;  %v1359_v17 = vor.u32 %v1358_v34, %v1355_v7  ;;  %v1364_v52 = vrot.slane %v1362_v32, 5  ;;  %v1372_v41 = vrot.slane %v1370_v55, 5  ;;  %3071 = vmatprep.subr.bf16.mxu0 %v3273_v16  ;;  %v1541_v40 = vld [vmem:[#allocation2 + $0x40] sm:$0xe] }
  0x5c   : > { %v585_v46 = vsel %vm3521_vm8, %v580_v42, %v584_v45  ;;  %v2585_v39 = vcombine.low %v3446_v25, %v3505_v27  ;;  %v1561_v21 = vsel %vm3719_vm11, %v2689_v6, %v1560_v51  ;;  %v1565_v32 = vsel %vm3719_vm11, %v2690_v14, %v1564_v26  ;;  %v869_v25 = vld [vmem:[#allocation2] sm:$0xe] }
  0x5d   : > { %v2576_v38 = vcombine.low %v571_v44, %v585_v46  ;;  %v1360_v45 = vrot.slane %v1359_v17, 4  ;;  %v1373_v7 = vor.u32 %v1372_v41, %v1369_v19  ;;  %v1378_v54 = vrot.slane %v1376_v58, 5  ;;  %v871_v58 = vld [vmem:[#allocation2 + $0x10] sm:$0xe]  ;;  %v3286_v41 = vld [vmem:[%s4018_s2 + $0xa8] sm:$0xff]  }
  0x5e   : > { %3072 = vmatpush3.bf16.msra.mxu0 %v3273_v16  ;;  %v2693_v27 = vrot.slane %v3725_v10, 9  ;;  %v1576_v35 = vrot.slane %v3657_v22, 5  ;;  %v2694_v33 = vrot.slane %v1539_v50, 9  ;;  %v1580_v51 = vrot.slane %v3662_v24, 5  ;;  %v872_v50 = vld [vmem:[#allocation2 + $0x18] sm:$0xe] }
  0x5f   : > { %2958 = vmatmul.mubr.bf16.gmra.mrb[4].mxu1 %v2576_v38  ;;  %v1365_v53 = vsel %vm3521_vm8, %v1360_v45, %v1364_v52  ;;  %v1374_v26 = vrot.slane %v1373_v7, 4  ;;  %3081 = vmatprep.subr.bf16.mxu0 %v3733_v11  ;;  %v2695_v6 = vrot.slane %v3736_v59, 9  ;;  %v2597_v14 = vrot.slane %v869_v25, 9  ;;  %v3285_v59 = vld [vmem:[%s4018_s2 + $0x1a0] sm:$0xff]   ;;  %v3287_v46 = vld [vmem:[%s4018_s2 + $0x1a8] sm:$0xff]   ;;  %v3290_v38 = vld [vmem:[%s4018_s2 + $0x1b0] sm:$0xff]  }
  0x60   : > { %2977 = vmatprep.mubr.bf16.mxu1 %v2585_v39  ;;  %v2598_v16 = vrot.slane %v870_v56, 9  ;;  %v2713_v22 = vcombine.low %v1561_v21, %v1565_v32  ;;  %v1584_v55 = vrot.slane %v3688_v31, 5  ;;  %v2696_v24 = vrot.slane %v1541_v40, 9  ;;  %v3278_v31 = vld [vmem:[%s4018_s2 + $0x88] sm:$0xff]   ;;  %v3289_v39 = vld [vmem:[%s4018_s2 + $0xb0] sm:$0xff]   ;;  %v3292_v40 = vld [vmem:[%s4018_s2 + $0xb8] sm:$0xff]  }
  0x61   : > { %v1379_v34 = vsel %vm3521_vm8, %v1374_v26, %v1378_v54  ;;  %v2586_v44 = vcombine.low %v3532_v62, %v3537_v2  ;;  %v899_v42 = vsel %vm3719_vm11, %v2597_v14, %v898_v18  ;;  %v1588_v17 = vrot.slane %v3709_v9, 5  ;;  %v873_v21 = vld [vmem:[#allocation2 + $0x20] sm:$0xe]  ;;  %v874_v32 = vld [vmem:[#allocation2 + $0x28] sm:$0xe] }
  0x62   : > { %v2680_v10 = vcombine.low %v1365_v53, %v1379_v34  ;;  %v903_v19 = vsel %vm3719_vm11, %v2598_v16, %v902_v36  ;;  %v2599_v62 = vrot.slane %v871_v58, 9  ;;  %v2600_v2 = vrot.slane %v872_v50, 9  ;;  %v1915_v45 = vld [vmem:[#allocation2 + $0x10] sm:$0xf]  ;;  %v1917_v7 = vld [vmem:[#allocation2 + $0x18] sm:$0xf] }
  0x63   : > { %v2621_v52 = vcombine.low %v899_v42, %v903_v19  ;;  %v1569_v18 = vsel %vm3719_vm11, %v2691_v20, %v1568_v5  ;;  %v1573_v28 = vsel %vm3719_vm11, %v2692_v60, %v1572_v4  ;;  %v1577_v3 = vsel %vm3719_vm11, %v2693_v27, %v1576_v35  ;;  %v3284_v20 = vld [vmem:[%s4018_s2 + $0xa0] sm:$0xff]   ;;  %v876_v16 = vld [vmem:[#allocation2 + $0x38] sm:$0xe] }
  0x64   : > { %3054 = vmatmul.mubr.bf16.gmra.mrb[4].mxu0 %v2680_v10  ;;  %v3792_v36 = vsel %vm3719_vm11, %v2599_v62, %v906_v30  ;;  %v3798_v63 = vsel %vm3719_vm11, %v2600_v2, %v910_v37  ;;  %v1581_v30 = vsel %vm3719_vm11, %v2694_v33, %v1580_v51  ;;  %v2714_v8 = vcombine.low %v1569_v18, %v1573_v28  ;;  %v3279_v37 = vld [vmem:[%s4018_s2 + $0x188] sm:$0xff]   ;;  %v875_v33 = vld [vmem:[#allocation2 + $0x30] sm:$0xe]  ;;  %v3296_v2 = vld [vmem:[%s4018_s2 + $0x1c0] sm:$0xff]  }
  0x65   : > { %3073 = vmatprep.mubr.bf16.mxu0 %v2713_v22  ;;  %v2622_v29 = vcombine.low %v3792_v36, %v3798_v63  ;;  %v2715_v5 = vcombine.low %v1577_v3, %v1581_v30  ;;  %v2588_v4 = vcombine.low %v3669_v48, %v3671_v57  ;;  %v1585_v9 = vsel %vm3719_vm11, %v2695_v6, %v1584_v55  ;;  %v3281_v48 = vld [vmem:[%s4018_s2 + $0x190] sm:$0xff]   ;;  %v3283_v57 = vld [vmem:[%s4018_s2 + $0x198] sm:$0xff]   ;;  %v3297_v18 = vld [vmem:[#allocation2 + $0x20] ss:$8 sps:$4 sm:$0xff]  }
  0x66   : > { %v2601_v54 = vrot.slane %v873_v21, 9  ;;  %v914_v25 = vrot.slane %v3599_v61, 5  ;;  %v2602_v27 = vrot.slane %v874_v32, 9  ;;  %v918_v35 = vrot.slane %v3649_v15, 5  ;;  %v3293_v6 = vld [vmem:[%s4018_s2 + $0x1b8] sm:$0xff]   ;;  %v3294_v61 = vld [vmem:[%s4018_s2 + $0xc0] sm:$0xff]  }
  0x67   : > { %2978 = vmatmul.mubr.bf16.vlgmr.msra.gmra.mrb[0].mxu1 %v2586_v44  ;;  %v1932_v51 = vshrl.u32 %v1915_v45, 16  ;;  %v1935_v56 = vshll.u32 %v1915_v45, 16  ;;  %v1946_v53 = vshrl.u32 %v1917_v7, 16  ;;  %v1949_v26 = vshll.u32 %v1917_v7, 16  ;;  %v3862_v22 = vld [vmem:[#allocation2 + $0x14] sm:$0x1] }
  0x68   : > { %2986 = vmatpush3.bf16.msra.mxu1 %v3715_v13  ;;  %2981 = vmatprep.mubr.bf16.mxu1 %v2587_v43  ;;  %v1589_v13 = vsel %vm3719_vm11, %v2696_v24, %v1588_v17  ;;  %v915_v15 = vsel %vm3719_vm11, %v2601_v54, %v914_v25  ;;  %v919_v14 = vsel %vm3719_vm11, %v2602_v27, %v918_v35  ;;  %v2603_v34 = vrot.slane %v875_v33, 9  ;;  %v3864_v55 = vld [vmem:[#allocation2 + $0x1c] sm:$0x1]  ;;  %v3298_v17 = vld [vmem:[%s4018_s2 + $0xc8] sm:$0xff]   ;;  %v3305_v25 = vld [vmem:[%s4018_s2 + $0x1e0] sm:$0xff]  }
  0x69   : > { %2987 = vmatprep.subr.bf16.mxu1 %v3278_v31  ;;  %v2716_v60 = vcombine.low %v1585_v9, %v1589_v13  ;;  %v1934_v24 = vrot.slane %v1932_v51, 4  ;;  %v1937_v10 = vrot.slane %v1935_v56, 5  ;;  %v1948_v44 = vrot.slane %v1946_v53, 4  ;;  %v3299_v28 = vld [vmem:[%s4018_s2 + $0x1c8] sm:$0xff]   ;;  %v1919_v9 = vld [vmem:[#allocation2 + $0x20] sm:$0xf] }
  0x6a   : > { %v1951_v42 = vrot.slane %v1949_v26, 5  ;;  %v2623_v19 = vcombine.low %v915_v15, %v919_v14  ;;  %v922_v58 = vrot.slane %v3678_v0, 5  ;;  %v2604_v50 = vrot.slane %v876_v16, 9  ;;  %v3300_v0 = vld [vmem:[%s4018_s2 + $0xd0] sm:$0xff]   ;;  %v3306_v27 = vld [vmem:[%s4018_s2 + $0xe8] sm:$0xff]  }
  0x6b   : > { %v1955_v62 = vshll.u32 %v3864_v55, 16  ;;  %v1963_v21 = vshll.u32 %v1919_v9, 16  ;;  %v3911_v35 = vld [vmem:[#allocation2 + $0x24] sm:$0x1]  ;;  %v3913_v26 = vld [vmem:[#allocation2 + $0x2c] sm:$0x1] }
  0x6c   : > { %3074 = vmatmul.mubr.bf16.vlgmr.msra.gmra.mrb[0].mxu0 %v2714_v8  ;;  %2988 = vmatpush3.bf16.msra.mxu1 %v3278_v31  ;;  %v926_v31 = vrot.slane %v3680_v1, 5  ;;  %v1938_v1 = vor.u32 %v1937_v10, %v1934_v24  ;;  %v1952_v43 = vor.u32 %v1951_v42, %v1948_v44  ;;  %v923_v3 = vsel %vm3719_vm11, %v2603_v34, %v922_v58  ;;  %v3915_v16 = vld [vmem:[#allocation2 + $0x34] sm:$0x1]  ;;  %v3917_v34 = vld [vmem:[#allocation2 + $0x3c] sm:$0x1]  ;;  %v3307_v42 = vld [vmem:[%s4018_s2 + $0x1e8] sm:$0xff]  }
  0x6d   : > { %3082 = vmatpush3.bf16.msra.mxu0 %v3733_v11  ;;  %2989 = vmatprep.subr.bf16.mxu1 %v3280_v49  ;;  %v3295_v11 = vld [vmem:[#allocation2 + $0x10] ss:$8 sps:$4 sm:$0xff]   ;;  %v1965_v51 = vrot.slane %v1963_v21, 5  ;;  %v1927_v10 = vld [vmem:[#allocation2 + $0x40] sm:$0xf]  ;;  %v1969_v58 = vshll.u32 %v3911_v35, 16 }
  0x6e   : > { %3083 = vmatprep.subr.bf16.mxu0 %v3279_v37  ;;  %3077 = vmatprep.mubr.bf16.mxu0 %v2715_v5  ;;  %v927_v36 = vsel %vm3719_vm11, %v2604_v50, %v926_v31  ;;  %v1939_v8 = vrot.slane %v1938_v1, 4  ;;  %v3314_v5 = vld [vmem:[#allocation2 + $0x8] ss:$8 sps:$4 sm:$0xff]   ;;  %v1983_v31 = vshll.u32 %v3913_v26, 16  ;;  %v2019_v1 = vshll.u32 %v1927_v10, 16 }
  0x6f   : > { %2982 = vmatmul.mubr.bf16.gmra.mrb[4].mxu1 %v2588_v4  ;;  %v2624_v30 = vcombine.low %v923_v3, %v927_v36  ;;  %v3302_v4 = vld [vmem:[%s4018_s2 + $0xd8] sm:$0xff]   ;;  %v3309_v24 = vld [vmem:[%s4018_s2 + $0xf0] sm:$0xff]   ;;  %v1929_v44 = vld [vmem:[#allocation2 + $0x48] sm:$0xf]  ;;  %v1971_v36 = vrot.slane %v1969_v58, 5 }
  0x70   : > { %2990 = vmatpush3.bf16.msra.mxu1 %v3280_v49  ;;  %3001 = vmatprep.mubr.bf16.mxu1 %v2621_v52  ;;  %v1941_v52 = vshll.u32 %v3862_v22, 16  ;;  %v3308_v49 = vld [vmem:[#allocation2 + $0x30] ss:$8 sps:$4 sm:$0xff]  }
  0x71   : > { %3084 = vmatpush3.bf16.msra.mxu0 %v3279_v37  ;;  %2991 = vmatprep.subr.bf16.mxu1 %v3282_v12  ;;  %v1953_v37 = vrot.slane %v1952_v43, 4  ;;  %v2030_v43 = vshrl.u32 %v1929_v44, 16 }
  0x72   : > { %3085 = vmatprep.subr.bf16.mxu0 %v3281_v48  ;;  %v1943_v63 = vrot.slane %v1941_v52, 5  ;;  %v1997_v52 = vshll.u32 %v3915_v16, 16 }
  0x74   : > { %2992 = vmatpush3.bf16.msra.mxu1 %v3282_v12  ;;  %3078 = vmatmul.mubr.bf16.gmra.mrb[4].mxu0 %v2716_v60  ;;  %v3301_v12 = vld [vmem:[%s4018_s2 + $0x1d0] sm:$0xff]   ;;  %v1944_v13 = vsel %vm3521_vm8, %v1939_v8, %v1943_v63  ;;  %v1999_v8 = vrot.slane %v1997_v52, 5 }
  0x75   : > { %3086 = vmatpush3.bf16.msra.mxu0 %v3281_v48  ;;  %2993 = vmatprep.subr.bf16.mxu1 %v3284_v20  ;;  %v1923_v60 = vld [vmem:[#allocation2 + $0x30] sm:$0xf] }
  0x76   : > { %3087 = vmatprep.subr.bf16.mxu0 %v3283_v57  ;;  %3097 = vmatprep.mubr.bf16.mxu0 %v3295_v11  ;;  %v1925_v11 = vld [vmem:[#allocation2 + $0x38] sm:$0xf]  ;;  %v1991_v45 = vshll.u32 %v1923_v60, 16 }
  0x77   : > { %v2002_v7 = vshrl.u32 %v1925_v11, 16  ;;  %v2005_v54 = vshll.u32 %v1925_v11, 16  ;;  %v2201_v11 = vld [vmem:[#allocation2 + $0x30] sm:$0xe] }
  0x78   : > { %2994 = vmatpush3.bf16.msra.mxu1 %v3284_v20  ;;  %v3310_v20 = vld [vmem:[#allocation2 + $0x40] ss:$8 sps:$4 sm:$0xff]  }
  0x79   : > { %3088 = vmatpush3.bf16.msra.mxu0 %v3283_v57  ;;  %2995 = vmatprep.subr.bf16.mxu1 %v3286_v41  ;;  %v1921_v57 = vld [vmem:[#allocation2 + $0x28] sm:$0xf]  ;;  %v2004_v15 = vrot.slane %v2002_v7, 4  ;;  %v2007_v14 = vrot.slane %v2005_v54, 5 }
  0x7a   : > { %3089 = vmatprep.subr.bf16.mxu0 %v3285_v59  ;;  %v1974_v32 = vshrl.u32 %v1921_v57, 16 }
  0x7c   : > { %2996 = vmatpush3.bf16.msra.mxu1 %v3286_v41  ;;  %v3304_v41 = vld [vmem:[%s4018_s2 + $0xe0] sm:$0xff]   ;;  %v1976_v56 = vrot.slane %v1974_v32, 4 }
  0x7d   : > { %3090 = vmatpush3.bf16.msra.mxu0 %v3285_v59  ;;  %2997 = vmatprep.subr.bf16.mxu1 %v3289_v39  ;;  %v1960_v59 = vshrl.u32 %v1919_v9, 16 }
  0x7e   : > { %3091 = vmatprep.subr.bf16.mxu0 %v3287_v46 }
  0x7f   : > { %v1962_v33 = vrot.slane %v1960_v59, 4  ;;  %v3315_v59 = vld [vmem:[#allocation2 + $0x18] ss:$8 sps:$4 sm:$0xff]  }
  0x80   : > { %2998 = vmatpush3.bf16.msra.mxu1 %v3289_v39 }
  0x81   : > { %3092 = vmatpush3.bf16.msra.mxu0 %v3287_v46  ;;  %2999 = vmatprep.subr.bf16.mxu1 %v3292_v40  ;;  %v3303_v46 = vld [vmem:[%s4018_s2 + $0x1d8] sm:$0xff]  }
  0x82   : > { %3093 = vmatprep.subr.bf16.mxu0 %v3290_v38 }
  0x84   : > { %3000 = vmatpush3.bf16.msra.mxu1 %v3292_v40  ;;  %v1977_v40 = vshll.u32 %v1921_v57, 16 }
  0x85   : > { %3094 = vmatpush3.bf16.msra.mxu0 %v3290_v38  ;;  %3009 = vmatprep.subr.bf16.mxu1 %v3294_v61  ;;  %v1988_v38 = vshrl.u32 %v1923_v60, 16  ;;  %v3313_v60 = vld [vmem:[%s4018_s2 + $0x1f8] sm:$0xff]  }
  0x86   : > { %3095 = vmatprep.subr.bf16.mxu0 %v3293_v6  ;;  %v1979_v53 = vrot.slane %v1977_v40, 5  ;;  %v3318_v40 = vld [vmem:[#allocation2 + $0x28] ss:$8 sps:$4 sm:$0xff]  }
  0x87   : > { %3002 = vmatmul.mubr.bf16.vlgmr.msra.gmra.mrb[0].mxu1 %v2622_v29  ;;  %v1957_v29 = vrot.slane %v1955_v62, 5  ;;  %v2008_v62 = vor.u32 %v2007_v14, %v2004_v15  ;;  %v2197_v14 = vld [vmem:[#allocation2 + $0x10] sm:$0xe] }
  0x88   : > { %3010 = vmatpush3.bf16.msra.mxu1 %v3294_v61  ;;  %3005 = vmatprep.mubr.bf16.mxu1 %v2623_v19  ;;  %v1993_v61 = vrot.slane %v1991_v45, 5  ;;  %v1966_v19 = vor.u32 %v1965_v51, %v1962_v33  ;;  %v1980_v50 = vor.u32 %v1979_v53, %v1976_v56  ;;  %v2239_v33 = vrot.slane %v3915_v16, 5 }
  0x89   : > { %3096 = vmatpush3.bf16.msra.mxu0 %v3293_v6  ;;  %3011 = vmatprep.subr.bf16.mxu1 %v3298_v17  ;;  %v1958_v48 = vsel %vm3521_vm8, %v1953_v37, %v1957_v29  ;;  %v1990_v6 = vrot.slane %v1988_v38, 4  ;;  %v1985_v29 = vrot.slane %v1983_v31, 5  ;;  %v2009_v37 = vrot.slane %v2008_v62, 4 }
  0x8a   : > { %3105 = vmatprep.subr.bf16.mxu0 %v3296_v2  ;;  %v2769_v39 = vcombine.low %v1944_v13, %v1958_v48  ;;  %v1967_v3 = vrot.slane %v1966_v19, 4  ;;  %v1981_v63 = vrot.slane %v1980_v50, 4  ;;  %v2021_v13 = vrot.slane %v2019_v1, 5  ;;  %v3319_v19 = vld [vmem:[#allocation2 + $0x38] ss:$8 sps:$4 sm:$0xff]  }
  0x8b   : > { %v2032_v48 = vrot.slane %v2030_v43, 4  ;;  %v2243_v56 = vrot.slane %v3917_v34, 5  ;;  %v2781_v58 = vrot.slane %v2197_v14, 9  ;;  %v2223_v50 = vrot.slane %v3862_v22, 5 }
  0x8c   : > { %3098 = vmatmul.mubr.bf16.vlgmr.msra.gmra.mrb[0].mxu0 %v3297_v18  ;;  %3012 = vmatpush3.bf16.msra.mxu1 %v3298_v17  ;;  %v1994_v17 = vor.u32 %v1993_v61, %v1990_v6  ;;  %v2033_v18 = vshll.u32 %v1929_v44, 16 }
  0x8d   : > { %3106 = vmatpush3.bf16.msra.mxu0 %v3296_v2  ;;  %3013 = vmatprep.subr.bf16.mxu1 %v3300_v0  ;;  %v2011_v2 = vshll.u32 %v3917_v34, 16  ;;  %v2224_v22 = vsel %vm3719_vm11, %v2781_v58, %v2223_v50 }
  0x8e   : > { %3107 = vmatprep.subr.bf16.mxu0 %v3299_v28  ;;  %3101 = vmatprep.mubr.bf16.mxu0 %v3308_v49  ;;  %v3311_v49 = vld [vmem:[%s4018_s2 + $0x1f0] sm:$0xff]   ;;  %v2035_v57 = vrot.slane %v2033_v18, 5  ;;  %v3323_v18 = vld [vmem:[%s4018_s2 + $0x228] sm:$0xff]  }
  0x8f   : > { %3006 = vmatmul.mubr.bf16.gmra.mrb[4].mxu1 %v2624_v30  ;;  %v1995_v30 = vrot.slane %v1994_v17, 4  ;;  %v2227_v17 = vrot.slane %v3864_v55, 5 }
  0x90   : > { %3014 = vmatpush3.bf16.msra.mxu1 %v3300_v0  ;;  %3025 = vmatprep.mubr.bf16.mxu1 %v3314_v5  ;;  %v2016_v0 = vshrl.u32 %v1927_v10, 16  ;;  %v2013_v5 = vrot.slane %v2011_v2, 5  ;;  %v2036_v54 = vor.u32 %v2035_v57, %v2032_v48  ;;  %v2235_v57 = vrot.slane %v3913_v26, 5 }
  0x91   : > { %3108 = vmatpush3.bf16.msra.mxu0 %v3299_v28  ;;  %3015 = vmatprep.subr.bf16.mxu1 %v3302_v4  ;;  %v3312_v28 = vld [vmem:[%s4018_s2 + $0xf8] sm:$0xff]   ;;  %v2000_v38 = vsel %vm3521_vm8, %v1995_v30, %v1999_v8 }
  0x92   : > { %3109 = vmatprep.subr.bf16.mxu0 %v3301_v12  ;;  %v2018_v9 = vrot.slane %v2016_v0, 4  ;;  %v2014_v45 = vsel %vm3521_vm8, %v2009_v37, %v2013_v5  ;;  %v2037_v44 = vrot.slane %v2036_v54, 4  ;;  %v3321_v0 = vld [vmem:[%s4018_s2 + $0x218] sm:$0xff]   ;;  %v2199_v37 = vld [vmem:[#allocation2 + $0x20] sm:$0xe] }
  0x93   : > { %v2771_v6 = vcombine.low %v2000_v38, %v2014_v45  ;;  %v3325_v8 = vld [vmem:[%s4018_s2 + $0x238] sm:$0xff]   ;;  %v2200_v5 = vld [vmem:[#allocation2 + $0x28] sm:$0xe] }
  0x94   : > { %3016 = vmatpush3.bf16.msra.mxu1 %v3302_v4  ;;  %3102 = vmatmul.mubr.bf16.gmra.mrb[4].mxu0 %v3310_v20  ;;  %v3935_v4 = vld [vmem:[#allocation2 + $0x44] sm:$0x1]  ;;  %v2022_v7 = vor.u32 %v2021_v13, %v2018_v9  ;;  %v2231_v13 = vrot.slane %v3911_v35, 5  ;;  %v2784_v48 = vrot.slane %v2200_v5, 9 }
  0x95   : > { %3110 = vmatpush3.bf16.msra.mxu0 %v3301_v12  ;;  %3017 = vmatprep.subr.bf16.mxu1 %v3304_v41  ;;  %v3937_v12 = vld [vmem:[#allocation2 + $0x4c] sm:$0x1]  ;;  %v3316_v20 = vld [vmem:[%s4018_s2 + $0x200] sm:$0xff]   ;;  %v2025_v21 = vshll.u32 %v3935_v4, 16 }
  0x96   : > { %3111 = vmatprep.subr.bf16.mxu0 %v3303_v46  ;;  %3121 = vmatprep.mubr.bf16.mxu0 %v2769_v39  ;;  %v1986_v39 = vsel %vm3521_vm8, %v1981_v63, %v1985_v29  ;;  %v2039_v32 = vshll.u32 %v3937_v12, 16  ;;  %v2023_v10 = vrot.slane %v2022_v7, 4  ;;  %v2251_v63 = vrot.slane %v3937_v12, 5 }
  0x97   : > { %v2027_v61 = vrot.slane %v2025_v21, 5  ;;  %v2783_v12 = vrot.slane %v2199_v37, 9 }
  0x98   : > { %3018 = vmatpush3.bf16.msra.mxu1 %v3304_v41  ;;  %v2202_v41 = vld [vmem:[#allocation2 + $0x38] sm:$0xe]  ;;  %v2041_v15 = vrot.slane %v2039_v32, 5 }
  0x99   : > { %3112 = vmatpush3.bf16.msra.mxu0 %v3303_v46  ;;  %3019 = vmatprep.subr.bf16.mxu1 %v3306_v27  ;;  %v1972_v46 = vsel %vm3521_vm8, %v1967_v3, %v1971_v36  ;;  %v2786_v51 = vrot.slane %v2202_v41, 9  ;;  %v2028_v62 = vsel %vm3521_vm8, %v2023_v10, %v2027_v61  ;;  %v2204_v3 = vld [vmem:[#allocation2 + $0x48] sm:$0xe]  ;;  %v2247_v36 = vrot.slane %v3935_v4, 5 }
  0x9a   : > { %3113 = vmatprep.subr.bf16.mxu0 %v3305_v25  ;;  %v2770_v53 = vcombine.low %v1972_v46, %v1986_v39  ;;  %v2042_v2 = vsel %vm3521_vm8, %v2037_v44, %v2041_v15  ;;  %v2788_v30 = vrot.slane %v2204_v3, 9 }
  0x9b   : > { %v2244_v34 = vsel %vm3719_vm11, %v2786_v51, %v2243_v56  ;;  %v2772_v1 = vcombine.low %v2028_v62, %v2042_v2 }
  0x9c   : > { %3020 = vmatpush3.bf16.msra.mxu1 %v3306_v27  ;;  %v2785_v27 = vrot.slane %v2201_v11, 9  ;;  %v2252_v4 = vsel %vm3719_vm11, %v2788_v30, %v2251_v63  ;;  %v2236_v11 = vsel %vm3719_vm11, %v2784_v48, %v2235_v57 }
  0x9d   : > { %3114 = vmatpush3.bf16.msra.mxu0 %v3305_v25  ;;  %3021 = vmatprep.subr.bf16.mxu1 %v3309_v24  ;;  %v3317_v25 = vld [vmem:[%s4018_s2 + $0x208] sm:$0xff]  }
  0x9e   : > { %3115 = vmatprep.subr.bf16.mxu0 %v3307_v42  ;;  %v2240_v16 = vsel %vm3719_vm11, %v2785_v27, %v2239_v33 }
  0x9f   : > { %v2807_v52 = vcombine.low %v2240_v16, %v2244_v34 }
  0xa0   : > { %3022 = vmatpush3.bf16.msra.mxu1 %v3309_v24  ;;  %v2198_v24 = vld [vmem:[#allocation2 + $0x18] sm:$0xe] }
  0xa1   : > { %3116 = vmatpush3.bf16.msra.mxu0 %v3307_v42  ;;  %3023 = vmatprep.subr.bf16.mxu1 %v3312_v28  ;;  %v3320_v42 = vld [vmem:[%s4018_s2 + $0x210] sm:$0xff]   ;;  %v2782_v31 = vrot.slane %v2198_v24, 9 }
  0xa2   : > { %3117 = vmatprep.subr.bf16.mxu0 %v3311_v49 }
  0xa3   : > { %v2228_v55 = vsel %vm3719_vm11, %v2782_v31, %v2227_v17 }
  0xa4   : > { %3024 = vmatpush3.bf16.msra.mxu1 %v3312_v28  ;;  %v2805_v43 = vcombine.low %v2224_v22, %v2228_v55  ;;  %v3324_v28 = vld [vmem:[%s4018_s2 + $0x230] sm:$0xff]  }
  0xa5   : > { %3118 = vmatpush3.bf16.msra.mxu0 %v3311_v49  ;;  %3153 = vmatprep.subr.bf16.mxu1 %v3316_v20  ;;  %v2203_v49 = vld [vmem:[#allocation2 + $0x40] sm:$0xe] }
  0xa6   : > { %3119 = vmatprep.subr.bf16.mxu0 %v3313_v60  ;;  %v2787_v29 = vrot.slane %v2203_v49, 9 }
  0xa7   : > { %3026 = vmatmul.mubr.bf16.vlgmr.msra.gmra.mrb[0].mxu1 %v3315_v59 }
  0xa8   : > { %3161 = vmatpush3.bf16.msra.mxu1 %v3316_v20  ;;  %3029 = vmatprep.mubr.bf16.mxu1 %v3318_v40  ;;  %v2248_v9 = vsel %vm3719_vm11, %v2787_v29, %v2247_v36 }
  0xa9   : > { %3120 = vmatpush3.bf16.msra.mxu0 %v3313_v60  ;;  %3154 = vmatprep.subr.bf16.mxu1 %v3317_v25  ;;  %v2232_v60 = vsel %vm3719_vm11, %v2783_v12, %v2231_v13 }
  0xaa   : > { %3129 = vmatprep.subr.bf16.mxu0 %v3316_v20  ;;  %v2806_v41 = vcombine.low %v2232_v60, %v2236_v11 }
  0xac   : > { %3122 = vmatmul.mubr.bf16.vlgmr.msra.gmra.mrb[0].mxu0 %v2770_v53  ;;  %3162 = vmatpush3.bf16.msra.mxu1 %v3317_v25 }
  0xad   : > { %3130 = vmatpush3.bf16.msra.mxu0 %v3316_v20  ;;  %3125 = vmatprep.mubr.bf16.mxu0 %v2771_v6  ;;  %v2808_v20 = vcombine.low %v2248_v9, %v2252_v4 }
  0xae   : > { %3131 = vmatprep.subr.bf16.mxu0 %v3317_v25  ;;  %3155 = vmatprep.subr.bf16.mxu1 %v3320_v42 }
  0xaf   : > { %3030 = vmatmul.mubr.bf16.gmra.mrb[4].mxu1 %v3319_v19 }
  0xb0   : > { %3163 = vmatpush3.bf16.msra.mxu1 %v3320_v42  ;;  %3149 = vmatprep.mubr.bf16.mxu1 %v2807_v52 }
  0xb1   : > { %3132 = vmatpush3.bf16.msra.mxu0 %v3317_v25  ;;  %3156 = vmatprep.subr.bf16.mxu1 %v3321_v0 }
  0xb2   : > { %3133 = vmatprep.subr.bf16.mxu0 %v3320_v42 }
  0xb4   : > { %3126 = vmatmul.mubr.bf16.gmra.mrb[4].mxu0 %v2772_v1  ;;  %3164 = vmatpush3.bf16.msra.mxu1 %v3321_v0 }
  0xb5   : > { %3134 = vmatpush3.bf16.msra.mxu0 %v3320_v42  ;;  %3157 = vmatprep.subr.bf16.mxu1 %v3322_v47 }
  0xb6   : > { %3135 = vmatprep.subr.bf16.mxu0 %v3321_v0  ;;  %3145 = vmatprep.mubr.bf16.mxu0 %v2805_v43 }
  0xb8   : > { %3165 = vmatpush3.bf16.msra.mxu1 %v3322_v47 }
  0xb9   : > { %3136 = vmatpush3.bf16.msra.mxu0 %v3321_v0  ;;  %3158 = vmatprep.subr.bf16.mxu1 %v3323_v18 }
  0xba   : > { %3137 = vmatprep.subr.bf16.mxu0 %v3322_v47 }
  0xbc   : > { %3166 = vmatpush3.bf16.msra.mxu1 %v3323_v18 }
  0xbd   : > { %3138 = vmatpush3.bf16.msra.mxu0 %v3322_v47  ;;  %3159 = vmatprep.subr.bf16.mxu1 %v3324_v28 }
  0xbe   : > { %3139 = vmatprep.subr.bf16.mxu0 %v3323_v18 }
  0xc0   : > { %3167 = vmatpush3.bf16.msra.mxu1 %v3324_v28 }
  0xc1   : > { %3140 = vmatpush3.bf16.msra.mxu0 %v3323_v18  ;;  %3160 = vmatprep.subr.bf16.mxu1 %v3325_v8 }
  0xc2   : > { %3141 = vmatprep.subr.bf16.mxu0 %v3324_v28 }
  0xc4   : > { %3168 = vmatpush3.bf16.msra.mxu1 %v3325_v8 }
  0xc5   : > { %3142 = vmatpush3.bf16.msra.mxu0 %v3324_v28 }
  0xc6   : > { %3143 = vmatprep.subr.bf16.mxu0 %v3325_v8 }
  0xc7   : > { %3150 = vmatmul.mubr.bf16.vlgmr.msra.gmra.mrb[8].mxu1 %v2808_v20 }
  0xc9   : > { %3144 = vmatpush3.bf16.msra.mxu0 %v3325_v8 }
  0xcc   : > { %3146 = vmatmul.mubr.bf16.vlgmr.msra.gmra.mrb[0].mxu0 %v2806_v41 }
 0x17a   : > { %v3027_v59 = vpop.f32.mrb[0].mxu1 }
 0x17b   : > { %v1213_v35 = vpop.f32.mrb[1].mxu1 }
 0x17c   : > { %v3028_v46 = vpop.f32.mrb[2].mxu1 }
 0x17d   : > { %v1216_v26 = vpop.f32.mrb[3].mxu1 }
 0x182   : > { %v3031_v39 = vpop.f32.mrb[4].mxu1 }
 0x183   : > { %v1229_v21 = vpop.f32.mrb[5].mxu1 }
 0x184   : > { %v3032_v32 = vpop.f32.mrb[6].mxu1 }
 0x185   : > { %v1232_v40 = vpop.f32.mrb[7].mxu1 }
 0x187   : > { %v3127_v38 = vpop.f32.mrb[4].mxu0 }
 0x188   : > { %v3173_v45 = vadd.f32 %v3127_v38, %v3031_v39  ;;  %v2174_v7 = vpop.f32.mrb[5].mxu0 }
 0x189   : > { %v3175_v54 = vadd.f32 %v2174_v7, %v1229_v21  ;;  %v3128_v23 = vpop.f32.mrb[6].mxu0 }
 0x18a   : > { %v3177_v25 = vadd.f32 %v3128_v23, %v3032_v32  ;;  %v2177_v27 = vpop.f32.mrb[7].mxu0 }
 0x18b   : > { %v3179_v33 = vadd.f32 %v2177_v27, %v1232_v40 }
 0x19a   : > { %v3151_v51 = vpop.f32.mrb[8].mxu1 }
 0x19b   : > { %v3174_v56 = vadd.f32 %v3173_v45, %v3151_v51  ;;  %v2384_v53 = vpop.f32.mrb[9].mxu1 }
 0x19c   : > { %v3176_v6 = vadd.f32 %v3175_v54, %v2384_v53  ;;  %v3152_v61 = vpop.f32.mrb[10].mxu1 }
 0x19d   : > { %2413 = vst [vmem:[%s204_s7 + $0x30] sm:$0xff] %v3174_v56  ;;  %v3178_v15 = vadd.f32 %v3177_v25, %v3152_v61  ;;  %v2387_v14 = vpop.f32.mrb[11].mxu1  ;;  %v2435_v36 = vmul.f32 %v3174_v56, %v3174_v56 }
 0x19e   : > { %2411 = vst [vmem:[%s204_s7 + $0x20] sm:$0xff] %v3176_v6  ;;  %v3180_v24 = vadd.f32 %v3179_v33, %v2387_v14  ;;  %v2433_v47 = vmul.f32 %v3176_v6, %v3176_v6 }
 0x19f   : > { %v3147_v10 = vpop.f32.mrb[0].mxu0  ;;  %2414 = vst [vmem:[%s204_s7 + $0x38] sm:$0xff] %v3178_v15  ;;  %v2436_v30 = vmul.f32 %v3178_v15, %v3178_v15 }
 0x1a0   : > { %v3169_v44 = vadd.f32 %v3147_v10, %v3027_v59  ;;  %v2368_v16 = vpop.f32.mrb[1].mxu0  ;;  %2412 = vst [vmem:[%s204_s7 + $0x28] sm:$0xff] %v3180_v24  ;;  %v2434_v49 = vmul.f32 %v3180_v24, %v3180_v24 }
 0x1a1   : > { %v3170_v34 = vadd.f32 %v2368_v16, %v1213_v35  ;;  %v3148_v42 = vpop.f32.mrb[2].mxu0 }
 0x1a2   : > { %2409 = vst [vmem:[%s204_s7 + $0x10] sm:$0xff] %v3169_v44  ;;  %v3171_v19 = vadd.f32 %v3148_v42, %v3028_v46  ;;  %v2371_v58 = vpop.f32.mrb[3].mxu0  ;;  %v2431_v62 = vmul.f32 %v3169_v44, %v3169_v44 }
 0x1a3   : > { %2407 = vst [vmem:[%s204_s7] sm:$0xff] %v3170_v34  ;;  %v3172_v50 = vadd.f32 %v2371_v58, %v1216_v26  ;;  %v2429_v31 = vmul.f32 %v3170_v34, %v3170_v34 }
 0x1a4   : > { %2410 = vst [vmem:[%s204_s7 + $0x18] sm:$0xff] %v3171_v19  ;;  %v2432_v22 = vmul.f32 %v3171_v19, %v3171_v19 }
 0x1a5   : > { %2408 = vst [vmem:[%s204_s7 + $0x8] sm:$0xff] %v3172_v50  ;;  %v2415_v17 = vadd.f32 %v3172_v50, %v3170_v34  ;;  %v2430_v52 = vmul.f32 %v3172_v50, %v3172_v50 }
 0x1a7   : > { %v2416_v2 = vadd.f32 %v3169_v44, %v2415_v17  ;;  %v2437_v0 = vadd.f32 %v2430_v52, %v2429_v31 }
 0x1a9   : > { %v2438_v55 = vadd.f32 %v2437_v0, %v2431_v62  ;;  %v2417_v1 = vadd.f32 %v3171_v19, %v2416_v2 }
 0x1ab   : > { %v2418_v43 = vadd.f32 %v3176_v6, %v2417_v1  ;;  %v2439_v18 = vadd.f32 %v2438_v55, %v2432_v22 }
 0x1ad   : > { %v2419_v28 = vadd.f32 %v3180_v24, %v2418_v43  ;;  %v2440_v3 = vadd.f32 %v2439_v18, %v2433_v47 }
 0x1af   : > { %v2420_v63 = vadd.f32 %v3174_v56, %v2419_v28  ;;  %v2441_v29 = vadd.f32 %v2440_v3, %v2434_v49 }
 0x1b1   : > { %v2421_v8 = vadd.f32 %v3178_v15, %v2420_v63  ;;  %v2442_v37 = vadd.f32 %v2441_v29, %v2435_v36 }
 0x1b3   : > { %v2422_v5 = vrot.slane %v2421_v8, 4  ;;  %v2443_v9 = vadd.f32 %v2442_v37, %v2436_v30 }
 0x1b5   : > { %v2423_v4 = vadd.f32 %v2422_v5, %v2421_v8  ;;  %v2444_v12 = vrot.slane %v2443_v9, 4 }
 0x1b7   : > { %v2424_v13 = vrot.slane %v2423_v4, 2  ;;  %v2445_v48 = vadd.f32 %v2444_v12, %v2443_v9 }
 0x1b9   : > { %v2425_v57 = vadd.f32 %v2424_v13, %v2423_v4  ;;  %v2446_v20 = vrot.slane %v2445_v48, 2 }
 0x1bb   : > { %v2426_v60 = vrot.slane %v2425_v57, 1  ;;  %v2447_v11 = vadd.f32 %v2446_v20, %v2445_v48 }
 0x1bd   : > { %v2427_v41 = vadd.f32 %v2426_v60, %v2425_v57  ;;  %v2448_v59 = vrot.slane %v2447_v11, 1 }
 0x1bf   : > { %2428 = vst [vmem:[%s208_s11] sm:$0x1] %v2427_v41  ;;  %v2449_v35 = vadd.f32 %v2448_v59, %v2447_v11 }
 0x1c1   : > { %2450 = vst [vmem:[%s208_s11 + $0x1] sm:$0x1] %v2449_v35 }
 0x1c2 PF: > { %s15_s15 = sadd.s32 1, %s3332_s15  }
 0x1c3   : > { %p12_p4 = scmp.ge.s32.totalorder %s15_s15, 4  }
 0x1c5   :  { %14 = sbr.rel (!%p12_p4) target bundleno = 1 (0x1), region = 84 }

</bundles_post_ra>
